<compile_context>
chip_gen: v7x
topology: tpu7x:2x2x1
jax: 0.10.0
libtpu: 0.0.40
codegen_flags: <defaults>
</compile_context>

<pallas_src>
import math

import jax
import jax.numpy as jnp
from jax.experimental import pallas as pl
from jax.experimental.pallas import tpu as pltpu


# ----------------------------------------------------------------------------
# Fused kernel: per batch element, QSTN stack + quat->rotmat + pos @ rotmat.
# ----------------------------------------------------------------------------
def _point_encoder_kernel(pos_ref,
                          w1_ref, s1_ref, t1_ref,
                          w2_ref, s2_ref, t2_ref,
                          w3_ref, s3_ref, t3_ref,
                          w4_ref, s4_ref, t4_ref,
                          w5_ref, s5_ref, t5_ref,
                          w6_ref, b6_ref,
                          trans_ref, posrot_ref):
    pos = pos_ref[0]                                          # (N, 3) f32
    px = pos[:, 0:1]                                          # (N, 1)
    py = pos[:, 1:2]
    pz = pos[:, 2:3]

    # --- conv1 (contraction K=3): broadcast FMAs on the VPU, f32 -------------
    w1 = w1_ref[...]                                          # (3, 64) f32
    z1 = px * w1[0:1, :] + py * w1[1:2, :] + pz * w1[2:3, :]  # (N, 64)
    h = jnp.maximum(z1 * s1_ref[...] + t1_ref[...], 0.0)

    # --- conv2/conv3/fc1/fc2: bf16 MXU matmul, f32 accumulate, f32 epilogue --
    def lin_bn_relu(a, w_ref, s_ref, t_ref):
        z = jnp.dot(a.astype(jnp.bfloat16), w_ref[...],
                    preferred_element_type=jnp.float32)
        return jnp.maximum(z * s_ref[...] + t_ref[...], 0.0)

    h = lin_bn_relu(h, w2_ref, s2_ref, t2_ref)                # (N, 128)
    h = lin_bn_relu(h, w3_ref, s3_ref, t3_ref)                # (N, 1024)

    # MaxPool1d(N) -- XLU cross-sublane reduce.
    # TODO(synk): for very large N this could become a row-tiled running max,
    # but (N, 1024) f32 fits VMEM comfortably at CMG-Net's N=700.
    g = jnp.max(h, axis=0, keepdims=True)                     # (1, 1024)

    f = lin_bn_relu(g, w4_ref, s4_ref, t4_ref)                # (1, 512)
    f = lin_bn_relu(f, w5_ref, s5_ref, t5_ref)                # (1, 256)

    # fc3 (+ identity quaternion already folded into b6)
    q = jnp.dot(f.astype(jnp.bfloat16), w6_ref[...],
                preferred_element_type=jnp.float32) + b6_ref[...]   # (1, 4)

    # --- quaternion -> rotation matrix, fully on the VPU ---------------------
    qw = q[:, 0:1]
    qx = q[:, 1:2]
    qy = q[:, 2:3]
    qz = q[:, 3:4]
    s = 2.0 / jnp.sum(q * q, axis=1, keepdims=True)           # (1, 1)

    r00 = 1.0 - (qy * qy + qz * qz) * s
    r01 = (qx * qy - qw * qz) * s
    r02 = (qx * qz + qw * qy) * s
    r10 = (qx * qy + qw * qz) * s
    r11 = 1.0 - (qx * qx + qz * qz) * s
    r12 = (qy * qz - qw * qx) * s
    r20 = (qx * qz - qw * qy) * s
    r21 = (qy * qz + qw * qx) * s
    r22 = 1.0 - (qx * qx + qy * qy) * s

    trans_ref[0] = jnp.concatenate(
        [r00, r01, r02, r10, r11, r12, r20, r21, r22], axis=1)      # (1, 9)

    # --- pos @ trans (K=3): broadcast FMAs, pos never re-read from HBM -------
    c0 = px * r00 + py * r10 + pz * r20
    c1 = px * r01 + py * r11 + pz * r21
    c2 = px * r02 + py * r12 + pz * r22
    posrot_ref[0] = jnp.concatenate([c0, c1, c2], axis=1)           # (N, 3)


# ----------------------------------------------------------------------------
# Wrapper
# ----------------------------------------------------------------------------
_QSTN_WEIGHT_KEYS = ['w1t', 's1', 't1', 'w2t', 's2', 't2', 'w3t', 's3', 't3',
                     'w4t', 's4', 't4', 'w5t', 's5', 't5', 'w6t', 'b6']


def point_encoder_forward(pos, knn_idx, knn_idx_l, params):
    """Implements the available part of PointEncoder.forward.

    pos: (B, N, 3) f32; knn_idx / knn_idx_l accepted for signature parity.
    Returns (trans, pos_rotated) -- the `trans` and `pos` outputs of the module.
    """
    del knn_idx, knn_idx_l  # TODO(synk): used only by the un-provided feature branch.
    B, N, _ = pos.shape
    weights = [params[k] for k in _QSTN_WEIGHT_KEYS]

    def full_spec(a):
        nd = a.ndim
        return pl.BlockSpec(a.shape, lambda b, _nd=nd: (0,) * _nd)

    in_specs = [pl.BlockSpec((1, N, 3), lambda b: (b, 0, 0))]
    in_specs += [full_spec(a) for a in weights]

    flops = 2 * B * (N * (3 * 64 + 64 * 128 + 128 * 1024 + 9)
                     + 1024 * 512 + 512 * 256 + 256 * 4)
    bytes_accessed = int(pos.size * 4
                         + sum(int(a.size) * a.dtype.itemsize for a in weights)
                         + B * 9 * 4 + B * N * 3 * 4)

    trans_flat, pos_rot = pl.pallas_call(
        _point_encoder_kernel,
        out_shape=(jax.ShapeDtypeStruct((B, 1, 9), jnp.float32),
                   jax.ShapeDtypeStruct((B, N, 3), jnp.float32)),
        grid=(B,),
        in_specs=in_specs,
        out_specs=(pl.BlockSpec((1, 1, 9), lambda b: (b, 0, 0)),
                   pl.BlockSpec((1, N, 3), lambda b: (b, 0, 0))),
        compiler_params=pltpu.CompilerParams(
            dimension_semantics=("parallel",),
            vmem_limit_bytes=32 * 1024 * 1024),
        cost_estimate=pl.CostEstimate(flops=flops, transcendentals=0,
                                      bytes_accessed=bytes_accessed),
    )(pos, *weights)

    trans = trans_flat.reshape(B, 3, 3)
    return trans, pos_rot


# ----------------------------------------------------------------------------
# Deterministic parameter init (QSTN shapes from __init__), BN eval-mode fold.
# Weights feeding the MXU are stored in bf16; conv1 (VPU path), BN scale/shift
# and biases stay f32.  The identity quaternion is folded into b6.
# ----------------------------------------------------------------------------
def init_qstn_params(key):
    dims = [(3, 64), (64, 128), (128, 1024), (1024, 512), (512, 256), (256, 4)]
    keys = iter(jax.random.split(key, 40))
    params = {}
    for i, (cin, cout) in enumerate(dims, start=1):
        bound = 1.0 / math.sqrt(cin)
        w = jax.random.uniform(next(keys), (cout, cin), jnp.float32, -bound, bound)
        b = jax.random.uniform(next(keys), (cout,), jnp.float32, -bound, bound)
        wt = jnp.transpose(w)                                 # (cin, cout)
        params[f'w{i}t'] = wt if i == 1 else wt.astype(jnp.bfloat16)
        if i < 6:
            gamma = jax.random.uniform(next(keys), (cout,), jnp.float32, 0.5, 1.5)
            beta = 0.1 * jax.random.normal(next(keys), (cout,), jnp.float32)
            mean = 0.1 * jax.random.normal(next(keys), (cout,), jnp.float32)
            var = jax.random.uniform(next(keys), (cout,), jnp.float32, 0.5, 1.5)
            scale = gamma / jnp.sqrt(var + 1e-5)
            shift = beta - mean * scale
            params[f's{i}'] = scale[None, :]                  # (1, cout)
            params[f't{i}'] = (scale * b + shift)[None, :]    # conv bias folded in
        else:
            iden = jnp.array([[1.0, 0.0, 0.0, 0.0]], jnp.float32)
            params['b6'] = b[None, :] + iden                  # identity quat folded in
    return params


# ----------------------------------------------------------------------------
# Pure-JAX reference (same bf16 operand quantization) for correctness checking
# ----------------------------------------------------------------------------
def point_encoder_ref(pos, p):
    def lin(a, i):
        z = jnp.dot(a.astype(jnp.bfloat16), p[f'w{i}t'],
                    preferred_element_type=jnp.float32)
        return jnp.maximum(z * p[f's{i}'] + p[f't{i}'], 0.0)

    w1 = p['w1t']
    h = (pos[..., 0:1] * w1[0] + pos[..., 1:2] * w1[1] + pos[..., 2:3] * w1[2])
    h = jnp.maximum(h * p['s1'] + p['t1'], 0.0)               # (B, N, 64)
    h = lin(h, 2)                                             # (B, N, 128)
    h = lin(h, 3)                                             # (B, N, 1024)
    g = jnp.max(h, axis=1)                                    # (B, 1024)
    f = lin(g, 4)                                             # (B, 512)
    f = lin(f, 5)                                             # (B, 256)
    q = jnp.dot(f.astype(jnp.bfloat16), p['w6t'],
                preferred_element_type=jnp.float32) + p['b6']  # (B, 4) (iden folded)

    s = 2.0 / jnp.sum(q * q, axis=1, keepdims=True)           # (B, 1)
    w, x, y, z = q[:, 0:1], q[:, 1:2], q[:, 2:3], q[:, 3:4]
    trans = jnp.concatenate([
        1.0 - (y * y + z * z) * s, (x * y - w * z) * s, (x * z + w * y) * s,
        (x * y + w * z) * s, 1.0 - (x * x + z * z) * s, (y * z - w * x) * s,
        (x * z - w * y) * s, (y * z + w * x) * s, 1.0 - (x * x + y * y) * s,
    ], axis=1).reshape(-1, 3, 3)
    pos_rot = jnp.einsum('bnd,bde->bne', pos, trans)
    return trans, pos_rot


if __name__ == "__main__":
    key = jax.random.PRNGKey(0)
    k_par, k_pos = jax.random.split(key)

    B, N = 2, 64                     # small num_points (QSTN built with num_points=N)
    KNN_L1, KNN_L2 = 16, 32

    params = init_qstn_params(k_par)
    pos = jax.random.normal(k_pos, (B, N, 3), jnp.float32)
    knn_idx = jnp.zeros((B, N, KNN_L1), jnp.int32)            # unused (see TODO)
    knn_idx_l = jnp.zeros((B, N, KNN_L2), jnp.int32)          # unused (see TODO)

    trans, pos_rot = point_encoder_forward(pos, knn_idx, knn_idx_l, params)
    trans = jax.block_until_ready(trans)
    pos_rot = jax.block_until_ready(pos_rot)

    # correctness check against a pure-JAX reference with identical numerics
    trans_ref, pos_rot_ref = point_encoder_ref(pos, params)
    assert trans.shape == (B, 3, 3) and pos_rot.shape == (B, N, 3)
    assert jnp.allclose(trans, trans_ref, rtol=2e-2, atol=2e-2)
    assert jnp.allclose(pos_rot, pos_rot_ref, rtol=2e-2, atol=2e-2)

    print("KERNEL_OK")
</pallas_src>

<mosaic_0001>
module attributes {stable_mosaic.version = 11 : i64} {
  func.func @_point_encoder_kernel(%arg0: i32, %arg1: memref<1x64x3xf32, #tpu.memory_space<vmem>>, %arg2: memref<3x64xf32, #tpu.memory_space<vmem>>, %arg3: memref<1x64xf32, #tpu.memory_space<vmem>>, %arg4: memref<1x64xf32, #tpu.memory_space<vmem>>, %arg5: memref<64x128xbf16, #tpu.memory_space<vmem>>, %arg6: memref<1x128xf32, #tpu.memory_space<vmem>>, %arg7: memref<1x128xf32, #tpu.memory_space<vmem>>, %arg8: memref<128x1024xbf16, #tpu.memory_space<vmem>>, %arg9: memref<1x1024xf32, #tpu.memory_space<vmem>>, %arg10: memref<1x1024xf32, #tpu.memory_space<vmem>>, %arg11: memref<1024x512xbf16, #tpu.memory_space<vmem>>, %arg12: memref<1x512xf32, #tpu.memory_space<vmem>>, %arg13: memref<1x512xf32, #tpu.memory_space<vmem>>, %arg14: memref<512x256xbf16, #tpu.memory_space<vmem>>, %arg15: memref<1x256xf32, #tpu.memory_space<vmem>>, %arg16: memref<1x256xf32, #tpu.memory_space<vmem>>, %arg17: memref<256x4xbf16, #tpu.memory_space<vmem>>, %arg18: memref<1x4xf32, #tpu.memory_space<vmem>>, %arg19: memref<1x1x9xf32, #tpu.memory_space<vmem>>, %arg20: memref<1x64x3xf32, #tpu.memory_space<vmem>>) attributes {dimension_semantics = [#tpu.dimension_semantics<parallel>], iteration_bounds = array<i64: 2>, scalar_prefetch = 0 : i64, scratch_operands = 0 : i64, tpu.core_type = #tpu.core_type<tc>, window_params = [{transform_indices = @transform_0, window_bounds = array<i64: 1, 64, 3>}, {pipeline_mode = #tpu.pipeline_mode<synchronous>, transform_indices = @transform_1, window_bounds = array<i64: 3, 64>}, {pipeline_mode = #tpu.pipeline_mode<synchronous>, transform_indices = @transform_2, window_bounds = array<i64: 1, 64>}, {pipeline_mode = #tpu.pipeline_mode<synchronous>, transform_indices = @transform_3, window_bounds = array<i64: 1, 64>}, {pipeline_mode = #tpu.pipeline_mode<synchronous>, transform_indices = @transform_4, window_bounds = array<i64: 64, 128>}, {pipeline_mode = #tpu.pipeline_mode<synchronous>, transform_indices = @transform_5, window_bounds = array<i64: 1, 128>}, {pipeline_mode = #tpu.pipeline_mode<synchronous>, transform_indices = @transform_6, window_bounds = array<i64: 1, 128>}, {pipeline_mode = #tpu.pipeline_mode<synchronous>, transform_indices = @transform_7, window_bounds = array<i64: 128, 1024>}, {pipeline_mode = #tpu.pipeline_mode<synchronous>, transform_indices = @transform_8, window_bounds = array<i64: 1, 1024>}, {pipeline_mode = #tpu.pipeline_mode<synchronous>, transform_indices = @transform_9, window_bounds = array<i64: 1, 1024>}, {pipeline_mode = #tpu.pipeline_mode<synchronous>, transform_indices = @transform_10, window_bounds = array<i64: 1024, 512>}, {pipeline_mode = #tpu.pipeline_mode<synchronous>, transform_indices = @transform_11, window_bounds = array<i64: 1, 512>}, {pipeline_mode = #tpu.pipeline_mode<synchronous>, transform_indices = @transform_12, window_bounds = array<i64: 1, 512>}, {pipeline_mode = #tpu.pipeline_mode<synchronous>, transform_indices = @transform_13, window_bounds = array<i64: 512, 256>}, {pipeline_mode = #tpu.pipeline_mode<synchronous>, transform_indices = @transform_14, window_bounds = array<i64: 1, 256>}, {pipeline_mode = #tpu.pipeline_mode<synchronous>, transform_indices = @transform_15, window_bounds = array<i64: 1, 256>}, {pipeline_mode = #tpu.pipeline_mode<synchronous>, transform_indices = @transform_16, window_bounds = array<i64: 256, 4>}, {pipeline_mode = #tpu.pipeline_mode<synchronous>, transform_indices = @transform_17, window_bounds = array<i64: 1, 4>}, {transform_indices = @transform_18, window_bounds = array<i64: 1, 1, 9>}, {transform_indices = @transform_19, window_bounds = array<i64: 1, 64, 3>}]} {
    %c0 = arith.constant 0 : index
    %c0_0 = arith.constant 0 : index
    %c0_1 = arith.constant 0 : index
    %0 = vector.load %arg1[%c0, %c0_0, %c0_1] : memref<1x64x3xf32, #tpu.memory_space<vmem>>, vector<1x64x3xf32>
    %1 = vector.shape_cast %0 : vector<1x64x3xf32> to vector<64x3xf32>
    %2 = vector.extract_strided_slice %1 {offsets = [0, 0], sizes = [64, 1], strides = [1, 1]} : vector<64x3xf32> to vector<64x1xf32>
    %3 = vector.extract_strided_slice %1 {offsets = [0, 1], sizes = [64, 1], strides = [1, 1]} : vector<64x3xf32> to vector<64x1xf32>
    %4 = vector.extract_strided_slice %1 {offsets = [0, 2], sizes = [64, 1], strides = [1, 1]} : vector<64x3xf32> to vector<64x1xf32>
    %c0_2 = arith.constant 0 : index
    %c0_3 = arith.constant 0 : index
    %5 = vector.load %arg2[%c0_2, %c0_3] : memref<3x64xf32, #tpu.memory_space<vmem>>, vector<3x64xf32>
    %6 = vector.extract_strided_slice %5 {offsets = [0, 0], sizes = [1, 64], strides = [1, 1]} : vector<3x64xf32> to vector<1x64xf32>
    %7 = vector.broadcast %2 : vector<64x1xf32> to vector<64x64xf32>
    %8 = vector.broadcast %6 : vector<1x64xf32> to vector<64x64xf32>
    %9 = arith.mulf %7, %8 : vector<64x64xf32>
    %10 = vector.extract_strided_slice %5 {offsets = [1, 0], sizes = [1, 64], strides = [1, 1]} : vector<3x64xf32> to vector<1x64xf32>
    %11 = vector.broadcast %3 : vector<64x1xf32> to vector<64x64xf32>
    %12 = vector.broadcast %10 : vector<1x64xf32> to vector<64x64xf32>
    %13 = arith.mulf %11, %12 : vector<64x64xf32>
    %14 = arith.addf %9, %13 : vector<64x64xf32>
    %15 = vector.extract_strided_slice %5 {offsets = [2, 0], sizes = [1, 64], strides = [1, 1]} : vector<3x64xf32> to vector<1x64xf32>
    %16 = vector.broadcast %4 : vector<64x1xf32> to vector<64x64xf32>
    %17 = vector.broadcast %15 : vector<1x64xf32> to vector<64x64xf32>
    %18 = arith.mulf %16, %17 : vector<64x64xf32>
    %19 = arith.addf %14, %18 : vector<64x64xf32>
    %c0_4 = arith.constant 0 : index
    %c0_5 = arith.constant 0 : index
    %20 = vector.load %arg3[%c0_4, %c0_5] : memref<1x64xf32, #tpu.memory_space<vmem>>, vector<1x64xf32>
    %21 = vector.broadcast %20 : vector<1x64xf32> to vector<64x64xf32>
    %22 = arith.mulf %19, %21 : vector<64x64xf32>
    %c0_6 = arith.constant 0 : index
    %c0_7 = arith.constant 0 : index
    %23 = vector.load %arg4[%c0_6, %c0_7] : memref<1x64xf32, #tpu.memory_space<vmem>>, vector<1x64xf32>
    %24 = vector.broadcast %23 : vector<1x64xf32> to vector<64x64xf32>
    %25 = arith.addf %22, %24 : vector<64x64xf32>
    %cst = arith.constant 0.000000e+00 : f32
    %26 = vector.broadcast %cst : f32 to vector<64x64xf32>
    %27 = arith.maximumf %25, %26 : vector<64x64xf32>
    %28 = arith.truncf %27 : vector<64x64xf32> to vector<64x64xbf16>
    %c0_8 = arith.constant 0 : index
    %c0_9 = arith.constant 0 : index
    %29 = vector.load %arg5[%c0_8, %c0_9] : memref<64x128xbf16, #tpu.memory_space<vmem>>, vector<64x128xbf16>
    %cst_10 = arith.constant dense<0.000000e+00> : vector<64x128xf32>
    %30 = tpu.matmul %28, %29, %cst_10 {dimension_numbers = #tpu.dot_dimension_numbers<[1], [0], [0], [1], [0, 0, 1, 1], [], []>} : vector<64x64xbf16>, vector<64x128xbf16>, vector<64x128xf32> -> vector<64x128xf32>
    %c0_11 = arith.constant 0 : index
    %c0_12 = arith.constant 0 : index
    %31 = vector.load %arg6[%c0_11, %c0_12] : memref<1x128xf32, #tpu.memory_space<vmem>>, vector<1x128xf32>
    %32 = vector.broadcast %31 : vector<1x128xf32> to vector<64x128xf32>
    %33 = arith.mulf %30, %32 : vector<64x128xf32>
    %c0_13 = arith.constant 0 : index
    %c0_14 = arith.constant 0 : index
    %34 = vector.load %arg7[%c0_13, %c0_14] : memref<1x128xf32, #tpu.memory_space<vmem>>, vector<1x128xf32>
    %35 = vector.broadcast %34 : vector<1x128xf32> to vector<64x128xf32>
    %36 = arith.addf %33, %35 : vector<64x128xf32>
    %cst_15 = arith.constant 0.000000e+00 : f32
    %37 = vector.broadcast %cst_15 : f32 to vector<64x128xf32>
    %38 = arith.maximumf %36, %37 : vector<64x128xf32>
    %39 = arith.truncf %38 : vector<64x128xf32> to vector<64x128xbf16>
    %c0_16 = arith.constant 0 : index
    %c0_17 = arith.constant 0 : index
    %40 = vector.load %arg8[%c0_16, %c0_17] : memref<128x1024xbf16, #tpu.memory_space<vmem>>, vector<128x1024xbf16>
    %cst_18 = arith.constant dense<0.000000e+00> : vector<64x1024xf32>
    %41 = tpu.matmul %39, %40, %cst_18 {dimension_numbers = #tpu.dot_dimension_numbers<[1], [0], [0], [1], [0, 0, 1, 1], [], []>} : vector<64x128xbf16>, vector<128x1024xbf16>, vector<64x1024xf32> -> vector<64x1024xf32>
    %c0_19 = arith.constant 0 : index
    %c0_20 = arith.constant 0 : index
    %42 = vector.load %arg9[%c0_19, %c0_20] : memref<1x1024xf32, #tpu.memory_space<vmem>>, vector<1x1024xf32>
    %43 = vector.broadcast %42 : vector<1x1024xf32> to vector<64x1024xf32>
    %44 = arith.mulf %41, %43 : vector<64x1024xf32>
    %c0_21 = arith.constant 0 : index
    %c0_22 = arith.constant 0 : index
    %45 = vector.load %arg10[%c0_21, %c0_22] : memref<1x1024xf32, #tpu.memory_space<vmem>>, vector<1x1024xf32>
    %46 = vector.broadcast %45 : vector<1x1024xf32> to vector<64x1024xf32>
    %47 = arith.addf %44, %46 : vector<64x1024xf32>
    %cst_23 = arith.constant 0.000000e+00 : f32
    %48 = vector.broadcast %cst_23 : f32 to vector<64x1024xf32>
    %49 = arith.maximumf %47, %48 : vector<64x1024xf32>
    %cst_24 = arith.constant dense<0xFF800000> : vector<1024xf32>
    %50 = vector.multi_reduction <maximumf>, %49, %cst_24 [0] : vector<64x1024xf32> to vector<1024xf32>
    %51 = vector.shape_cast %50 : vector<1024xf32> to vector<1x1024xf32>
    %52 = arith.truncf %51 : vector<1x1024xf32> to vector<1x1024xbf16>
    %c0_25 = arith.constant 0 : index
    %c0_26 = arith.constant 0 : index
    %53 = vector.load %arg11[%c0_25, %c0_26] : memref<1024x512xbf16, #tpu.memory_space<vmem>>, vector<1024x512xbf16>
    %cst_27 = arith.constant dense<0.000000e+00> : vector<1x512xf32>
    %54 = tpu.matmul %52, %53, %cst_27 {dimension_numbers = #tpu.dot_dimension_numbers<[1], [0], [0], [1], [0, 0, 1, 1], [], []>} : vector<1x1024xbf16>, vector<1024x512xbf16>, vector<1x512xf32> -> vector<1x512xf32>
    %c0_28 = arith.constant 0 : index
    %c0_29 = arith.constant 0 : index
    %55 = vector.load %arg12[%c0_28, %c0_29] : memref<1x512xf32, #tpu.memory_space<vmem>>, vector<1x512xf32>
    %56 = arith.mulf %54, %55 : vector<1x512xf32>
    %c0_30 = arith.constant 0 : index
    %c0_31 = arith.constant 0 : index
    %57 = vector.load %arg13[%c0_30, %c0_31] : memref<1x512xf32, #tpu.memory_space<vmem>>, vector<1x512xf32>
    %58 = arith.addf %56, %57 : vector<1x512xf32>
    %cst_32 = arith.constant 0.000000e+00 : f32
    %59 = vector.broadcast %cst_32 : f32 to vector<1x512xf32>
    %60 = arith.maximumf %58, %59 : vector<1x512xf32>
    %61 = arith.truncf %60 : vector<1x512xf32> to vector<1x512xbf16>
    %c0_33 = arith.constant 0 : index
    %c0_34 = arith.constant 0 : index
    %62 = vector.load %arg14[%c0_33, %c0_34] : memref<512x256xbf16, #tpu.memory_space<vmem>>, vector<512x256xbf16>
    %cst_35 = arith.constant dense<0.000000e+00> : vector<1x256xf32>
    %63 = tpu.matmul %61, %62, %cst_35 {dimension_numbers = #tpu.dot_dimension_numbers<[1], [0], [0], [1], [0, 0, 1, 1], [], []>} : vector<1x512xbf16>, vector<512x256xbf16>, vector<1x256xf32> -> vector<1x256xf32>
    %c0_36 = arith.constant 0 : index
    %c0_37 = arith.constant 0 : index
    %64 = vector.load %arg15[%c0_36, %c0_37] : memref<1x256xf32, #tpu.memory_space<vmem>>, vector<1x256xf32>
    %65 = arith.mulf %63, %64 : vector<1x256xf32>
    %c0_38 = arith.constant 0 : index
    %c0_39 = arith.constant 0 : index
    %66 = vector.load %arg16[%c0_38, %c0_39] : memref<1x256xf32, #tpu.memory_space<vmem>>, vector<1x256xf32>
    %67 = arith.addf %65, %66 : vector<1x256xf32>
    %cst_40 = arith.constant 0.000000e+00 : f32
    %68 = vector.broadcast %cst_40 : f32 to vector<1x256xf32>
    %69 = arith.maximumf %67, %68 : vector<1x256xf32>
    %70 = arith.truncf %69 : vector<1x256xf32> to vector<1x256xbf16>
    %c0_41 = arith.constant 0 : index
    %c0_42 = arith.constant 0 : index
    %71 = vector.load %arg17[%c0_41, %c0_42] : memref<256x4xbf16, #tpu.memory_space<vmem>>, vector<256x4xbf16>
    %cst_43 = arith.constant dense<0.000000e+00> : vector<1x4xf32>
    %72 = tpu.matmul %70, %71, %cst_43 {dimension_numbers = #tpu.dot_dimension_numbers<[1], [0], [0], [1], [0, 0, 1, 1], [], []>} : vector<1x256xbf16>, vector<256x4xbf16>, vector<1x4xf32> -> vector<1x4xf32>
    %c0_44 = arith.constant 0 : index
    %c0_45 = arith.constant 0 : index
    %73 = vector.load %arg18[%c0_44, %c0_45] : memref<1x4xf32, #tpu.memory_space<vmem>>, vector<1x4xf32>
    %74 = arith.addf %72, %73 : vector<1x4xf32>
    %75 = vector.extract_strided_slice %74 {offsets = [0, 0], sizes = [1, 1], strides = [1, 1]} : vector<1x4xf32> to vector<1x1xf32>
    %76 = vector.extract_strided_slice %74 {offsets = [0, 1], sizes = [1, 1], strides = [1, 1]} : vector<1x4xf32> to vector<1x1xf32>
    %77 = vector.extract_strided_slice %74 {offsets = [0, 2], sizes = [1, 1], strides = [1, 1]} : vector<1x4xf32> to vector<1x1xf32>
    %78 = vector.extract_strided_slice %74 {offsets = [0, 3], sizes = [1, 1], strides = [1, 1]} : vector<1x4xf32> to vector<1x1xf32>
    %79 = arith.mulf %74, %74 : vector<1x4xf32>
    %cst_46 = arith.constant dense<0.000000e+00> : vector<1xf32>
    %80 = vector.multi_reduction <add>, %79, %cst_46 [1] : vector<1x4xf32> to vector<1xf32>
    %81 = vector.shape_cast %80 : vector<1xf32> to vector<1x1xf32>
    %cst_47 = arith.constant 2.000000e+00 : f32
    %82 = vector.broadcast %cst_47 : f32 to vector<1x1xf32>
    %83 = arith.divf %82, %81 : vector<1x1xf32>
    %84 = arith.mulf %77, %77 : vector<1x1xf32>
    %85 = arith.mulf %78, %78 : vector<1x1xf32>
    %86 = arith.addf %84, %85 : vector<1x1xf32>
    %87 = arith.mulf %86, %83 : vector<1x1xf32>
    %cst_48 = arith.constant 1.000000e+00 : f32
    %88 = vector.broadcast %cst_48 : f32 to vector<1x1xf32>
    %89 = arith.subf %88, %87 : vector<1x1xf32>
    %90 = arith.mulf %76, %77 : vector<1x1xf32>
    %91 = arith.mulf %75, %78 : vector<1x1xf32>
    %92 = arith.subf %90, %91 : vector<1x1xf32>
    %93 = arith.mulf %92, %83 : vector<1x1xf32>
    %94 = arith.mulf %76, %78 : vector<1x1xf32>
    %95 = arith.mulf %75, %77 : vector<1x1xf32>
    %96 = arith.addf %94, %95 : vector<1x1xf32>
    %97 = arith.mulf %96, %83 : vector<1x1xf32>
    %98 = arith.mulf %76, %77 : vector<1x1xf32>
    %99 = arith.mulf %75, %78 : vector<1x1xf32>
    %100 = arith.addf %98, %99 : vector<1x1xf32>
    %101 = arith.mulf %100, %83 : vector<1x1xf32>
    %102 = arith.mulf %76, %76 : vector<1x1xf32>
    %103 = arith.mulf %78, %78 : vector<1x1xf32>
    %104 = arith.addf %102, %103 : vector<1x1xf32>
    %105 = arith.mulf %104, %83 : vector<1x1xf32>
    %cst_49 = arith.constant 1.000000e+00 : f32
    %106 = vector.broadcast %cst_49 : f32 to vector<1x1xf32>
    %107 = arith.subf %106, %105 : vector<1x1xf32>
    %108 = arith.mulf %77, %78 : vector<1x1xf32>
    %109 = arith.mulf %75, %76 : vector<1x1xf32>
    %110 = arith.subf %108, %109 : vector<1x1xf32>
    %111 = arith.mulf %110, %83 : vector<1x1xf32>
    %112 = arith.mulf %76, %78 : vector<1x1xf32>
    %113 = arith.mulf %75, %77 : vector<1x1xf32>
    %114 = arith.subf %112, %113 : vector<1x1xf32>
    %115 = arith.mulf %114, %83 : vector<1x1xf32>
    %116 = arith.mulf %77, %78 : vector<1x1xf32>
    %117 = arith.mulf %75, %76 : vector<1x1xf32>
    %118 = arith.addf %116, %117 : vector<1x1xf32>
    %119 = arith.mulf %118, %83 : vector<1x1xf32>
    %120 = arith.mulf %76, %76 : vector<1x1xf32>
    %121 = arith.mulf %77, %77 : vector<1x1xf32>
    %122 = arith.addf %120, %121 : vector<1x1xf32>
    %123 = arith.mulf %122, %83 : vector<1x1xf32>
    %cst_50 = arith.constant 1.000000e+00 : f32
    %124 = vector.broadcast %cst_50 : f32 to vector<1x1xf32>
    %125 = arith.subf %124, %123 : vector<1x1xf32>
    %126 = tpu.concatenate %89, %93, %97, %101, %107, %111, %115, %119, %125 in 1 : vector<1x1xf32>, vector<1x1xf32>, vector<1x1xf32>, vector<1x1xf32>, vector<1x1xf32>, vector<1x1xf32>, vector<1x1xf32>, vector<1x1xf32>, vector<1x1xf32> -> vector<1x9xf32>
    %c0_51 = arith.constant 0 : index
    %c0_52 = arith.constant 0 : index
    %c0_53 = arith.constant 0 : index
    %127 = vector.load %arg19[%c0_51, %c0_52, %c0_53] : memref<1x1x9xf32, #tpu.memory_space<vmem>>, vector<1x1x9xf32>
    %128 = vector.shape_cast %127 : vector<1x1x9xf32> to vector<1x9xf32>
    %129 = vector.shape_cast %126 : vector<1x9xf32> to vector<1x1x9xf32>
    tpu.vector_store %arg19[%c0_51, %c0_52, %c0_53], %129 {strides = array<i32>} : memref<1x1x9xf32, #tpu.memory_space<vmem>>, vector<1x1x9xf32>,
    %130 = vector.broadcast %89 : vector<1x1xf32> to vector<64x1xf32>
    %131 = arith.mulf %2, %130 : vector<64x1xf32>
    %132 = vector.broadcast %101 : vector<1x1xf32> to vector<64x1xf32>
    %133 = arith.mulf %3, %132 : vector<64x1xf32>
    %134 = arith.addf %131, %133 : vector<64x1xf32>
    %135 = vector.broadcast %115 : vector<1x1xf32> to vector<64x1xf32>
    %136 = arith.mulf %4, %135 : vector<64x1xf32>
    %137 = arith.addf %134, %136 : vector<64x1xf32>
    %138 = vector.broadcast %93 : vector<1x1xf32> to vector<64x1xf32>
    %139 = arith.mulf %2, %138 : vector<64x1xf32>
    %140 = vector.broadcast %107 : vector<1x1xf32> to vector<64x1xf32>
    %141 = arith.mulf %3, %140 : vector<64x1xf32>
    %142 = arith.addf %139, %141 : vector<64x1xf32>
    %143 = vector.broadcast %119 : vector<1x1xf32> to vector<64x1xf32>
    %144 = arith.mulf %4, %143 : vector<64x1xf32>
    %145 = arith.addf %142, %144 : vector<64x1xf32>
    %146 = vector.broadcast %97 : vector<1x1xf32> to vector<64x1xf32>
    %147 = arith.mulf %2, %146 : vector<64x1xf32>
    %148 = vector.broadcast %111 : vector<1x1xf32> to vector<64x1xf32>
    %149 = arith.mulf %3, %148 : vector<64x1xf32>
    %150 = arith.addf %147, %149 : vector<64x1xf32>
    %151 = vector.broadcast %125 : vector<1x1xf32> to vector<64x1xf32>
    %152 = arith.mulf %4, %151 : vector<64x1xf32>
    %153 = arith.addf %150, %152 : vector<64x1xf32>
    %154 = tpu.concatenate %137, %145, %153 in 1 : vector<64x1xf32>, vector<64x1xf32>, vector<64x1xf32> -> vector<64x3xf32>
    %c0_54 = arith.constant 0 : index
    %c0_55 = arith.constant 0 : index
    %c0_56 = arith.constant 0 : index
    %155 = vector.load %arg20[%c0_54, %c0_55, %c0_56] : memref<1x64x3xf32, #tpu.memory_space<vmem>>, vector<1x64x3xf32>
    %156 = vector.shape_cast %155 : vector<1x64x3xf32> to vector<64x3xf32>
    %157 = vector.shape_cast %154 : vector<64x3xf32> to vector<1x64x3xf32>
    tpu.vector_store %arg20[%c0_54, %c0_55, %c0_56], %157 {strides = array<i32>} : memref<1x64x3xf32, #tpu.memory_space<vmem>>, vector<1x64x3xf32>,
    return
  }
  func.func @transform_0(%arg0: i32) -> (i32, i32, i32) {
    %c0_i32 = arith.constant 0 : i32
    %c0_i32_0 = arith.constant 0 : i32
    %c0_i32_1 = arith.constant 0 : i32
    return %arg0, %c0_i32, %c0_i32_0 : i32, i32, i32
  }
  func.func @transform_1(%arg0: i32) -> (i32, i32) {
    %c0_i32 = arith.constant 0 : i32
    %c0_i32_0 = arith.constant 0 : i32
    %c0_i32_1 = arith.constant 0 : i32
    return %c0_i32, %c0_i32_0 : i32, i32
  }
  func.func @transform_2(%arg0: i32) -> (i32, i32) {
    %c0_i32 = arith.constant 0 : i32
    %c0_i32_0 = arith.constant 0 : i32
    %c0_i32_1 = arith.constant 0 : i32
    return %c0_i32, %c0_i32_0 : i32, i32
  }
  func.func @transform_3(%arg0: i32) -> (i32, i32) {
    %c0_i32 = arith.constant 0 : i32
    %c0_i32_0 = arith.constant 0 : i32
    %c0_i32_1 = arith.constant 0 : i32
    return %c0_i32, %c0_i32_0 : i32, i32
  }
  func.func @transform_4(%arg0: i32) -> (i32, i32) {
    %c0_i32 = arith.constant 0 : i32
    %c0_i32_0 = arith.constant 0 : i32
    %c0_i32_1 = arith.constant 0 : i32
    return %c0_i32, %c0_i32_0 : i32, i32
  }
  func.func @transform_5(%arg0: i32) -> (i32, i32) {
    %c0_i32 = arith.constant 0 : i32
    %c0_i32_0 = arith.constant 0 : i32
    %c0_i32_1 = arith.constant 0 : i32
    return %c0_i32, %c0_i32_0 : i32, i32
  }
  func.func @transform_6(%arg0: i32) -> (i32, i32) {
    %c0_i32 = arith.constant 0 : i32
    %c0_i32_0 = arith.constant 0 : i32
    %c0_i32_1 = arith.constant 0 : i32
    return %c0_i32, %c0_i32_0 : i32, i32
  }
  func.func @transform_7(%arg0: i32) -> (i32, i32) {
    %c0_i32 = arith.constant 0 : i32
    %c0_i32_0 = arith.constant 0 : i32
    %c0_i32_1 = arith.constant 0 : i32
    return %c0_i32, %c0_i32_0 : i32, i32
  }
  func.func @transform_8(%arg0: i32) -> (i32, i32) {
    %c0_i32 = arith.constant 0 : i32
    %c0_i32_0 = arith.constant 0 : i32
    %c0_i32_1 = arith.constant 0 : i32
    return %c0_i32, %c0_i32_0 : i32, i32
  }
  func.func @transform_9(%arg0: i32) -> (i32, i32) {
    %c0_i32 = arith.constant 0 : i32
    %c0_i32_0 = arith.constant 0 : i32
    %c0_i32_1 = arith.constant 0 : i32
    return %c0_i32, %c0_i32_0 : i32, i32
  }
  func.func @transform_10(%arg0: i32) -> (i32, i32) {
    %c0_i32 = arith.constant 0 : i32
    %c0_i32_0 = arith.constant 0 : i32
    %c0_i32_1 = arith.constant 0 : i32
    return %c0_i32, %c0_i32_0 : i32, i32
  }
  func.func @transform_11(%arg0: i32) -> (i32, i32) {
    %c0_i32 = arith.constant 0 : i32
    %c0_i32_0 = arith.constant 0 : i32
    %c0_i32_1 = arith.constant 0 : i32
    return %c0_i32, %c0_i32_0 : i32, i32
  }
  func.func @transform_12(%arg0: i32) -> (i32, i32) {
    %c0_i32 = arith.constant 0 : i32
    %c0_i32_0 = arith.constant 0 : i32
    %c0_i32_1 = arith.constant 0 : i32
    return %c0_i32, %c0_i32_0 : i32, i32
  }
  func.func @transform_13(%arg0: i32) -> (i32, i32) {
    %c0_i32 = arith.constant 0 : i32
    %c0_i32_0 = arith.constant 0 : i32
    %c0_i32_1 = arith.constant 0 : i32
    return %c0_i32, %c0_i32_0 : i32, i32
  }
  func.func @transform_14(%arg0: i32) -> (i32, i32) {
    %c0_i32 = arith.constant 0 : i32
    %c0_i32_0 = arith.constant 0 : i32
    %c0_i32_1 = arith.constant 0 : i32
    return %c0_i32, %c0_i32_0 : i32, i32
  }
  func.func @transform_15(%arg0: i32) -> (i32, i32) {
    %c0_i32 = arith.constant 0 : i32
    %c0_i32_0 = arith.constant 0 : i32
    %c0_i32_1 = arith.constant 0 : i32
    return %c0_i32, %c0_i32_0 : i32, i32
  }
  func.func @transform_16(%arg0: i32) -> (i32, i32) {
    %c0_i32 = arith.constant 0 : i32
    %c0_i32_0 = arith.constant 0 : i32
    %c0_i32_1 = arith.constant 0 : i32
    return %c0_i32, %c0_i32_0 : i32, i32
  }
  func.func @transform_17(%arg0: i32) -> (i32, i32) {
    %c0_i32 = arith.constant 0 : i32
    %c0_i32_0 = arith.constant 0 : i32
    %c0_i32_1 = arith.constant 0 : i32
    return %c0_i32, %c0_i32_0 : i32, i32
  }
  func.func @transform_18(%arg0: i32) -> (i32, i32, i32) {
    %c0_i32 = arith.constant 0 : i32
    %c0_i32_0 = arith.constant 0 : i32
    %c0_i32_1 = arith.constant 0 : i32
    return %arg0, %c0_i32, %c0_i32_0 : i32, i32, i32
  }
  func.func @transform_19(%arg0: i32) -> (i32, i32, i32) {
    %c0_i32 = arith.constant 0 : i32
    %c0_i32_0 = arith.constant 0 : i32
    %c0_i32_1 = arith.constant 0 : i32
    return %arg0, %c0_i32, %c0_i32_0 : i32, i32, i32
  }
}

</mosaic_0001>

<bundles_post_ra>
// kernel: tpu_custom_call.1
= control target key start
LH: loop header
LB: loop body
LE: loop exit
PB: predicated region body
PF: predicated region fallthrough
CT: control target
= control target key end

     0   :  { %s7773_s0 = inlined_call_operand.vmem [shape: f32[2,64,3], index: 0, kind: input, shape index: {}]   ;;  %s7774_s1 = inlined_call_operand.vmem [shape: f32[3,64], index: 1, kind: input, shape index: {}]   ;;  %s7775_s2 = inlined_call_operand.vmem [shape: f32[1,64], index: 2, kind: input, shape index: {}]   ;;  %s7776_s3 = inlined_call_operand.vmem [shape: f32[1,64], index: 3, kind: input, shape index: {}]   ;;  %s7777_s4 = inlined_call_operand.vmem [shape: bf16[64,128], index: 4, kind: input, shape index: {}]   ;;  %s7778_s5 = inlined_call_operand.vmem [shape: f32[1,128], index: 5, kind: input, shape index: {}]   ;;  %s7779_s6 = inlined_call_operand.vmem [shape: f32[1,128], index: 6, kind: input, shape index: {}]   ;;  %s7780_s7 = inlined_call_operand.hbm [shape: bf16[128,1024], index: 7, kind: input, shape index: {}]   ;;  %s7781_s8 = inlined_call_operand.vmem [shape: f32[1,1024], index: 8, kind: input, shape index: {}]   ;;  %s7782_s9 = inlined_call_operand.vmem [shape: f32[1,1024], index: 9, kind: input, shape index: {}]   ;;  %s7783_s10 = inlined_call_operand.hbm [shape: bf16[1024,512], index: 10, kind: input, shape index: {}]   ;;  %s7784_s11 = inlined_call_operand.vmem [shape: f32[1,512], index: 11, kind: input, shape index: {}]   ;;  %s7785_s12 = inlined_call_operand.vmem [shape: f32[1,512], index: 12, kind: input, shape index: {}]   ;;  %s7786_s13 = inlined_call_operand.hbm [shape: bf16[512,256], index: 13, kind: input, shape index: {}]   ;;  %s7787_s14 = inlined_call_operand.vmem [shape: f32[1,256], index: 14, kind: input, shape index: {}]   ;;  %s7788_s15 = inlined_call_operand.vmem [shape: f32[1,256], index: 15, kind: input, shape index: {}]   ;;  %s7789_s16 = inlined_call_operand.vmem [shape: bf16[256,4], index: 16, kind: input, shape index: {}]   ;;  %s7790_s17 = inlined_call_operand.vmem [shape: f32[1,4], index: 17, kind: input, shape index: {}]   ;;  %s7791_s18 = inlined_call_operand.hbm [shape: f32[2,1,9], index: 18, kind: output, shape index: {0}]   ;;  %s7792_s19 = inlined_call_operand.vmem [shape: f32[2,64,3], index: 19, kind: output, shape index: {1}]  }
   0x1   :  { %7807 = sst [smem:[#allocation20_spill]] %s7773_s0 }
   0x2   :  { %7808 = sst [smem:[#allocation21_spill]] %s7774_s1 }
   0x3   :  { %7809 = sst [smem:[#allocation22_spill]] %s7775_s2 }
   0x4   :  { %7810 = sst [smem:[#allocation23_spill]] %s7776_s3 }
   0x5   :  { %7811 = sst [smem:[#allocation24_spill]] %s7783_s10 }
   0x6   :  { %7812 = sst [smem:[#allocation25_spill]] %s7791_s18 }
   0x7   :  { %7813 = sst [smem:[#allocation26_spill]] %s7792_s19 }
   0x8   :  { %25 = vsyncpa [#allocation3], 0 }
   0x9   :  { %26 = vsyncpa [#allocation6], 0 }
   0xa   :  { %27 = vsyncpa [#allocation4], 0 }
   0xb   :  { %29 = vsyncpa [#allocation4 + $0x1], 0  ;;  %s6758_s0 = smov 0   ;;  %s6760_s30 = smov 0  }
   0xc   :  { %s6762_s20 = smov 0   ;;  %s6764_s21 = smov 0  }
   0xd LB: > { %7814 = sst [smem:[#allocation12_spill]] %s6623_s0  ;;  %s6779_s1 = sadd.s32 4294967295, %s6635_s21   ;;  %s6635_s21 = sphi %s6764_s21, %s7846_s21   ;;  %s6631_s20 = sphi %s6762_s20, %s7849_s20   ;;  %s6627_s30 = sphi %s6760_s30, %s7848_s30   ;;  %s6623_s0 = sphi %s6758_s0, %s7847_s0  }
   0xe   : > { %7815 = sst [smem:[#allocation13_spill]] %s6627_s30  ;;  %s5365_s22 = sadd.s32 4294967294, %s6635_s21  }
   0xf   : > { %7816 = sst [smem:[#allocation14_spill]] %s6631_s20  ;;  %s6783_s2 = sadd.s32 1, %s6635_s21  }
  0x10   : > { %7817 = sst [smem:[#allocation15_spill]] %s6635_s21  ;;  %s425_s23 = sadd.s32 1, %s6631_s20 }
  0x11   : > { %7818 = sst [smem:[#allocation16_spill]] %s6783_s2  ;;  %s422_s24 = ssub.s32 %s6635_s21, %s6783_s2 }
  0x12   : > { %p435_p0 = scmp.ne.s32.totalorder %s6631_s20, %s6627_s30  ;;  %p423_p1 = scmp.eq.s32.totalorder %s422_s24, 0 }
  0x13   : > { %p436_p2 = scmp.eq.s32.totalorder %s6779_s1, 1  ;;  %p441_p3 = scmp.ne.s32.totalorder %s6627_s30, %s6623_s0 }
  0x14   : > { %p442_p4 = scmp.eq.s32.totalorder %s5365_s22, 1  ;;  %p5366_p7 = scmp.ge.s32.totalorder %s6635_s21, 1 }
  0x15   : > { %s6794_s25 = scalar_select %p423_p1, %s6631_s20, %s425_s23  }
  0x16   : > { %p6796_p5 = por %p436_p2, %p435_p0  ;;  %p6800_p6 = por %p442_p4, %p441_p3 }
  0x17   : > { %7819 = sst [smem:[#allocation17_spill]] %s6794_s25  ;;  %p475_p8 = scmp.lt.s32.totalorder %s6635_s21, 3 }
  0x18   : > { %s7820_s3 = scalar_select %p6796_p5, 1, 0 }
  0x19   : > { %s7822_s26 = scalar_select %p6800_p6, 1, 0 }
  0x1a   : > { %7821 = sst [smem:[#allocation18_spill]] %s7820_s3  ;;  %p7799_p9 = scmp.eq.s32.totalorder %s6779_s1, 0 }
  0x1b   : > { %7823 = sst [smem:[#allocation19_spill]] %s7822_s26  ;;  %p6807_p10 = pnand %p5366_p7, %p475_p8 }
  0x1c   : > { %s6637_s28 = smov [#allocation5]   ;;  %s6638_s23 = smov [#allocation2]  }
  0x1d   : > { %s7824_s27 = scalar_select %p6807_p10, 1, 0 }
  0x1e   : > { %s524_s29 = sshll.u32 %s6637_s28, 4  ;;  %p5884_p11 = pneg %p6807_p10  ;;  %s525_s29 = int_to_ptr.vmem [resolvable:$true] %s524_s29 }
  0x1f   : > { %s505_s24 = sshll.u32 %s6638_s23, 4  ;;  %s7826_s10 = sld [smem:[#allocation24_spill]]  ;;  %s6819_s24 = int_to_ptr.vmem [resolvable:$true] %s505_s24 }
  0x20   : > { %p6815_p12 = pnand %p7799_p9, %p5884_p11 }
  0x22   : > { %p6829_p0 = pneg %p6815_p12 }
  0x25   : > { %s6481_s2 = scalar_lea.hbm %s7826_s10, 32768 }
  0x26   : > { %p6482_p13 = scmp.ne.s32.totalorder %s7826_s10, %s6481_s2  ;;  %p6488_p3 = scmp.lt.u32.totalorder %s6481_s2, %s7826_s10 }
  0x28   : > { %p6484_p1 = pnand %p6829_p0, %p6482_p13 }
  0x2a   : > { %p6485_p2 = pneg %p6484_p1 }
  0x2c   : > { %p6490_p4 = pnand %p6488_p3, %p6485_p2 }
  0x2e   : > { %6493 = shalt.err (!%p6490_p4)
}
  0x2f   : > { %s6494_s20 = scalar_lea.vmem %s525_s29, 32768  ;;  %p6502_p9 = scmp.lt.s32.totalorder %s525_s29, %s525_s29 }
  0x30   : > { %p6495_p7 = scmp.ne.s32.totalorder %s525_s29, %s6494_s20  ;;  %p6503_p6 = scmp.lt.s32.totalorder %s6494_s20, %s6494_s20 }
  0x32   : > { %p6497_p8 = pnand %p6495_p7, %p6829_p0  ;;  %p6504_p5 = por %p6503_p6, %p6502_p9 }
  0x34   : > { %p6498_p11 = pneg %p6497_p8 }
  0x36   : > { %p6505_p10 = pnand %p6504_p5, %p6498_p11 }
  0x38   : > { %6508 = shalt.err (!%p6505_p10)
}
  0x39   : > { %s6639_s0 = smov 256   ;;  %s6640_s25 = smov 16  }
  0x3a   : > { %5890 = dma.hbm_to_vmem [thread:$0]  (!%p6815_p12), %s7826_s10, 32768, %s525_s29, [#allocation6], %s6639_s0, %s6639_s0, %s6640_s25  }
  0x3b   : > { %s6509_s19 = scalar_lea.hbm %s7780_s7, 8192 }
  0x3c   : > { %p6510_p13 = scmp.ne.s32.totalorder %s7780_s7, %s6509_s19  ;;  %p6516_p9 = scmp.lt.u32.totalorder %s6509_s19, %s7780_s7 }
  0x3e   : > { %p6512_p5 = pnand %p6510_p13, %p6829_p0 }
  0x40   : > { %p6513_p6 = pneg %p6512_p5 }
  0x42   : > { %p6518_p10 = pnand %p6516_p9, %p6513_p6 }
  0x44   : > { %6521 = shalt.err (!%p6518_p10)
}
  0x45   : > { %s6522_s29 = scalar_lea.vmem %s6819_s24, 8192  ;;  %p6530_p4 = scmp.lt.s32.totalorder %s6819_s24, %s6819_s24 }
  0x46   : > { %p6523_p1 = scmp.ne.s32.totalorder %s6819_s24, %s6522_s29  ;;  %p6531_p7 = scmp.lt.s32.totalorder %s6522_s29, %s6522_s29 }
  0x48   : > { %p6525_p2 = pnand %p6523_p1, %p6829_p0  ;;  %p6532_p8 = por %p6531_p7, %p6530_p4 }
  0x4a   : > { %p6526_p3 = pneg %p6525_p2 }
  0x4c   : > { %p6533_p11 = pnand %p6532_p8, %p6526_p3 }
  0x4e   : > { %6536 = shalt.err (!%p6533_p11)
}
  0x4f   : > { %s6641_s18 = smov 512   ;;  %s6642_s19 = smov 32  }
  0x50   : > { %5887 = dma.hbm_to_vmem [thread:$0]  (!%p6815_p12), %s7780_s7, 8192, %s6819_s24, [#allocation3], %s6641_s18, %s6641_s18, %s6642_s19  }
  0x51   : > { %s6643_s0 = smov [#allocation7]   ;;  %s6537_s26 = scalar_lea.hbm %s7786_s13, 8192 }
  0x52   : > { %s543_s25 = sshll.u32 %s6643_s0, 4  ;;  %p6538_p13 = scmp.ne.s32.totalorder %s7786_s13, %s6537_s26  ;;  %s544_s25 = int_to_ptr.vmem [resolvable:$true] %s543_s25 }
  0x53   : > { %p6544_p9 = scmp.lt.u32.totalorder %s6537_s26, %s7786_s13 }
  0x54   : > { %p6540_p5 = pnand %p6538_p13, %p6829_p0 }
  0x56   : > { %p6541_p6 = pneg %p6540_p5 }
  0x58   : > { %p6546_p10 = pnand %p6544_p9, %p6541_p6 }
  0x5a   : > { %6549 = shalt.err (!%p6546_p10)
}
  0x5b   : > { %s6550_s24 = scalar_lea.vmem %s544_s25, 8192  ;;  %p6558_p4 = scmp.lt.s32.totalorder %s544_s25, %s544_s25 }
  0x5c   : > { %p6551_p1 = scmp.ne.s32.totalorder %s544_s25, %s6550_s24  ;;  %p6559_p7 = scmp.lt.s32.totalorder %s6550_s24, %s6550_s24 }
  0x5e   : > { %p6553_p2 = pnand %p6551_p1, %p6829_p0  ;;  %p6560_p8 = por %p6559_p7, %p6558_p4 }
  0x60   : > { %p6554_p3 = pneg %p6553_p2 }
  0x62   : > { %p6561_p11 = pnand %p6560_p8, %p6554_p3 }
  0x64   : > { %6564 = shalt.err (!%p6561_p11)
}
  0x65   : > { %s6644_s18 = smov 128   ;;  %s6645_s19 = smov 8  }
  0x66   : > { %5893 = dma.hbm_to_vmem [thread:$0]  (!%p6815_p12), %s7786_s13, 8192, %s544_s25, [#allocation6], %s6644_s18, %s6644_s18, %s6645_s19  }
  0x67   : > { %p7828_p13 = scmp.ne.s32.totalorder %s7824_s27, 0 }
  0x68   : > { %p7829_p5 = scmp.eq.s32.totalorder (!%p7828_p13), %s6779_s1, 0 }
  0x69   : > { %579 = sbr.rel (%p7828_p13) target bundleno = 2370 (0x942), region = 92 }
  0x70   : > { %6610 = dma.done.wait (%p7829_p5), [#allocation3], 8192   ;;  %p7830_p0 = pmov %p7829_p5 }
  0x72   : > { %6612 = vsyncadd (%p7830_p0), [#allocation3], 4294959104  ;;  %p7831_p6 = pmov %p7830_p0 }
  0x73   : > { %p7832_p9 = pmov %p7830_p0 }
  0x74   : > { %6614 = dma.done.wait (%p7831_p6), [#allocation6], 40960  }
  0x75   : > { %6616 = vsyncadd (%p7832_p9), [#allocation6], 4294926336  ;;  %p647_p10 = scmp.lt.s32.totalorder %s6779_s1, 1  ;;  %v6646_v0 = vmov 1   ;;  %v6647_v1 = vmov 0   ;;  %s7833_s0 = sld [smem:[#allocation20_spill]]  ;;  %v707_v39 = vlaneseq }
  0x76   : > { %5958 = vset.pattern.permute.xlu1 %v6646_v0  ;;  %5957 = vset.pattern.permute.xlu0 %v6647_v1  ;;  %v6648_v4 = vmov 2   ;;  %v5971_v8 = vld [vmem:[%s7777_s4] sm:$0xff]   ;;  %v5972_v10 = vld [vmem:[%s7777_s4 + $0x8] sm:$0xff]   ;;  %v5973_v12 = vld [vmem:[%s7777_s4 + $0x10] sm:$0xff]   ;;  %s7834_s10 = sld [smem:[#allocation21_spill]]  ;;  %s7836_s26 = sld [smem:[#allocation23_spill]] }
  0x77   : > { %s6899_s27 = scalar_select %p647_p10, %s6779_s1, 1  ;;  %1579 = vmatprep.mubr.bf16.mxu1 %v6647_v1  ;;  %5826 = vmatprep.subr.bf16.mxu0 %v5971_v8  ;;  %v5974_v13 = vld [vmem:[%s7777_s4 + $0x18] sm:$0xff]   ;;  %v6934_v15 = vld [vmem:[#allocation2] sm:$0xff]  ;;  %v1019_v17 = vld [vmem:[#allocation2 + $0x10] sm:$0xff]  ;;  %v6942_v40 = vshrl.u32 %v707_v39, 7  ;;  %vm897_vm0 = vcmask 523264  }
  0x78   : > { %5827 = vmatpush3.bf16.msra.mxu0 %v5971_v8  ;;  %v6936_v16 = vld [vmem:[#allocation2 + $0x20] sm:$0xff]  ;;  %v1023_v20 = vld [vmem:[#allocation2 + $0x30] sm:$0xff]  ;;  %vm4673_vm1 = vcmask 24576   ;;  %s6649_s28 = smov 127   ;;  %s6650_s3 = smov 125   ;;  %vm4760_vm2 = vcmask 7168  }
  0x79   : > { %s5794_s22 = sshll.u32 %s6899_s27, 6  ;;  %5828 = vmatprep.subr.bf16.mxu0 %v5972_v10  ;;  %v5391_v18 = vcombine.low %v6934_v15, %v6936_v16  ;;  %v5392_v19 = vcombine.high %v6934_v15, %v6936_v16  ;;  %v5396_v21 = vcombine.high %v1019_v17, %v1023_v20  ;;  %v5395_v22 = vcombine.low %v1019_v17, %v1023_v20  ;;  %v1027_v23 = vld [vmem:[#allocation2 + $0x50] sm:$0xff]  ;;  %s6652_s21 = smov 2  }
  0x7a   : > { %v1031_v24 = vld [vmem:[#allocation2 + $0x70] sm:$0xff]  ;;  %v6945_v44 = vsub.s32 2, %v6942_v40  ;;  %v6948_v45 = vsub.s32 1, %v6942_v40  ;;  %v6951_v46 = vsub.s32 0, %v6942_v40  ;;  %s6653_s2 = smov 1   ;;  %s6655_s23 = smov 7  }
  0x7b   : > { %s6908_s25 = scalar_lea.vmem %s7833_s0, %s5794_s22  ;;  %v5404_v25 = vcombine.high %v1027_v23, %v1031_v24  ;;  %v1035_v26 = vld [vmem:[#allocation2 + $0x90] sm:$0xff]  ;;  %1547 = vmatprep.subr.bf16.mxu1 %v5396_v21  ;;  %v5403_v28 = vcombine.low %v1027_v23, %v1031_v24  ;;  %s7835_s0 = sld [smem:[#allocation22_spill]]  ;;  %vm4762_vm3 = vcmask 15360   ;;  %vm4764_vm4 = vcmask 23552  }
  0x7c   : > { %v658_v2 = vld [vmem:[%s6908_s25] sm:$0xff]  ;;  %v659_v3 = vld [vmem:[%s6908_s25 + $0x8] sm:$0xff]  ;;  %v661_v5 = vld [vmem:[%s6908_s25 + $0x18] sm:$0xff]  ;;  %5829 = vmatpush3.bf16.msra.mxu0 %v5972_v10  ;;  %1548 = vmatpush1.bf16.msra.mxu1 %v5395_v22  ;;  %s6656_s20 = smov 5   ;;  %vm4766_vm5 = vcmask 31744   ;;  %vm4768_vm6 = vcmask 39936  }
  0x7d   : > { %720 = vperm.xlu1 %5958, %v658_v2   ;;  %669 = vperm.xlu0 %5957, %v658_v2   ;;  %v660_v6 = vld [vmem:[%s6908_s25 + $0x10] sm:$0xff]  ;;  %v662_v7 = vld [vmem:[%s6908_s25 + $0x20] sm:$0xff]  ;;  %v663_v9 = vld [vmem:[%s6908_s25 + $0x28] sm:$0xff]  ;;  %vm4770_vm7 = vcmask 48128   ;;  %vm4772_vm8 = vcmask 56320   ;;  %vm4774_vm9 = vcmask 64512  }
  0x7e   : > { %v664_v11 = vld [vmem:[%s6908_s25 + $0x30] sm:$0xff]  ;;  %5830 = vmatprep.subr.bf16.mxu0 %v5973_v12  ;;  %v665_v14 = vld [vmem:[%s6908_s25 + $0x38] sm:$0xff]  ;;  %1549 = vmatprep.subr.bf16.mxu1 %v5404_v25  ;;  %v666_v48 = vld [vmem:[%s7834_s10] sm:$0x7]  ;;  %vm4776_vm10 = vcmask 65536   ;;  %s7838_s18 = sld [smem:[#allocation18_spill]] }
  0x7f   : > { %v1039_v27 = vld [vmem:[#allocation2 + $0xb0] sm:$0xff]  ;;  %v6957_v49 = vrot.slane %v666_v48, %v6945_v44  ;;  %v6960_v50 = vrot.slane %v666_v48, %v6948_v45  ;;  %v6963_v51 = vrot.slane %v666_v48, %v6951_v46  ;;  %v1037_v48 = vld [vmem:[#allocation2 + $0xa0] sm:$0xff]  ;;  %s5791_s19 = sshll.u32 %s6779_s1, 4  ;;  %s6657_s1 = smov [#allocation8]  }
  0x80   : > { %5831 = vmatpush3.bf16.msra.mxu0 %v5973_v12  ;;  %v5412_v29 = vcombine.high %v1035_v26, %v1039_v27  ;;  %v1043_v30 = vld [vmem:[#allocation2 + $0xd0] sm:$0xff]  ;;  %1550 = vmatpush1.bf16.msra.mxu1 %v5403_v28  ;;  %v5411_v32 = vcombine.low %v1035_v26, %v1039_v27 }
  0x81   : > { %724 = vperm.xlu1 %5958, %v659_v3   ;;  %5962 = vset.pattern.permute.xlu0 %v6648_v4  ;;  %v1047_v31 = vld [vmem:[#allocation2 + $0xf0] sm:$0xff]  ;;  %v6973_v63 = vld [vmem:[%s7835_s0] ss:$0 sm:$0xff]  ;;  %s6651_s0 = smov 126  }
  0x82   : > { %776 = vperm.xlu0 %5962, %v659_v3   ;;  %5832 = vmatprep.subr.bf16.mxu0 %v5974_v13  ;;  %v1051_v33 = vld [vmem:[#allocation2 + $0x110] sm:$0xff]  ;;  %v5420_v35 = vcombine.high %v1043_v30, %v1047_v31  ;;  %v5419_v36 = vcombine.low %v1043_v30, %v1047_v31 }
  0x83   : > { %v1055_v34 = vld [vmem:[#allocation2 + $0x130] sm:$0xff]  ;;  %1551 = vmatprep.subr.bf16.mxu1 %v5412_v29 }
  0x84   : > { %5833 = vmatpush3.bf16.msra.mxu0 %v5974_v13  ;;  %1552 = vmatpush1.bf16.msra.mxu1 %v5411_v32  ;;  %v5428_v37 = vcombine.high %v1051_v33, %v1055_v34  ;;  %v5427_v38 = vcombine.low %v1051_v33, %v1055_v34  ;;  %p7840_p1 = scmp.ne.s32.totalorder %s7838_s18, 0 }
  0x85   : > { %5959 = vset.pattern.permute.xlu1 %v6647_v1  ;;  %1401 = vmatprep.subr.bf16.mxu0 %v5392_v19 }
  0x86   : > { %684 = vperm.xlu1 %5959, %v661_v5   ;;  %5963 = vset.pattern.permute.xlu0 %v6647_v1 }
  0x87   : > { %674 = vperm.xlu0 %5963, %v659_v3   ;;  %1553 = vmatprep.subr.bf16.mxu1 %v5420_v35 }
  0x88   : > { %1554 = vmatpush1.bf16.msra.mxu1 %v5419_v36  ;;  %v1025_v36 = vld [vmem:[#allocation2 + $0x40] sm:$0xff] }
  0x89   : > { %1555 = vmatprep.subr.bf16.mxu1 %v5428_v37  ;;  %v1029_v37 = vld [vmem:[#allocation2 + $0x60] sm:$0xff] }
  0x8a   : > { %5960 = vset.pattern.permute.xlu1 %v6646_v0 }
  0x8b   : > { %732 = vperm.xlu1 %5960, %v661_v5   ;;  %679 = vperm.xlu0 %5963, %v660_v6  }
  0x8c   : > { %1556 = vmatpush1.bf16.msra.mxu1 %v5427_v38 }
  0x8f   : > { %5961 = vset.pattern.permute.xlu1 %v6648_v4  ;;  %689 = vperm.xlu0 %5963, %v662_v7  }
  0x90   : > { %772 = vperm.xlu1 %5961, %v658_v2  }
  0x93   : > { %5964 = vset.pattern.permute.xlu0 %v6646_v0 }
  0x94   : > { %780 = vperm.xlu1 %5961, %v660_v6   ;;  %728 = vperm.xlu0 %5964, %v660_v6   ;;  %v6980_v6 = vld [vmem:[%s7836_s26] ss:$0 sm:$0xff]  ;;  %s6654_s26 = smov 3  }
  0x98   : > { %784 = vperm.xlu1 %5961, %v661_v5   ;;  %740 = vperm.xlu0 %5964, %v663_v9  }
  0x9c   : > { %5965 = vset.pattern.permute.xlu1 %v6647_v1  ;;  %744 = vperm.xlu0 %5964, %v664_v11  }
  0x9d   : > { %694 = vperm.xlu1 %5965, %v663_v9  }
  0xa0   : > { %5969 = vset.pattern.permute.xlu0 %v6648_v4 }
  0xa1   : > { %5966 = vset.pattern.permute.xlu1 %v6646_v0  ;;  %788 = vperm.xlu0 %5969, %v662_v7  }
  0xa2   : > { %736 = vperm.xlu1 %5966, %v662_v7  }
  0xa5   : > { %800 = vperm.xlu0 %5969, %v665_v14  }
  0xa6   : > { %5967 = vset.pattern.permute.xlu1 %v6647_v1 }
  0xa7   : > { %699 = vperm.xlu1 %5967, %v664_v11  }
  0xab   : > { %704 = vperm.xlu1 %5967, %v665_v14  }
  0xaf   : > { %5968 = vset.pattern.permute.xlu1 %v6646_v0 }
  0xb0   : > { %748 = vperm.xlu1 %5968, %v665_v14  }
  0xb4   : > { %5970 = vset.pattern.permute.xlu1 %v6648_v4 }
  0xb5   : > { %792 = vperm.xlu1 %5970, %v663_v9  }
  0xb9   : > { %796 = vperm.xlu1 %5970, %v664_v11  }
  0xfc   : > { %v721_v41 = vpop.permute.xlu1 %720  ;;  %v670_v42 = vpop.permute.xlu0 %669 }
  0xfd   : > { %v755_v60 = vmul.f32 %v6960_v50, %v721_v41  ;;  %v711_v61 = vmul.f32 %v6963_v51, %v670_v42 }
  0xff   : > { %v763_v3 = vadd.f32 %v755_v60, %v711_v61 }
 0x100   : > { %v725_v43 = vpop.permute.xlu1 %724 }
 0x101   : > { %v777_v47 = vpop.permute.xlu0 %776  ;;  %v756_v54 = vmul.f32 %v6960_v50, %v725_v43  ;;  %v5400_v43 = vcombine.high %v1025_v36, %v1029_v37 }
 0x102   : > { %v808_v56 = vmul.f32 %v6957_v49, %v777_v47  ;;  %v1033_v47 = vld [vmem:[#allocation2 + $0x80] sm:$0xff] }
 0x105   : > { %v685_v52 = vpop.permute.xlu1 %684 }
 0x106   : > { %v675_v53 = vpop.permute.xlu0 %674  ;;  %v714_v17 = vmul.f32 %v6963_v51, %v685_v52 }
 0x107   : > { %v712_v55 = vmul.f32 %v6963_v51, %v675_v53  ;;  %v5399_v53 = vcombine.low %v1025_v36, %v1029_v37 }
 0x109   : > { %v764_v57 = vadd.f32 %v756_v54, %v712_v55  ;;  %v5408_v55 = vcombine.high %v1033_v47, %v1037_v48 }
 0x10a   : > { %v733_v58 = vpop.permute.xlu1 %732  ;;  %v680_v59 = vpop.permute.xlu0 %679 }
 0x10b   : > { %v816_v62 = vadd.f32 %v808_v56, %v764_v57  ;;  %v713_v7 = vmul.f32 %v6963_v51, %v680_v59  ;;  %v758_v9 = vmul.f32 %v6960_v50, %v733_v58  ;;  %v1041_v56 = vld [vmem:[#allocation2 + $0xc0] sm:$0xff]  ;;  %v5407_v59 = vcombine.low %v1033_v47, %v1037_v48  ;;  %v1059_v47 = vld [vmem:[#allocation2 + $0x150] sm:$0xff] }
 0x10c   : > { %v1045_v57 = vld [vmem:[#allocation2 + $0xe0] sm:$0xff] }
 0x10d   : > { %v831_v5 = vmul.f32 %v6973_v63, %v816_v62  ;;  %v766_v22 = vadd.f32 %v758_v9, %v714_v17  ;;  %v5416_v62 = vcombine.high %v1041_v56, %v1045_v57 }
 0x10e   : > { %v690_v0 = vpop.permute.xlu0 %689 }
 0x10f   : > { %v773_v2 = vpop.permute.xlu1 %772  ;;  %v846_v14 = vadd.f32 %v6980_v6, %v831_v5 }
 0x110   : > { %v807_v4 = vmul.f32 %v6957_v49, %v773_v2  ;;  %v715_v2 = vmul.f32 %v6963_v51, %v690_v0 }
 0x111   : > { %v854_v27 = vmax.f32 %v846_v14, 0.0 }
 0x112   : > { %v815_v8 = vadd.f32 %v807_v4, %v763_v3  ;;  %v1049_v3 = vld [vmem:[#allocation2 + $0x100] sm:$0xff] }
 0x113   : > { %v781_v10 = vpop.permute.xlu1 %780  ;;  %v729_v11 = vpop.permute.xlu0 %728  ;;  %v1053_v4 = vld [vmem:[#allocation2 + $0x120] sm:$0xff] }
 0x114   : > { %v830_v12 = vmul.f32 %v6973_v63, %v815_v8  ;;  %v757_v13 = vmul.f32 %v6960_v50, %v729_v11  ;;  %v809_v19 = vmul.f32 %v6957_v49, %v781_v10  ;;  %v5423_v11 = vcombine.low %v1049_v3, %v1053_v4 }
 0x116   : > { %v765_v20 = vadd.f32 %v757_v13, %v713_v7  ;;  %v845_v21 = vadd.f32 %v6980_v6, %v830_v12  ;;  %v5424_v7 = vcombine.high %v1049_v3, %v1053_v4  ;;  %v1075_v3 = vld [vmem:[#allocation2 + $0x1d0] sm:$0xff] }
 0x117   : > { %v785_v23 = vpop.permute.xlu1 %784  ;;  %v741_v35 = vpop.permute.xlu0 %740 }
 0x118   : > { %v817_v24 = vadd.f32 %v809_v19, %v765_v20  ;;  %v810_v25 = vmul.f32 %v6957_v49, %v785_v23  ;;  %v853_v26 = vmax.f32 %v845_v21, 0.0  ;;  %v760_v12 = vmul.f32 %v6960_v50, %v741_v35 }
 0x11a   : > { %v832_v28 = vmul.f32 %v6973_v63, %v817_v24  ;;  %v818_v29 = vadd.f32 %v810_v25, %v766_v22  ;;  %v861_v30 = vpack.c.bf16 %v854_v27, %v853_v26 }
 0x11b   : > { %v745_v52 = vpop.permute.xlu0 %744 }
 0x11c   : > { %v847_v31 = vadd.f32 %v6980_v6, %v832_v28  ;;  %v833_v32 = vmul.f32 %v6973_v63, %v818_v29  ;;  %v695_v33 = vpop.permute.xlu1 %694  ;;  %5834 = vmatprep.mubr.msk.bf16.mxu0 %vm897_vm0, %v861_v30  ;;  %v761_v19 = vmul.f32 %v6960_v50, %v745_v52  ;;  %v1063_v52 = vld [vmem:[#allocation2 + $0x170] sm:$0xff] }
 0x11d   : > { %v716_v0 = vmul.f32 %v6963_v51, %v695_v33 }
 0x11e   : > { %v848_v34 = vadd.f32 %v6980_v6, %v833_v32  ;;  %v855_v38 = vmax.f32 %v847_v31, 0.0 }
 0x11f   : > { %v768_v22 = vadd.f32 %v760_v12, %v716_v0  ;;  %v7031_v0 = vld [vmem:[%s7779_s6] ss:$0 sm:$0xff] }
 0x120   : > { %v856_v39 = vmax.f32 %v848_v34, 0.0  ;;  %v789_v60 = vpop.permute.xlu0 %788 }
 0x121   : > { %v737_v41 = vpop.permute.xlu1 %736  ;;  %v811_v16 = vmul.f32 %v6957_v49, %v789_v60 }
 0x122   : > { %v862_v42 = vpack.c.bf16 %v856_v39, %v855_v38  ;;  %v759_v58 = vmul.f32 %v6960_v50, %v737_v41 }
 0x124   : > { %5835 = vmatmul.mubr.msk.bf16.vlgmr.msra.gmra.mrb[0].mxu0 %vm897_vm0, %v862_v42  ;;  %v767_v15 = vadd.f32 %v759_v58, %v715_v2  ;;  %v801_v5 = vpop.permute.xlu0 %800  ;;  %v1071_v58 = vld [vmem:[#allocation2 + $0x1b0] sm:$0xff]  ;;  %v1077_v2 = vld [vmem:[#allocation2 + $0x1e0] sm:$0xff] }
 0x125   : > { %1402 = vmatpush1.bf16.msra.mxu0 %v5391_v18  ;;  %v5415_v18 = vcombine.low %v1041_v56, %v1045_v57  ;;  %v814_v14 = vmul.f32 %v6957_v49, %v801_v5  ;;  %v1067_v57 = vld [vmem:[#allocation2 + $0x190] sm:$0xff] }
 0x126   : > { %v700_v54 = vpop.permute.xlu1 %699  ;;  %1403 = vmatprep.subr.bf16.mxu0 %v5400_v43  ;;  %v819_v13 = vadd.f32 %v811_v16, %v767_v15  ;;  %v1061_v43 = vld [vmem:[#allocation2 + $0x160] sm:$0xff]  ;;  %v5444_v60 = vcombine.high %v1067_v57, %v1071_v58  ;;  %v1079_v15 = vld [vmem:[#allocation2 + $0x1f0] sm:$0xff] }
 0x127   : > { %v717_v20 = vmul.f32 %v6963_v51, %v700_v54  ;;  %v5436_v54 = vcombine.high %v1059_v47, %v1063_v52  ;;  %v5451_v5 = vcombine.low %v1075_v3, %v1079_v15 }
 0x128   : > { %v834_v23 = vmul.f32 %v6973_v63, %v819_v13 }
 0x129   : > { %1404 = vmatpush1.bf16.msra.mxu0 %v5399_v53  ;;  %v769_v27 = vadd.f32 %v761_v19, %v717_v20  ;;  %1557 = vmatprep.subr.bf16.mxu1 %v5436_v54 }
 0x12a   : > { %v705_v61 = vpop.permute.xlu1 %704  ;;  %1405 = vmatprep.subr.bf16.mxu0 %v5408_v55  ;;  %v849_v29 = vadd.f32 %v6980_v6, %v834_v23  ;;  %v1069_v55 = vld [vmem:[#allocation2 + $0x1a0] sm:$0xff] }
 0x12b   : > { %v718_v9 = vmul.f32 %v6963_v51, %v705_v61  ;;  %v5443_v61 = vcombine.low %v1067_v57, %v1071_v58  ;;  %v1074_v58 = vld [vmem:[#allocation2 + $0x1c8] sm:$0xff] }
 0x12c   : > { %v857_v33 = vmax.f32 %v849_v29, 0.0 }
 0x12d   : > { %1406 = vmatpush1.bf16.msra.mxu0 %v5407_v59 }
 0x12e   : > { %1407 = vmatprep.subr.bf16.mxu0 %v5416_v62  ;;  %v1073_v62 = vld [vmem:[#allocation2 + $0x1c0] sm:$0xff] }
 0x12f   : > { %v749_v8 = vpop.permute.xlu1 %748  ;;  %v5448_v4 = vcombine.high %v1073_v62, %v1077_v2  ;;  %v5447_v16 = vcombine.low %v1073_v62, %v1077_v2 }
 0x130   : > { %v762_v10 = vmul.f32 %v6960_v50, %v749_v8  ;;  %v1022_v8 = vld [vmem:[#allocation2 + $0x28] sm:$0xff] }
 0x131   : > { %1408 = vmatpush1.bf16.msra.mxu0 %v5415_v18  ;;  %v5452_v18 = vcombine.high %v1075_v3, %v1079_v15 }
 0x132   : > { %v770_v17 = vadd.f32 %v762_v10, %v718_v9  ;;  %1409 = vmatprep.subr.bf16.mxu0 %v5424_v7  ;;  %v1018_v7 = vld [vmem:[#allocation2 + $0x8] sm:$0xff] }
 0x133   : > { %v5393_v9 = vcombine.low %v1018_v7, %v1022_v8  ;;  %v5394_v10 = vcombine.high %v1018_v7, %v1022_v8  ;;  %v1020_v7 = vld [vmem:[#allocation2 + $0x18] sm:$0xff] }
 0x134   : > { %v793_v21 = vpop.permute.xlu1 %792  ;;  %v822_v24 = vadd.f32 %v814_v14, %v770_v17  ;;  %v1024_v8 = vld [vmem:[#allocation2 + $0x38] sm:$0xff] }
 0x135   : > { %v812_v25 = vmul.f32 %v6957_v49, %v793_v21  ;;  %1410 = vmatpush1.bf16.msra.mxu0 %v5423_v11  ;;  %v7026_v11 = vld [vmem:[%s7778_s5] ss:$0 sm:$0xff] }
 0x136   : > { %v837_v30 = vmul.f32 %v6973_v63, %v822_v24 }
 0x137   : > { %v820_v26 = vadd.f32 %v812_v25, %v768_v22 }
 0x138   : > { %v797_v28 = vpop.permute.xlu1 %796  ;;  %v852_v34 = vadd.f32 %v6980_v6, %v837_v30 }
 0x139   : > { %v835_v31 = vmul.f32 %v6973_v63, %v820_v26  ;;  %v813_v50 = vmul.f32 %v6957_v49, %v797_v28  ;;  %v1057_v49 = vld [vmem:[#allocation2 + $0x140] sm:$0xff] }
 0x13a   : > { %v860_v39 = vmax.f32 %v852_v34, 0.0  ;;  %v5432_v48 = vcombine.high %v1057_v49, %v1061_v43  ;;  %v5431_v53 = vcombine.low %v1057_v49, %v1061_v43  ;;  %v1034_v34 = vld [vmem:[#allocation2 + $0x88] sm:$0xff] }
 0x13b   : > { %v850_v51 = vadd.f32 %v6980_v6, %v835_v31  ;;  %v821_v32 = vadd.f32 %v813_v50, %v769_v27  ;;  %v1026_v31 = vld [vmem:[#allocation2 + $0x48] sm:$0xff] }
 0x13c   : > { %1411 = vmatprep.subr.bf16.mxu0 %v5432_v48  ;;  %v1030_v50 = vld [vmem:[#allocation2 + $0x68] sm:$0xff] }
 0x13d   : > { %v858_v35 = vmax.f32 %v850_v51, 0.0  ;;  %v836_v36 = vmul.f32 %v6973_v63, %v821_v32  ;;  %v5435_v63 = vcombine.low %v1059_v47, %v1063_v52  ;;  %1412 = vmatpush1.bf16.msra.mxu0 %v5431_v53  ;;  %v1050_v49 = vld [vmem:[#allocation2 + $0x108] sm:$0xff] }
 0x13e   : > { %v1054_v43 = vld [vmem:[#allocation2 + $0x128] sm:$0xff] }
 0x13f   : > { %v851_v37 = vadd.f32 %v6980_v6, %v836_v36  ;;  %v863_v38 = vpack.c.bf16 %v858_v35, %v857_v33  ;;  %v1065_v6 = vld [vmem:[#allocation2 + $0x180] sm:$0xff]  ;;  %1558 = vmatpush1.bf16.msra.mxu1 %v5435_v63  ;;  %v5402_v33 = vcombine.high %v1026_v31, %v1030_v50  ;;  %v1038_v35 = vld [vmem:[#allocation2 + $0xa8] sm:$0xff]  ;;  %v5401_v36 = vcombine.low %v1026_v31, %v1030_v50  ;;  %v1044_v31 = vld [vmem:[#allocation2 + $0xd8] sm:$0xff] }
 0x140   : > { %v5440_v56 = vcombine.high %v1065_v6, %v1069_v55  ;;  %v5439_v59 = vcombine.low %v1065_v6, %v1069_v55  ;;  %1559 = vmatprep.subr.bf16.mxu1 %v5444_v60  ;;  %v5426_v48 = vcombine.high %v1050_v49, %v1054_v43  ;;  %v1058_v52 = vld [vmem:[#allocation2 + $0x148] sm:$0xff]  ;;  %v5425_v54 = vcombine.low %v1050_v49, %v1054_v43  ;;  %v1048_v50 = vld [vmem:[#allocation2 + $0xf8] sm:$0xff] }
 0x141   : > { %v859_v41 = vmax.f32 %v851_v37, 0.0  ;;  %5838 = vmatprep.mubr.msk.bf16.mxu0 %vm897_vm0, %v863_v38  ;;  %v5410_v37 = vcombine.high %v1034_v34, %v1038_v35  ;;  %v1042_v38 = vld [vmem:[#allocation2 + $0xc8] sm:$0xff]  ;;  %v1068_v43 = vld [vmem:[#allocation2 + $0x198] sm:$0xff] }
 0x142   : > { %1413 = vmatprep.subr.bf16.mxu0 %v5440_v56  ;;  %v1062_v53 = vld [vmem:[#allocation2 + $0x168] sm:$0xff] }
 0x143   : > { %v864_v42 = vpack.c.bf16 %v860_v39, %v859_v41  ;;  %1414 = vmatpush1.bf16.msra.mxu0 %v5439_v59  ;;  %1560 = vmatpush1.bf16.msra.mxu1 %v5443_v61  ;;  %v1046_v39 = vld [vmem:[#allocation2 + $0xe8] sm:$0xff]  ;;  %v5409_v41 = vcombine.low %v1034_v34, %v1038_v35  ;;  %v5434_v63 = vcombine.high %v1058_v52, %v1062_v53  ;;  %v1052_v35 = vld [vmem:[#allocation2 + $0x118] sm:$0xff] }
 0x144   : > { %1415 = vmatprep.subr.bf16.mxu0 %v5448_v4  ;;  %1561 = vmatprep.subr.bf16.mxu1 %v5452_v18  ;;  %v5417_v47 = vcombine.low %v1042_v38, %v1046_v39  ;;  %v1066_v6 = vld [vmem:[#allocation2 + $0x188] sm:$0xff]  ;;  %v5433_v56 = vcombine.low %v1058_v52, %v1062_v53  ;;  %v5422_v34 = vcombine.high %v1044_v31, %v1048_v50  ;;  %v1076_v53 = vld [vmem:[#allocation2 + $0x1d8] sm:$0xff] }
 0x145   : > { %5839 = vmatmul.mubr.msk.bf16.gmra.mrb[4].mxu0 %vm897_vm0, %v864_v42  ;;  %v5418_v42 = vcombine.high %v1042_v38, %v1046_v39  ;;  %v1070_v55 = vld [vmem:[#allocation2 + $0x1a8] sm:$0xff]  ;;  %v1060_v39 = vld [vmem:[#allocation2 + $0x158] sm:$0xff] }
 0x146   : > { %1433 = vmatprep.mubr.bf16.mxu0 %v6647_v1  ;;  %v5442_v57 = vcombine.high %v1066_v6, %v1070_v55  ;;  %v1078_v59 = vld [vmem:[#allocation2 + $0x1e8] sm:$0xff]  ;;  %v5441_v2 = vcombine.low %v1066_v6, %v1070_v55 }
 0x147   : > { %1416 = vmatpush1.bf16.msra.mxu0 %v5447_v16  ;;  %1562 = vmatpush1.bf16.msra.mxu1 %v5451_v5  ;;  %v5450_v15 = vcombine.high %v1074_v58, %v1078_v59 }
 0x148   : > { %1474 = vmatprep.subr.bf16.mxu0 %v5394_v10 }
 0x1f7   : > { %v5836_v12 = vpop.f32.mrb[0].mxu0 }
 0x1f8   : > { %v984_v13 = vmul.f32 %v5836_v12, %v7026_v11  ;;  %v944_v14 = vpop.f32.mrb[1].mxu0 }
 0x1f9   : > { %v982_v17 = vmul.f32 %v7026_v11, %v944_v14  ;;  %v5837_v19 = vpop.f32.mrb[2].mxu0 }
 0x1fa   : > { %v999_v20 = vadd.f32 %v7031_v0, %v984_v13  ;;  %v985_v21 = vmul.f32 %v5837_v19, %v7026_v11  ;;  %v947_v22 = vpop.f32.mrb[3].mxu0  ;;  %v5449_v13 = vcombine.low %v1074_v58, %v1078_v59  ;;  %v5975_v58 = vld [vmem:[#allocation5] ss:$16 sps:$4 sm:$0xff]   ;;  %v5978_v59 = vld [vmem:[#allocation5 + $0x8] ss:$16 sps:$4 sm:$0xff]  }
 0x1fb   : > { %v997_v23 = vadd.f32 %v7031_v0, %v982_v17  ;;  %v983_v24 = vmul.f32 %v7026_v11, %v947_v22  ;;  %v5398_v17 = vcombine.high %v1020_v7, %v1024_v8 }
 0x1fc   : > { %v1000_v25 = vadd.f32 %v7031_v0, %v985_v21  ;;  %v1007_v27 = vmax.f32 %v999_v20, 0.0 }
 0x1fd   : > { %v998_v26 = vadd.f32 %v7031_v0, %v983_v24  ;;  %v1005_v29 = vmax.f32 %v997_v23, 0.0 }
 0x1fe   : > { %v1008_v28 = vmax.f32 %v1000_v25, 0.0  ;;  %v5397_v25 = vcombine.low %v1020_v7, %v1024_v8  ;;  %v6001_v7 = vld [vmem:[#allocation5 + $0x84] ss:$16 sps:$4 sm:$0xff]   ;;  %v6004_v8 = vld [vmem:[#allocation5 + $0x8c] ss:$16 sps:$4 sm:$0xff]  }
 0x1ff   : > { %v1006_v30 = vmax.f32 %v998_v26, 0.0 }
 0x200   : > { %v7041_v51 = vpack.c.bf16 %v1008_v28, %v1007_v27  ;;  %v1036_v27 = vld [vmem:[#allocation2 + $0x98] sm:$0xff] }
 0x201   : > { %v7043_v32 = vpack.c.bf16 %v1006_v30, %v1005_v29  ;;  %v1040_v28 = vld [vmem:[#allocation2 + $0xb8] sm:$0xff] }
 0x202   : > { %v5414_v30 = vcombine.high %v1036_v27, %v1040_v28 }
 0x203   : > { %1434 = vmatmul.mubr.bf16.vlgmr.msra.gmra.mrb[8].mxu0 %v7043_v32  ;;  %1580 = vmatmul.mubr.bf16.vlgmr.msra.gmra.mrb[0].mxu1 %v7043_v32 }
 0x204   : > { %1443 = vmatprep.mubr.bf16.mxu0 %v6647_v1  ;;  %1589 = vmatprep.mubr.bf16.mxu1 %v6647_v1 }
 0x205   : > { %1475 = vmatpush1.bf16.msra.mxu0 %v5393_v9 }
 0x206   : > { %1476 = vmatprep.subr.bf16.mxu0 %v5402_v33  ;;  %v5413_v33 = vcombine.low %v1036_v27, %v1040_v28  ;;  %v6026_v27 = vld [vmem:[#allocation5 + $0x108] ss:$16 sps:$4 sm:$0xff]   ;;  %v6031_v28 = vld [vmem:[#allocation5 + $0x124] ss:$16 sps:$4 sm:$0xff]  }
 0x209   : > { %1477 = vmatpush1.bf16.msra.mxu0 %v5401_v36  ;;  %v1056_v36 = vld [vmem:[#allocation2 + $0x138] sm:$0xff] }
 0x20a   : > { %1478 = vmatprep.subr.bf16.mxu0 %v5410_v37  ;;  %v5421_v37 = vcombine.low %v1044_v31, %v1048_v50  ;;  %v5430_v38 = vcombine.high %v1052_v35, %v1056_v36  ;;  %v6032_v31 = vld [vmem:[#allocation5 + $0x128] ss:$16 sps:$4 sm:$0xff]   ;;  %v6037_v50 = vld [vmem:[#allocation5 + $0x144] ss:$16 sps:$4 sm:$0xff]  }
 0x20b   : > { %1444 = vmatmul.mubr.bf16.gmra.mrb[12].mxu0 %v7041_v51  ;;  %1590 = vmatmul.mubr.bf16.gmra.mrb[4].mxu1 %v7041_v51 }
 0x20c   : > { %1453 = vmatprep.mubr.bf16.mxu0 %v6647_v1  ;;  %1599 = vmatprep.mubr.bf16.mxu1 %v6647_v1 }
 0x20d   : > { %1479 = vmatpush1.bf16.msra.mxu0 %v5409_v41  ;;  %v1064_v41 = vld [vmem:[#allocation2 + $0x178] sm:$0xff] }
 0x20e   : > { %1480 = vmatprep.subr.bf16.mxu0 %v5418_v42  ;;  %v5429_v42 = vcombine.low %v1052_v35, %v1056_v36  ;;  %v5438_v49 = vcombine.high %v1060_v39, %v1064_v41  ;;  %v6038_v35 = vld [vmem:[#allocation5 + $0x148] ss:$16 sps:$4 sm:$0xff]   ;;  %v6043_v36 = vld [vmem:[#allocation5 + $0x164] ss:$16 sps:$4 sm:$0xff]  }
 0x211   : > { %1481 = vmatpush1.bf16.msra.mxu0 %v5417_v47  ;;  %v1072_v47 = vld [vmem:[#allocation2 + $0x1b8] sm:$0xff] }
 0x212   : > { %1482 = vmatprep.subr.bf16.mxu0 %v5426_v48  ;;  %v5437_v48 = vcombine.low %v1060_v39, %v1064_v41  ;;  %v5446_v52 = vcombine.high %v1068_v43, %v1072_v47  ;;  %v6044_v39 = vld [vmem:[#allocation5 + $0x168] ss:$16 sps:$4 sm:$0xff]   ;;  %v6049_v41 = vld [vmem:[#allocation5 + $0x184] ss:$16 sps:$4 sm:$0xff]  }
 0x215   : > { %1483 = vmatpush1.bf16.msra.mxu0 %v5425_v54  ;;  %v1080_v54 = vld [vmem:[#allocation2 + $0x1f8] sm:$0xff] }
 0x216   : > { %1484 = vmatprep.subr.bf16.mxu0 %v5434_v63  ;;  %v5445_v63 = vcombine.low %v1068_v43, %v1072_v47  ;;  %v5454_v6 = vcombine.high %v1076_v53, %v1080_v54  ;;  %v5453_v55 = vcombine.low %v1076_v53, %v1080_v54  ;;  %v6050_v43 = vld [vmem:[#allocation5 + $0x188] ss:$16 sps:$4 sm:$0xff]   ;;  %v6055_v47 = vld [vmem:[#allocation5 + $0x1a4] ss:$16 sps:$4 sm:$0xff]  }
 0x217   : > { %v6056_v53 = vld [vmem:[#allocation5 + $0x1a8] ss:$16 sps:$4 sm:$0xff]   ;;  %v6061_v54 = vld [vmem:[#allocation5 + $0x1c4] ss:$16 sps:$4 sm:$0xff]  }
 0x218   : > { %v5840_v60 = vpop.f32.mrb[4].mxu0 }
 0x219   : > { %v988_v61 = vmul.f32 %v5840_v60, %v7026_v11  ;;  %v960_v62 = vpop.f32.mrb[5].mxu0  ;;  %1485 = vmatpush1.bf16.msra.mxu0 %v5433_v56  ;;  %v5977_v56 = vld [vmem:[#allocation5 + $0x4] ss:$16 sps:$4 sm:$0xff]  }
 0x21a   : > { %v986_v3 = vmul.f32 %v7026_v11, %v960_v62  ;;  %v5841_v4 = vpop.f32.mrb[6].mxu0  ;;  %1486 = vmatprep.subr.bf16.mxu0 %v5442_v57  ;;  %v5980_v57 = vld [vmem:[#allocation5 + $0xc] ss:$16 sps:$4 sm:$0xff]   ;;  %3617 = vmatprep.subr.bf16.mxu1 %v5977_v56  ;;  %v5983_v60 = vld [vmem:[#allocation5 + $0x24] ss:$16 sps:$4 sm:$0xff]  }
 0x21b   : > { %v1003_v16 = vadd.f32 %v7031_v0, %v988_v61  ;;  %v989_v18 = vmul.f32 %v5841_v4, %v7026_v11  ;;  %v963_v5 = vpop.f32.mrb[7].mxu0  ;;  %3618 = vmatpush1.bf16.msra.mxu1 %v5975_v58  ;;  %v5986_v61 = vld [vmem:[#allocation5 + $0x2c] ss:$16 sps:$4 sm:$0xff]   ;;  %v5981_v62 = vld [vmem:[#allocation5 + $0x20] ss:$16 sps:$4 sm:$0xff]  }
 0x21c   : > { %v1001_v9 = vadd.f32 %v7031_v0, %v986_v3  ;;  %v987_v10 = vmul.f32 %v7026_v11, %v963_v5  ;;  %v1028_v11 = vld [vmem:[#allocation2 + $0x58] sm:$0xff]  ;;  %3619 = vmatprep.subr.bf16.mxu1 %v5983_v60  ;;  %v5987_v4 = vld [vmem:[#allocation5 + $0x40] ss:$16 sps:$4 sm:$0xff]   ;;  %v6067_v56 = vld [vmem:[#allocation5 + $0x1e4] ss:$16 sps:$4 sm:$0xff]  }
 0x21d   : > { %v1004_v12 = vadd.f32 %v7031_v0, %v989_v18  ;;  %1487 = vmatpush1.bf16.msra.mxu0 %v5441_v2  ;;  %v1011_v19 = vmax.f32 %v1003_v16, 0.0  ;;  %v5984_v2 = vld [vmem:[#allocation5 + $0x28] ss:$16 sps:$4 sm:$0xff]   ;;  %v5992_v3 = vld [vmem:[#allocation5 + $0x4c] ss:$16 sps:$4 sm:$0xff]  }
 0x21e   : > { %v1002_v14 = vadd.f32 %v7031_v0, %v987_v10  ;;  %1488 = vmatprep.subr.bf16.mxu0 %v5450_v15  ;;  %v1009_v21 = vmax.f32 %v1001_v9, 0.0  ;;  %v1032_v0 = vld [vmem:[#allocation2 + $0x78] sm:$0xff]  ;;  %v5995_v16 = vld [vmem:[#allocation5 + $0x64] ss:$16 sps:$4 sm:$0xff]   ;;  %v5999_v9 = vld [vmem:[#allocation5 + $0x80] ss:$16 sps:$4 sm:$0xff]  }
 0x21f   : > { %v1012_v20 = vmax.f32 %v1004_v12, 0.0  ;;  %v5406_v26 = vcombine.high %v1028_v11, %v1032_v0  ;;  %v5405_v29 = vcombine.low %v1028_v11, %v1032_v0  ;;  %3620 = vmatpush1.bf16.msra.mxu1 %v5981_v62  ;;  %v5990_v15 = vld [vmem:[#allocation5 + $0x48] ss:$16 sps:$4 sm:$0xff]   ;;  %v5998_v18 = vld [vmem:[#allocation5 + $0x6c] ss:$16 sps:$4 sm:$0xff]   ;;  %v1713_v62 = vsub.s32 4, %v6942_v40 }
 0x220   : > { %v1010_v22 = vmax.f32 %v1002_v14, 0.0  ;;  %v5996_v5 = vld [vmem:[#allocation5 + $0x68] ss:$16 sps:$4 sm:$0xff]   ;;  %v6007_v12 = vld [vmem:[#allocation5 + $0xa4] ss:$16 sps:$4 sm:$0xff]  }
 0x221   : > { %v7061_v23 = vpack.c.bf16 %v1012_v20, %v1011_v19  ;;  %1489 = vmatpush1.bf16.msra.mxu0 %v5449_v13  ;;  %v6002_v10 = vld [vmem:[#allocation5 + $0x88] ss:$16 sps:$4 sm:$0xff]   ;;  %v6010_v13 = vld [vmem:[#allocation5 + $0xac] ss:$16 sps:$4 sm:$0xff]   ;;  %v6005_v14 = vld [vmem:[#allocation5 + $0xa0] ss:$16 sps:$4 sm:$0xff]  }
 0x222   : > { %v7063_v24 = vpack.c.bf16 %v1010_v22, %v1009_v21  ;;  %1620 = vmatprep.subr.bf16.mxu0 %v5398_v17  ;;  %v6008_v17 = vld [vmem:[#allocation5 + $0xa8] ss:$16 sps:$4 sm:$0xff]   ;;  %v6013_v19 = vld [vmem:[#allocation5 + $0xc4] ss:$16 sps:$4 sm:$0xff]   ;;  %v6011_v20 = vld [vmem:[#allocation5 + $0xc0] ss:$16 sps:$4 sm:$0xff]  }
 0x223   : > { %v6014_v21 = vld [vmem:[#allocation5 + $0xc8] ss:$16 sps:$4 sm:$0xff]   ;;  %v6019_v22 = vld [vmem:[#allocation5 + $0xe4] ss:$16 sps:$4 sm:$0xff]   ;;  %v6017_v11 = vld [vmem:[#allocation5 + $0xe0] ss:$16 sps:$4 sm:$0xff]  }
 0x224   : > { %1454 = vmatmul.mubr.bf16.gmra.mrb[16].mxu0 %v7063_v24  ;;  %1600 = vmatmul.mubr.bf16.gmra.mrb[8].mxu1 %v7063_v24  ;;  %v6020_v0 = vld [vmem:[#allocation5 + $0xe8] ss:$16 sps:$4 sm:$0xff]   ;;  %v6065_v58 = vld [vmem:[#allocation5 + $0x1e0] ss:$16 sps:$4 sm:$0xff]   ;;  %v6073_v60 = vld [vmem:[#allocation5 + $0x204] ss:$16 sps:$4 sm:$0xff]  }
 0x225   : > { %1463 = vmatprep.mubr.bf16.mxu0 %v6647_v1  ;;  %1609 = vmatprep.mubr.bf16.mxu1 %v6647_v1 }
 0x22c   : > { %1464 = vmatmul.mubr.bf16.gmra.mrb[20].mxu0 %v7061_v23  ;;  %1610 = vmatmul.mubr.bf16.gmra.mrb[12].mxu1 %v7061_v23 }
 0x22d   : > { %1506 = vmatprep.mubr.bf16.mxu0 %v6647_v1 }
 0x234   : > { %1507 = vmatmul.mubr.bf16.vlgmr.msra.gmra.mrb[24].mxu0 %v7043_v32 }
 0x235   : > { %1621 = vmatpush1.bf16.msra.mxu0 %v5397_v25  ;;  %1516 = vmatprep.mubr.bf16.mxu0 %v6647_v1  ;;  %v6025_v25 = vld [vmem:[#allocation5 + $0x104] ss:$16 sps:$4 sm:$0xff]  }
 0x236   : > { %1622 = vmatprep.subr.bf16.mxu0 %v5406_v26  ;;  %v6023_v26 = vld [vmem:[#allocation5 + $0x100] ss:$16 sps:$4 sm:$0xff]  }
 0x239   : > { %1623 = vmatpush1.bf16.msra.mxu0 %v5405_v29  ;;  %v6034_v29 = vld [vmem:[#allocation5 + $0x12c] ss:$16 sps:$4 sm:$0xff]  }
 0x23a   : > { %1624 = vmatprep.subr.bf16.mxu0 %v5414_v30  ;;  %v6029_v30 = vld [vmem:[#allocation5 + $0x120] ss:$16 sps:$4 sm:$0xff]  }
 0x23c   : > { %1517 = vmatmul.mubr.bf16.gmra.mrb[28].mxu0 %v7041_v51 }
 0x23d   : > { %1625 = vmatpush1.bf16.msra.mxu0 %v5413_v33  ;;  %1526 = vmatprep.mubr.bf16.mxu0 %v6647_v1  ;;  %v6040_v33 = vld [vmem:[#allocation5 + $0x14c] ss:$16 sps:$4 sm:$0xff]  }
 0x23e   : > { %1626 = vmatprep.subr.bf16.mxu0 %v5422_v34  ;;  %v6035_v34 = vld [vmem:[#allocation5 + $0x140] ss:$16 sps:$4 sm:$0xff]  }
 0x241   : > { %1627 = vmatpush1.bf16.msra.mxu0 %v5421_v37  ;;  %v6046_v37 = vld [vmem:[#allocation5 + $0x16c] ss:$16 sps:$4 sm:$0xff]  }
 0x242   : > { %1628 = vmatprep.subr.bf16.mxu0 %v5430_v38  ;;  %v6041_v38 = vld [vmem:[#allocation5 + $0x160] ss:$16 sps:$4 sm:$0xff]  }
 0x244   : > { %1527 = vmatmul.mubr.bf16.gmra.mrb[32].mxu0 %v7063_v24 }
 0x245   : > { %1629 = vmatpush1.bf16.msra.mxu0 %v5429_v42  ;;  %1536 = vmatprep.mubr.bf16.mxu0 %v6647_v1  ;;  %v6052_v42 = vld [vmem:[#allocation5 + $0x18c] ss:$16 sps:$4 sm:$0xff]  }
 0x246   : > { %1630 = vmatprep.subr.bf16.mxu0 %v5438_v49  ;;  %v6047_v49 = vld [vmem:[#allocation5 + $0x180] ss:$16 sps:$4 sm:$0xff]  }
 0x249   : > { %1631 = vmatpush1.bf16.msra.mxu0 %v5437_v48  ;;  %v6058_v48 = vld [vmem:[#allocation5 + $0x1ac] ss:$16 sps:$4 sm:$0xff]  }
 0x24a   : > { %1632 = vmatprep.subr.bf16.mxu0 %v5446_v52  ;;  %v6053_v52 = vld [vmem:[#allocation5 + $0x1a0] ss:$16 sps:$4 sm:$0xff]  }
 0x24c   : > { %1537 = vmatmul.mubr.bf16.gmra.mrb[36].mxu0 %v7061_v23 }
 0x24d   : > { %1633 = vmatpush1.bf16.msra.mxu0 %v5445_v63  ;;  %1652 = vmatprep.mubr.bf16.mxu0 %v6647_v1  ;;  %v6064_v63 = vld [vmem:[#allocation5 + $0x1cc] ss:$16 sps:$4 sm:$0xff]  }
 0x24e   : > { %1634 = vmatprep.subr.bf16.mxu0 %v5454_v6  ;;  %v6059_v6 = vld [vmem:[#allocation5 + $0x1c0] ss:$16 sps:$4 sm:$0xff]  }
 0x251   : > { %1635 = vmatpush1.bf16.msra.mxu0 %v5453_v55  ;;  %v6062_v55 = vld [vmem:[#allocation5 + $0x1c8] ss:$16 sps:$4 sm:$0xff]  }
 0x252   : > { %3781 = vmatprep.subr.bf16.mxu0 %v5980_v57  ;;  %v6070_v57 = vld [vmem:[#allocation5 + $0x1ec] ss:$16 sps:$4 sm:$0xff]  }
 0x254   : > { %1653 = vmatmul.mubr.bf16.vlgmr.msra.gmra.mrb[40].mxu0 %v7043_v32  ;;  %v5989_v32 = vld [vmem:[#allocation5 + $0x44] ss:$16 sps:$4 sm:$0xff]  }
 0x255   : > { %1662 = vmatprep.mubr.bf16.mxu0 %v6647_v1  ;;  %3782 = vmatpush1.bf16.msra.mxu0 %v5978_v59  ;;  %v6068_v59 = vld [vmem:[#allocation5 + $0x1e8] ss:$16 sps:$4 sm:$0xff]  }
 0x256   : > { %3783 = vmatprep.subr.bf16.mxu0 %v5986_v61  ;;  %3621 = vmatprep.subr.bf16.mxu1 %v5989_v32  ;;  %v6076_v61 = vld [vmem:[#allocation5 + $0x20c] ss:$16 sps:$4 sm:$0xff]   ;;  %v1717_v32 = vsub.s32 5, %v6942_v40 }
 0x257   : > { %3622 = vmatpush1.bf16.msra.mxu1 %v5987_v4 }
 0x258   : > { %3623 = vmatprep.subr.bf16.mxu1 %v5995_v16 }
 0x259   : > { %3784 = vmatpush1.bf16.msra.mxu0 %v5984_v2  ;;  %v7091_v2 = vld [vmem:[%s7781_s8] sm:$0xff] }
 0x25a   : > { %3785 = vmatprep.subr.bf16.mxu0 %v5992_v3  ;;  %v7097_v3 = vld [vmem:[%s7782_s9] sm:$0xff]  ;;  %v7101_v4 = vrot.slane %v7091_v2, %v6951_v46  ;;  %v7108_v16 = vrot.slane %v7091_v2, %v6948_v45 }
 0x25c   : > { %1663 = vmatmul.mubr.bf16.gmra.mrb[44].mxu0 %v7041_v51  ;;  %v5993_v51 = vld [vmem:[#allocation5 + $0x60] ss:$16 sps:$4 sm:$0xff]  }
 0x25d   : > { %1672 = vmatprep.mubr.bf16.mxu0 %v6647_v1  ;;  %3786 = vmatpush1.bf16.msra.mxu0 %v5990_v15  ;;  %v7104_v15 = vrot.slane %v7091_v2, %v1713_v62 }
 0x25e   : > { %3787 = vmatprep.subr.bf16.mxu0 %v5998_v18  ;;  %3624 = vmatpush1.bf16.msra.mxu1 %v5993_v51  ;;  %v7111_v18 = vrot.slane %v7091_v2, %v1717_v32  ;;  %v7115_v51 = vrot.slane %v7097_v3, %v6951_v46 }
 0x25f   : > { %3625 = vmatprep.subr.bf16.mxu1 %v6001_v7 }
 0x261   : > { %3788 = vmatpush1.bf16.msra.mxu0 %v5996_v5  ;;  %v7118_v5 = vrot.slane %v7097_v3, %v1713_v62 }
 0x262   : > { %3789 = vmatprep.subr.bf16.mxu0 %v6004_v8  ;;  %3626 = vmatpush1.bf16.msra.mxu1 %v5999_v9  ;;  %v7122_v9 = vrot.slane %v7097_v3, %v6948_v45 }
 0x263   : > { %3627 = vmatprep.subr.bf16.mxu1 %v6007_v12 }
 0x264   : > { %1673 = vmatmul.mubr.bf16.gmra.mrb[48].mxu0 %v7063_v24  ;;  %v6022_v24 = vld [vmem:[#allocation5 + $0xec] ss:$16 sps:$4 sm:$0xff]  }
 0x265   : > { %1682 = vmatprep.mubr.bf16.mxu0 %v6647_v1  ;;  %3790 = vmatpush1.bf16.msra.mxu0 %v6002_v10  ;;  %v6016_v1 = vld [vmem:[#allocation5 + $0xcc] ss:$16 sps:$4 sm:$0xff]   ;;  %v7125_v10 = vrot.slane %v7097_v3, %v1717_v32 }
 0x266   : > { %3791 = vmatprep.subr.bf16.mxu0 %v6010_v13  ;;  %3628 = vmatpush1.bf16.msra.mxu1 %v6005_v14 }
 0x267   : > { %3629 = vmatprep.subr.bf16.mxu1 %v6013_v19 }
 0x269   : > { %3792 = vmatpush1.bf16.msra.mxu0 %v6008_v17 }
 0x26a   : > { %3793 = vmatprep.subr.bf16.mxu0 %v6016_v1  ;;  %3630 = vmatpush1.bf16.msra.mxu1 %v6011_v20 }
 0x26b   : > { %3631 = vmatprep.subr.bf16.mxu1 %v6019_v22 }
 0x26c   : > { %1683 = vmatmul.mubr.bf16.gmra.mrb[52].mxu0 %v7061_v23  ;;  %v6028_v23 = vld [vmem:[#allocation5 + $0x10c] ss:$16 sps:$4 sm:$0xff]  }
 0x26d   : > { %3794 = vmatpush1.bf16.msra.mxu0 %v6014_v21 }
 0x26e   : > { %3795 = vmatprep.subr.bf16.mxu0 %v6022_v24  ;;  %3632 = vmatpush1.bf16.msra.mxu1 %v6017_v11 }
 0x26f   : > { %3633 = vmatprep.subr.bf16.mxu1 %v6025_v25 }
 0x271   : > { %3796 = vmatpush1.bf16.msra.mxu0 %v6020_v0 }
 0x272   : > { %3797 = vmatprep.subr.bf16.mxu0 %v6028_v23  ;;  %3634 = vmatpush1.bf16.msra.mxu1 %v6023_v26 }
 0x273   : > { %3635 = vmatprep.subr.bf16.mxu1 %v6031_v28 }
 0x275   : > { %3798 = vmatpush1.bf16.msra.mxu0 %v6026_v27 }
 0x276   : > { %3799 = vmatprep.subr.bf16.mxu0 %v6034_v29  ;;  %3636 = vmatpush1.bf16.msra.mxu1 %v6029_v30 }
 0x277   : > { %3637 = vmatprep.subr.bf16.mxu1 %v6037_v50 }
 0x279   : > { %3800 = vmatpush1.bf16.msra.mxu0 %v6032_v31 }
 0x27a   : > { %3801 = vmatprep.subr.bf16.mxu0 %v6040_v33  ;;  %3638 = vmatpush1.bf16.msra.mxu1 %v6035_v34 }
 0x27b   : > { %3639 = vmatprep.subr.bf16.mxu1 %v6043_v36 }
 0x27d   : > { %3802 = vmatpush1.bf16.msra.mxu0 %v6038_v35 }
 0x27e   : > { %3803 = vmatprep.subr.bf16.mxu0 %v6046_v37  ;;  %3640 = vmatpush1.bf16.msra.mxu1 %v6041_v38 }
 0x27f   : > { %3641 = vmatprep.subr.bf16.mxu1 %v6049_v41 }
 0x281   : > { %3804 = vmatpush1.bf16.msra.mxu0 %v6044_v39 }
 0x282   : > { %3805 = vmatprep.subr.bf16.mxu0 %v6052_v42  ;;  %3642 = vmatpush1.bf16.msra.mxu1 %v6047_v49 }
 0x283   : > { %3643 = vmatprep.subr.bf16.mxu1 %v6055_v47 }
 0x285   : > { %3806 = vmatpush1.bf16.msra.mxu0 %v6050_v43 }
 0x286   : > { %3807 = vmatprep.subr.bf16.mxu0 %v6058_v48  ;;  %3644 = vmatpush1.bf16.msra.mxu1 %v6053_v52 }
 0x287   : > { %3645 = vmatprep.subr.bf16.mxu1 %v6061_v54 }
 0x289   : > { %3808 = vmatpush1.bf16.msra.mxu0 %v6056_v53 }
 0x28a   : > { %3809 = vmatprep.subr.bf16.mxu0 %v6064_v63  ;;  %3646 = vmatpush1.bf16.msra.mxu1 %v6059_v6 }
 0x28b   : > { %3647 = vmatprep.subr.bf16.mxu1 %v6067_v56 }
 0x28d   : > { %3810 = vmatpush1.bf16.msra.mxu0 %v6062_v55 }
 0x28e   : > { %3811 = vmatprep.subr.bf16.mxu0 %v6070_v57  ;;  %3648 = vmatpush1.bf16.msra.mxu1 %v6065_v58 }
 0x28f   : > { %3658 = vmatprep.subr.bf16.mxu1 %v6073_v60 }
 0x291   : > { %3812 = vmatpush1.bf16.msra.mxu0 %v6068_v59 }
 0x292   : > { %3822 = vmatprep.subr.bf16.mxu0 %v6076_v61 }
 0x2d6   : > { %v1435_v7 = vpop.f32.mrb[8].mxu0  ;;  %v1581_v8 = vpop.f32.mrb[0].mxu1 }
 0x2d7   : > { %v1735_v12 = vmul.f32 %v7101_v4, %v1435_v7  ;;  %v1739_v13 = vmul.f32 %v7104_v15, %v1581_v8  ;;  %v1437_v14 = vpop.f32.mrb[9].mxu0  ;;  %v1583_v17 = vpop.f32.mrb[1].mxu1 }
 0x2d8   : > { %v1736_v19 = vmul.f32 %v7108_v16, %v1437_v14  ;;  %v1740_v1 = vmul.f32 %v7111_v18, %v1583_v17  ;;  %v1439_v20 = vpop.f32.mrb[10].mxu0  ;;  %v1585_v21 = vpop.f32.mrb[2].mxu1 }
 0x2d9   : > { %v1841_v22 = vadd.f32 %v7115_v51, %v1735_v12  ;;  %v1845_v24 = vadd.f32 %v7118_v5, %v1739_v13  ;;  %v1743_v11 = vmul.f32 %v7101_v4, %v1439_v20  ;;  %v1747_v0 = vmul.f32 %v7104_v15, %v1585_v21  ;;  %v1441_v25 = vpop.f32.mrb[11].mxu0  ;;  %v1587_v23 = vpop.f32.mrb[3].mxu1 }
 0x2da   : > { %v1842_v26 = vadd.f32 %v7122_v9, %v1736_v19  ;;  %v1846_v27 = vadd.f32 %v7125_v10, %v1740_v1  ;;  %v1744_v28 = vmul.f32 %v7108_v16, %v1441_v25  ;;  %v1748_v29 = vmul.f32 %v7111_v18, %v1587_v23 }
 0x2db   : > { %v1849_v30 = vadd.f32 %v7115_v51, %v1743_v11  ;;  %v1853_v31 = vadd.f32 %v7118_v5, %v1747_v0  ;;  %v1905_v34 = vmax.f32 %v1841_v22, 0.0  ;;  %v1909_v35 = vmax.f32 %v1845_v24, 0.0 }
 0x2dc   : > { %v1850_v50 = vadd.f32 %v7122_v9, %v1744_v28  ;;  %v1854_v33 = vadd.f32 %v7125_v10, %v1748_v29  ;;  %v1906_v38 = vmax.f32 %v1842_v26, 0.0  ;;  %v1910_v39 = vmax.f32 %v1846_v27, 0.0 }
 0x2dd   : > { %v1913_v36 = vmax.f32 %v1849_v30, 0.0  ;;  %v1917_v37 = vmax.f32 %v1853_v31, 0.0 }
 0x2de   : > { %v1914_v41 = vmax.f32 %v1850_v50, 0.0  ;;  %v1918_v42 = vmax.f32 %v1854_v33, 0.0  ;;  %v1445_v49 = vpop.f32.mrb[12].mxu0  ;;  %v1591_v43 = vpop.f32.mrb[4].mxu1 }
 0x2df   : > { %v1969_v47 = vmax.f32 %v1905_v34, %v1913_v36  ;;  %v2021_v48 = vmax.f32 %v1909_v35, %v1917_v37  ;;  %v1751_v52 = vmul.f32 %v7101_v4, %v1445_v49  ;;  %v1755_v53 = vmul.f32 %v7104_v15, %v1591_v43  ;;  %v1447_v54 = vpop.f32.mrb[13].mxu0  ;;  %v1593_v63 = vpop.f32.mrb[5].mxu1 }
 0x2e0   : > { %v1982_v6 = vmax.f32 %v1906_v38, %v1914_v41  ;;  %v2034_v55 = vmax.f32 %v1910_v39, %v1918_v42  ;;  %v1752_v56 = vmul.f32 %v7108_v16, %v1447_v54  ;;  %v1756_v57 = vmul.f32 %v7111_v18, %v1593_v63  ;;  %v1449_v58 = vpop.f32.mrb[14].mxu0  ;;  %v1595_v59 = vpop.f32.mrb[6].mxu1 }
 0x2e1   : > { %v1857_v60 = vadd.f32 %v7115_v51, %v1751_v52  ;;  %v1861_v61 = vadd.f32 %v7118_v5, %v1755_v53  ;;  %v1759_v62 = vmul.f32 %v7101_v4, %v1449_v58  ;;  %v1763_v32 = vmul.f32 %v7104_v15, %v1595_v59  ;;  %v1451_v7 = vpop.f32.mrb[15].mxu0  ;;  %v1597_v8 = vpop.f32.mrb[7].mxu1 }
 0x2e2   : > { %v1858_v12 = vadd.f32 %v7122_v9, %v1752_v56  ;;  %v1862_v13 = vadd.f32 %v7125_v10, %v1756_v57  ;;  %v1760_v14 = vmul.f32 %v7108_v16, %v1451_v7  ;;  %v1764_v17 = vmul.f32 %v7111_v18, %v1597_v8 }
 0x2e3   : > { %v1921_v19 = vmax.f32 %v1857_v60, 0.0  ;;  %v1925_v1 = vmax.f32 %v1861_v61, 0.0  ;;  %v1865_v20 = vadd.f32 %v7115_v51, %v1759_v62  ;;  %v1869_v21 = vadd.f32 %v7118_v5, %v1763_v32 }
 0x2e4   : > { %v1922_v22 = vmax.f32 %v1858_v12, 0.0  ;;  %v1926_v24 = vmax.f32 %v1862_v13, 0.0  ;;  %v1866_v11 = vadd.f32 %v7122_v9, %v1760_v14  ;;  %v1870_v0 = vadd.f32 %v7125_v10, %v1764_v17 }
 0x2e5   : > { %v1970_v25 = vmax.f32 %v1969_v47, %v1921_v19  ;;  %v2022_v23 = vmax.f32 %v2021_v48, %v1925_v1  ;;  %v1929_v26 = vmax.f32 %v1865_v20, 0.0  ;;  %v1933_v27 = vmax.f32 %v1869_v21, 0.0 }
 0x2e6   : > { %v1983_v28 = vmax.f32 %v1982_v6, %v1922_v22  ;;  %v2035_v29 = vmax.f32 %v2034_v55, %v1926_v24  ;;  %v1930_v30 = vmax.f32 %v1866_v11, 0.0  ;;  %v1934_v31 = vmax.f32 %v1870_v0, 0.0 }
 0x2e7   : > { %v1971_v50 = vmax.f32 %v1970_v25, %v1929_v26  ;;  %v2023_v33 = vmax.f32 %v2022_v23, %v1933_v27  ;;  %v7160_v36 = vsub.s32 3, %v6942_v40  ;;  %v7166_v43 = vrot.slane %v7091_v2, %v6945_v44 }
 0x2e8   : > { %v1984_v34 = vmax.f32 %v1983_v28, %v1930_v30  ;;  %v2036_v35 = vmax.f32 %v2035_v29, %v1934_v31  ;;  %v7176_v63 = vrot.slane %v7097_v3, %v6945_v44 }
 0x2e9   : > { %v7170_v47 = vrot.slane %v7091_v2, %v7160_v36  ;;  %v7180_v6 = vrot.slane %v7097_v3, %v7160_v36 }
 0x2f7   : > { %v1455_v37 = vpop.f32.mrb[16].mxu0  ;;  %v1601_v38 = vpop.f32.mrb[8].mxu1 }
 0x2f8   : > { %v1767_v39 = vmul.f32 %v7101_v4, %v1455_v37  ;;  %v1771_v41 = vmul.f32 %v7104_v15, %v1601_v38  ;;  %v1457_v42 = vpop.f32.mrb[17].mxu0  ;;  %v1603_v49 = vpop.f32.mrb[9].mxu1 }
 0x2f9   : > { %v1768_v48 = vmul.f32 %v7108_v16, %v1457_v42  ;;  %v1772_v52 = vmul.f32 %v7111_v18, %v1603_v49  ;;  %v1459_v53 = vpop.f32.mrb[18].mxu0  ;;  %v1605_v54 = vpop.f32.mrb[10].mxu1 }
 0x2fa   : > { %v1873_v55 = vadd.f32 %v7115_v51, %v1767_v39  ;;  %v1877_v56 = vadd.f32 %v7118_v5, %v1771_v41  ;;  %v1775_v57 = vmul.f32 %v7101_v4, %v1459_v53  ;;  %v1779_v58 = vmul.f32 %v7104_v15, %v1605_v54  ;;  %v1461_v59 = vpop.f32.mrb[19].mxu0  ;;  %v1607_v60 = vpop.f32.mrb[11].mxu1 }
 0x2fb   : > { %v1874_v61 = vadd.f32 %v7122_v9, %v1768_v48  ;;  %v1878_v62 = vadd.f32 %v7125_v10, %v1772_v52  ;;  %v1776_v32 = vmul.f32 %v7108_v16, %v1461_v59  ;;  %v1780_v7 = vmul.f32 %v7111_v18, %v1607_v60 }
 0x2fc   : > { %v1937_v8 = vmax.f32 %v1873_v55, 0.0  ;;  %v1941_v12 = vmax.f32 %v1877_v56, 0.0  ;;  %v1881_v13 = vadd.f32 %v7115_v51, %v1775_v57  ;;  %v1885_v14 = vadd.f32 %v7118_v5, %v1779_v58 }
 0x2fd   : > { %v1938_v17 = vmax.f32 %v1874_v61, 0.0  ;;  %v1942_v19 = vmax.f32 %v1878_v62, 0.0  ;;  %v1882_v1 = vadd.f32 %v7122_v9, %v1776_v32  ;;  %v1886_v20 = vadd.f32 %v7125_v10, %v1780_v7 }
 0x2fe   : > { %v1972_v21 = vmax.f32 %v1971_v50, %v1937_v8  ;;  %v2024_v22 = vmax.f32 %v2023_v33, %v1941_v12  ;;  %v1945_v24 = vmax.f32 %v1881_v13, 0.0  ;;  %v1949_v11 = vmax.f32 %v1885_v14, 0.0 }
 0x2ff   : > { %v1985_v0 = vmax.f32 %v1984_v34, %v1938_v17  ;;  %v2037_v25 = vmax.f32 %v2036_v35, %v1942_v19  ;;  %v1946_v23 = vmax.f32 %v1882_v1, 0.0  ;;  %v1950_v26 = vmax.f32 %v1886_v20, 0.0  ;;  %v1465_v27 = vpop.f32.mrb[20].mxu0  ;;  %v1611_v28 = vpop.f32.mrb[12].mxu1 }
 0x300   : > { %v1973_v29 = vmax.f32 %v1972_v21, %v1945_v24  ;;  %v2025_v30 = vmax.f32 %v2024_v22, %v1949_v11  ;;  %v1783_v31 = vmul.f32 %v7101_v4, %v1465_v27  ;;  %v1787_v37 = vmul.f32 %v7104_v15, %v1611_v28  ;;  %v1467_v38 = vpop.f32.mrb[21].mxu0  ;;  %v1613_v39 = vpop.f32.mrb[13].mxu1 }
 0x301   : > { %v1986_v41 = vmax.f32 %v1985_v0, %v1946_v23  ;;  %v2038_v42 = vmax.f32 %v2037_v25, %v1950_v26  ;;  %v1784_v50 = vmul.f32 %v7108_v16, %v1467_v38  ;;  %v1788_v33 = vmul.f32 %v7111_v18, %v1613_v39  ;;  %v1469_v34 = vpop.f32.mrb[22].mxu0  ;;  %v1615_v35 = vpop.f32.mrb[14].mxu1 }
 0x302   : > { %v1889_v49 = vadd.f32 %v7115_v51, %v1783_v31  ;;  %v1893_v48 = vadd.f32 %v7118_v5, %v1787_v37  ;;  %v1791_v52 = vmul.f32 %v7101_v4, %v1469_v34  ;;  %v1795_v53 = vmul.f32 %v7104_v15, %v1615_v35  ;;  %v1471_v54 = vpop.f32.mrb[23].mxu0  ;;  %v1617_v55 = vpop.f32.mrb[15].mxu1 }
 0x303   : > { %v1890_v56 = vadd.f32 %v7122_v9, %v1784_v50  ;;  %v1894_v57 = vadd.f32 %v7125_v10, %v1788_v33  ;;  %v1792_v58 = vmul.f32 %v7108_v16, %v1471_v54  ;;  %v1796_v59 = vmul.f32 %v7111_v18, %v1617_v55 }
 0x304   : > { %v1953_v60 = vmax.f32 %v1889_v49, 0.0  ;;  %v1957_v61 = vmax.f32 %v1893_v48, 0.0  ;;  %v1897_v62 = vadd.f32 %v7115_v51, %v1791_v52  ;;  %v1901_v32 = vadd.f32 %v7118_v5, %v1795_v53 }
 0x305   : > { %v1954_v7 = vmax.f32 %v1890_v56, 0.0  ;;  %v1958_v4 = vmax.f32 %v1894_v57, 0.0  ;;  %v1898_v15 = vadd.f32 %v7122_v9, %v1792_v58  ;;  %v1902_v8 = vadd.f32 %v7125_v10, %v1796_v59 }
 0x306   : > { %v1974_v12 = vmax.f32 %v1973_v29, %v1953_v60  ;;  %v2026_v13 = vmax.f32 %v2025_v30, %v1957_v61  ;;  %v1961_v14 = vmax.f32 %v1897_v62, 0.0  ;;  %v1965_v17 = vmax.f32 %v1901_v32, 0.0 }
 0x307   : > { %v1987_v19 = vmax.f32 %v1986_v41, %v1954_v7  ;;  %v2039_v16 = vmax.f32 %v2038_v42, %v1958_v4  ;;  %v1962_v1 = vmax.f32 %v1898_v15, 0.0  ;;  %v1966_v18 = vmax.f32 %v1902_v8, 0.0  ;;  %v1508_v20 = vpop.f32.mrb[24].mxu0 }
 0x308   : > { %v1975_v21 = vmax.f32 %v1974_v12, %v1961_v14  ;;  %v7210_v22 = vmax.f32 %v2026_v13, %v1965_v17  ;;  %v1737_v51 = vmul.f32 %v7166_v43, %v1508_v20  ;;  %v1510_v5 = vpop.f32.mrb[25].mxu0 }
 0x309   : > { %v1988_v24 = vmax.f32 %v1987_v19, %v1962_v1  ;;  %v7213_v11 = vmax.f32 %v2039_v16, %v1966_v18  ;;  %v1738_v9 = vmul.f32 %v7170_v47, %v1510_v5  ;;  %v1512_v10 = vpop.f32.mrb[26].mxu0 }
 0x30a   : > { %v1976_v0 = vrot.slane %v1975_v21, 4  ;;  %v1843_v25 = vadd.f32 %v7176_v63, %v1737_v51  ;;  %v1745_v23 = vmul.f32 %v7166_v43, %v1512_v10  ;;  %v1514_v26 = vpop.f32.mrb[27].mxu0  ;;  %v6074_v51 = vld [vmem:[#allocation5 + $0x208] ss:$16 sps:$4 sm:$0xff]  }
 0x30b   : > { %v1989_v27 = vrot.slane %v1988_v24, 4  ;;  %v1844_v28 = vadd.f32 %v7180_v6, %v1738_v9  ;;  %v1746_v29 = vmul.f32 %v7170_v47, %v1514_v26 }
 0x30c   : > { %v1977_v30 = vmax.f32 %v1975_v21, %v1976_v0  ;;  %v1851_v31 = vadd.f32 %v7176_v63, %v1745_v23  ;;  %v1907_v41 = vmax.f32 %v1843_v25, 0.0  ;;  %v6071_v21 = vld [vmem:[#allocation5 + $0x200] ss:$16 sps:$4 sm:$0xff]   ;;  %v6079_v0 = vld [vmem:[#allocation5 + $0x224] ss:$16 sps:$4 sm:$0xff]  }
 0x30d   : > { %v1990_v37 = vmax.f32 %v1988_v24, %v1989_v27  ;;  %v1852_v38 = vadd.f32 %v7180_v6, %v1746_v29  ;;  %v1908_v50 = vmax.f32 %v1844_v28, 0.0  ;;  %v6082_v25 = vld [vmem:[#allocation5 + $0x22c] ss:$16 sps:$4 sm:$0xff]  }
 0x30e   : > { %v1978_v39 = vrot.slane %v1977_v30, 2  ;;  %v1915_v42 = vmax.f32 %v1851_v31, 0.0 }
 0x30f   : > { %v1916_v33 = vmax.f32 %v1852_v38, 0.0  ;;  %v1518_v34 = vpop.f32.mrb[28].mxu0  ;;  %v1991_v35 = vrot.slane %v1990_v37, 2  ;;  %v6077_v38 = vld [vmem:[#allocation5 + $0x220] ss:$16 sps:$4 sm:$0xff]  }
 0x310   : > { %v1979_v49 = vmax.f32 %v1977_v30, %v1978_v39  ;;  %v1995_v48 = vmax.f32 %v1907_v41, %v1915_v42  ;;  %v1753_v52 = vmul.f32 %v7166_v43, %v1518_v34  ;;  %v1520_v53 = vpop.f32.mrb[29].mxu0  ;;  %v6080_v39 = vld [vmem:[#allocation5 + $0x228] ss:$16 sps:$4 sm:$0xff]  }
 0x311   : > { %v2008_v54 = vmax.f32 %v1908_v50, %v1916_v33  ;;  %v1754_v55 = vmul.f32 %v7170_v47, %v1520_v53  ;;  %v1522_v56 = vpop.f32.mrb[30].mxu0  ;;  %v1992_v57 = vmax.f32 %v1990_v37, %v1991_v35  ;;  %v6085_v50 = vld [vmem:[#allocation5 + $0x244] ss:$16 sps:$4 sm:$0xff]   ;;  %v6088_v33 = vld [vmem:[#allocation5 + $0x24c] ss:$16 sps:$4 sm:$0xff]  }
 0x312   : > { %v1980_v58 = vrot.slane %v1979_v49, 1  ;;  %v1859_v59 = vadd.f32 %v7176_v63, %v1753_v52  ;;  %v1761_v60 = vmul.f32 %v7166_v43, %v1522_v56  ;;  %v1524_v61 = vpop.f32.mrb[31].mxu0  ;;  %v6086_v56 = vld [vmem:[#allocation5 + $0x248] ss:$16 sps:$4 sm:$0xff]  }
 0x313   : > { %v1860_v62 = vadd.f32 %v7180_v6, %v1754_v55  ;;  %v1762_v32 = vmul.f32 %v7170_v47, %v1524_v61  ;;  %v1993_v7 = vrot.slane %v1992_v57, 1  ;;  %v6083_v55 = vld [vmem:[#allocation5 + $0x240] ss:$16 sps:$4 sm:$0xff]   ;;  %v6094_v61 = vld [vmem:[#allocation5 + $0x26c] ss:$16 sps:$4 sm:$0xff]  }
 0x314   : > { %v1981_v4 = vmax.f32 %v1979_v49, %v1980_v58  ;;  %v1923_v15 = vmax.f32 %v1859_v59, 0.0  ;;  %v1867_v8 = vadd.f32 %v7176_v63, %v1761_v60  ;;  %v6091_v60 = vld [vmem:[#allocation5 + $0x264] ss:$16 sps:$4 sm:$0xff]  }
 0x315   : > { %v1924_v12 = vmax.f32 %v1860_v62, 0.0  ;;  %v1868_v13 = vadd.f32 %v7180_v6, %v1762_v32  ;;  %v1994_v14 = vmax.f32 %v1992_v57, %v1993_v7  ;;  %v1721_v62 = vsub.s32 6, %v6942_v40 }
 0x316   : > { %v1996_v17 = vmax.f32 %v1995_v48, %v1923_v15  ;;  %v1931_v19 = vmax.f32 %v1867_v8, 0.0  ;;  %v2073_v5 = vpack.c.bf16 %v1981_v4, %v1981_v4  ;;  %v1725_v15 = vsub.s32 7, %v6942_v40 }
 0x317   : > { %v2009_v16 = vmax.f32 %v2008_v54, %v1924_v12  ;;  %v1932_v1 = vmax.f32 %v1868_v13, 0.0  ;;  %v1528_v18 = vpop.f32.mrb[32].mxu0  ;;  %v2074_v20 = vpack.c.bf16 %v1994_v14, %v1994_v14  ;;  %v7248_v40 = vrot.slane %v7091_v2, %v1721_v62 }
 0x318   : > { %v1997_v24 = vmax.f32 %v1996_v17, %v1931_v19  ;;  %v1769_v9 = vmul.f32 %v7166_v43, %v1528_v18  ;;  %v1530_v10 = vpop.f32.mrb[33].mxu0  ;;  %v6089_v19 = vld [vmem:[#allocation5 + $0x260] ss:$16 sps:$4 sm:$0xff]  }
 0x319   : > { %v2010_v23 = vmax.f32 %v2009_v16, %v1932_v1  ;;  %v1770_v26 = vmul.f32 %v7170_v47, %v1530_v10  ;;  %v1532_v27 = vpop.f32.mrb[34].mxu0  ;;  %3649 = vmatprep.mubr.bf16.mxu1 %v2074_v20  ;;  %3813 = vmatprep.mubr.bf16.mxu0 %v2074_v20  ;;  %v6092_v16 = vld [vmem:[#allocation5 + $0x268] ss:$16 sps:$4 sm:$0xff]   ;;  %v6097_v20 = vld [vmem:[#allocation5 + $0x284] ss:$16 sps:$4 sm:$0xff]  }
 0x31a   : > { %v1875_v28 = vadd.f32 %v7176_v63, %v1769_v9  ;;  %v1777_v29 = vmul.f32 %v7166_v43, %v1532_v27  ;;  %v1534_v30 = vpop.f32.mrb[35].mxu0  ;;  %3650 = vmatmul.mubr.bf16.vlgmr.msra.gmra.mrb[16].mxu1 %v2073_v5  ;;  %3814 = vmatmul.mubr.bf16.vlgmr.msra.gmra.mrb[56].mxu0 %v2073_v5  ;;  %v7252_v5 = vrot.slane %v7091_v2, %v1725_v15 }
 0x31b   : > { %v1876_v31 = vadd.f32 %v7180_v6, %v1770_v26  ;;  %v1778_v37 = vmul.f32 %v7170_v47, %v1534_v30  ;;  %3659 = vmatpush1.bf16.msra.mxu1 %v6071_v21  ;;  %3823 = vmatpush1.bf16.msra.mxu0 %v6074_v51  ;;  %v6100_v21 = vld [vmem:[#allocation5 + $0x28c] ss:$16 sps:$4 sm:$0xff]   ;;  %v7255_v9 = vrot.slane %v7097_v3, %v1721_v62  ;;  %v6098_v26 = vld [vmem:[#allocation5 + $0x288] ss:$16 sps:$4 sm:$0xff]  }
 0x31c   : > { %v1939_v41 = vmax.f32 %v1875_v28, 0.0  ;;  %v1883_v42 = vadd.f32 %v7176_v63, %v1777_v29  ;;  %3660 = vmatprep.subr.bf16.mxu1 %v6079_v0  ;;  %3824 = vmatprep.subr.bf16.mxu0 %v6082_v25  ;;  %v7258_v25 = vrot.slane %v7097_v3, %v1725_v15  ;;  %v6103_v28 = vld [vmem:[#allocation5 + $0x2a4] ss:$16 sps:$4 sm:$0xff]   ;;  %v6106_v29 = vld [vmem:[#allocation5 + $0x2ac] ss:$16 sps:$4 sm:$0xff]  }
 0x31d   : > { %v1940_v34 = vmax.f32 %v1876_v31, 0.0  ;;  %v1884_v35 = vadd.f32 %v7180_v6, %v1778_v37  ;;  %v6118_v15 = vld [vmem:[#allocation5 + $0x2ec] ss:$16 sps:$4 sm:$0xff]  }
 0x31e   : > { %v1998_v49 = vmax.f32 %v1997_v24, %v1939_v41  ;;  %v1947_v48 = vmax.f32 %v1883_v42, 0.0 }
 0x31f   : > { %v2011_v52 = vmax.f32 %v2010_v23, %v1940_v34  ;;  %v1948_v53 = vmax.f32 %v1884_v35, 0.0  ;;  %3661 = vmatpush1.bf16.msra.mxu1 %v6077_v38  ;;  %3825 = vmatpush1.bf16.msra.mxu0 %v6080_v39  ;;  %v1538_v54 = vpop.f32.mrb[36].mxu0  ;;  %v6095_v23 = vld [vmem:[#allocation5 + $0x280] ss:$16 sps:$4 sm:$0xff]   ;;  %v6104_v34 = vld [vmem:[#allocation5 + $0x2a8] ss:$16 sps:$4 sm:$0xff]  }
 0x320   : > { %v1999_v57 = vmax.f32 %v1998_v49, %v1947_v48  ;;  %v1785_v58 = vmul.f32 %v7166_v43, %v1538_v54  ;;  %v1540_v59 = vpop.f32.mrb[37].mxu0  ;;  %3662 = vmatprep.subr.bf16.mxu1 %v6085_v50  ;;  %3826 = vmatprep.subr.bf16.mxu0 %v6088_v33  ;;  %v6101_v33 = vld [vmem:[#allocation5 + $0x2a0] ss:$16 sps:$4 sm:$0xff]   ;;  %v6109_v49 = vld [vmem:[#allocation5 + $0x2c4] ss:$16 sps:$4 sm:$0xff]  }
 0x321   : > { %v2012_v32 = vmax.f32 %v2011_v52, %v1948_v53  ;;  %v1786_v7 = vmul.f32 %v7170_v47, %v1540_v59  ;;  %v1542_v4 = vpop.f32.mrb[38].mxu0  ;;  %v6112_v48 = vld [vmem:[#allocation5 + $0x2cc] ss:$16 sps:$4 sm:$0xff]  }
 0x322   : > { %v1891_v8 = vadd.f32 %v7176_v63, %v1785_v58  ;;  %v1793_v12 = vmul.f32 %v7166_v43, %v1542_v4  ;;  %v1544_v13 = vpop.f32.mrb[39].mxu0  ;;  %v6115_v4 = vld [vmem:[#allocation5 + $0x2e4] ss:$16 sps:$4 sm:$0xff]  }
 0x323   : > { %v1892_v14 = vadd.f32 %v7180_v6, %v1786_v7  ;;  %v1794_v17 = vmul.f32 %v7170_v47, %v1544_v13  ;;  %3663 = vmatpush1.bf16.msra.mxu1 %v6083_v55  ;;  %3827 = vmatpush1.bf16.msra.mxu0 %v6086_v56  ;;  %v6107_v56 = vld [vmem:[#allocation5 + $0x2c0] ss:$16 sps:$4 sm:$0xff]  }
 0x324   : > { %v1955_v1 = vmax.f32 %v1891_v8, 0.0  ;;  %v1899_v18 = vadd.f32 %v7176_v63, %v1793_v12  ;;  %3664 = vmatprep.subr.bf16.mxu1 %v6091_v60  ;;  %3828 = vmatprep.subr.bf16.mxu0 %v6094_v61  ;;  %v6110_v60 = vld [vmem:[#allocation5 + $0x2c8] ss:$16 sps:$4 sm:$0xff]  }
 0x325   : > { %v1956_v43 = vmax.f32 %v1892_v14, 0.0  ;;  %v1900_v51 = vadd.f32 %v7180_v6, %v1794_v17 }
 0x326   : > { %v2000_v47 = vmax.f32 %v1999_v57, %v1955_v1  ;;  %v1963_v24 = vmax.f32 %v1899_v18, 0.0 }
 0x327   : > { %v2013_v10 = vmax.f32 %v2012_v32, %v1956_v43  ;;  %v1964_v63 = vmax.f32 %v1900_v51, 0.0  ;;  %3665 = vmatpush1.bf16.msra.mxu1 %v6089_v19  ;;  %3829 = vmatpush1.bf16.msra.mxu0 %v6092_v16  ;;  %v1654_v0 = vpop.f32.mrb[40].mxu0 }
 0x328   : > { %v7260_v27 = vmax.f32 %v2000_v47, %v1963_v24  ;;  %v1741_v2 = vmul.f32 %v7248_v40, %v1654_v0  ;;  %v1656_v6 = vpop.f32.mrb[41].mxu0  ;;  %3666 = vmatprep.subr.bf16.mxu1 %v6097_v20  ;;  %3830 = vmatprep.subr.bf16.mxu0 %v6100_v21  ;;  %v6113_v20 = vld [vmem:[#allocation5 + $0x2e0] ss:$16 sps:$4 sm:$0xff]   ;;  %v6116_v21 = vld [vmem:[#allocation5 + $0x2e8] ss:$16 sps:$4 sm:$0xff]  }
 0x329   : > { %v2014_v30 = vmax.f32 %v2013_v10, %v1964_v63  ;;  %v1742_v31 = vmul.f32 %v7252_v5, %v1656_v6  ;;  %v1658_v37 = vpop.f32.mrb[42].mxu0  ;;  %v6121_v24 = vld [vmem:[#allocation5 + $0x304] ss:$16 sps:$4 sm:$0xff]   ;;  %v6124_v10 = vld [vmem:[#allocation5 + $0x30c] ss:$16 sps:$4 sm:$0xff]  }
 0x32a   : > { %v1847_v38 = vadd.f32 %v7255_v9, %v1741_v2  ;;  %v1749_v3 = vmul.f32 %v7248_v40, %v1658_v37  ;;  %v1660_v39 = vpop.f32.mrb[43].mxu0  ;;  %v6122_v37 = vld [vmem:[#allocation5 + $0x308] ss:$16 sps:$4 sm:$0xff]  }
 0x32b   : > { %v2015_v41 = vrot.slane %v2014_v30, 4  ;;  %v1848_v42 = vadd.f32 %v7258_v25, %v1742_v31  ;;  %v1750_v50 = vmul.f32 %v7252_v5, %v1660_v39  ;;  %3667 = vmatpush1.bf16.msra.mxu1 %v6095_v23  ;;  %3831 = vmatpush1.bf16.msra.mxu0 %v6098_v26 }
 0x32c   : > { %v1855_v35 = vadd.f32 %v7255_v9, %v1749_v3  ;;  %3668 = vmatprep.subr.bf16.mxu1 %v6103_v28  ;;  %3832 = vmatprep.subr.bf16.mxu0 %v6106_v29  ;;  %v1911_v54 = vmax.f32 %v1847_v38, 0.0 }
 0x32d   : > { %v2016_v52 = vmax.f32 %v2014_v30, %v2015_v41  ;;  %v1856_v53 = vadd.f32 %v7258_v25, %v1750_v50  ;;  %v1912_v57 = vmax.f32 %v1848_v42, 0.0  ;;  %v6119_v30 = vld [vmem:[#allocation5 + $0x300] ss:$16 sps:$4 sm:$0xff]   ;;  %v6127_v41 = vld [vmem:[#allocation5 + $0x324] ss:$16 sps:$4 sm:$0xff]  }
 0x32e   : > { %v1919_v55 = vmax.f32 %v1855_v35, 0.0  ;;  %v6130_v42 = vld [vmem:[#allocation5 + $0x32c] ss:$16 sps:$4 sm:$0xff]  }
 0x32f   : > { %v1920_v58 = vmax.f32 %v1856_v53, 0.0  ;;  %3669 = vmatpush1.bf16.msra.mxu1 %v6101_v33  ;;  %3833 = vmatpush1.bf16.msra.mxu0 %v6104_v34  ;;  %v1664_v59 = vpop.f32.mrb[44].mxu0  ;;  %v2017_v61 = vrot.slane %v2016_v52, 2 }
 0x330   : > { %v2047_v62 = vmax.f32 %v1911_v54, %v1919_v55  ;;  %v1757_v32 = vmul.f32 %v7248_v40, %v1664_v59  ;;  %v1666_v7 = vpop.f32.mrb[45].mxu0  ;;  %3670 = vmatprep.subr.bf16.mxu1 %v6109_v49  ;;  %3834 = vmatprep.subr.bf16.mxu0 %v6112_v48  ;;  %v6125_v54 = vld [vmem:[#allocation5 + $0x320] ss:$16 sps:$4 sm:$0xff]   ;;  %v6128_v55 = vld [vmem:[#allocation5 + $0x328] ss:$16 sps:$4 sm:$0xff]  }
 0x331   : > { %v2060_v8 = vmax.f32 %v1912_v57, %v1920_v58  ;;  %v1758_v12 = vmul.f32 %v7252_v5, %v1666_v7  ;;  %v1668_v13 = vpop.f32.mrb[46].mxu0  ;;  %v2018_v14 = vmax.f32 %v2016_v52, %v2017_v61  ;;  %v6133_v58 = vld [vmem:[#allocation5 + $0x344] ss:$16 sps:$4 sm:$0xff]   ;;  %v6136_v59 = vld [vmem:[#allocation5 + $0x34c] ss:$16 sps:$4 sm:$0xff]  }
 0x332   : > { %v1863_v17 = vadd.f32 %v7255_v9, %v1757_v32  ;;  %v1765_v19 = vmul.f32 %v7248_v40, %v1668_v13  ;;  %v1670_v16 = vpop.f32.mrb[47].mxu0  ;;  %v2002_v13 = vrot.slane %v7260_v27, 4 }
 0x333   : > { %v1864_v1 = vadd.f32 %v7258_v25, %v1758_v12  ;;  %v1766_v18 = vmul.f32 %v7252_v5, %v1670_v16  ;;  %3671 = vmatpush1.bf16.msra.mxu1 %v6107_v56  ;;  %3835 = vmatpush1.bf16.msra.mxu0 %v6110_v60  ;;  %v2019_v43 = vrot.slane %v2018_v14, 1  ;;  %v6134_v12 = vld [vmem:[#allocation5 + $0x348] ss:$16 sps:$4 sm:$0xff]   ;;  %v6139_v16 = vld [vmem:[#allocation5 + $0x364] ss:$16 sps:$4 sm:$0xff]  }
 0x334   : > { %v1927_v51 = vmax.f32 %v1863_v17, 0.0  ;;  %v1871_v47 = vadd.f32 %v7255_v9, %v1765_v19  ;;  %3672 = vmatprep.subr.bf16.mxu1 %v6115_v4  ;;  %3836 = vmatprep.subr.bf16.mxu0 %v6118_v15 }
 0x335   : > { %v1928_v63 = vmax.f32 %v1864_v1, 0.0  ;;  %v1872_v0 = vadd.f32 %v7258_v25, %v1766_v18  ;;  %v2020_v23 = vmax.f32 %v2018_v14, %v2019_v43  ;;  %v6142_v1 = vld [vmem:[#allocation5 + $0x36c] ss:$16 sps:$4 sm:$0xff]   ;;  %v2041_v18 = vrot.slane %v7213_v11, 4 }
 0x336   : > { %v2048_v26 = vmax.f32 %v2047_v62, %v1927_v51  ;;  %v1935_v2 = vmax.f32 %v1871_v47, 0.0 }
 0x337   : > { %v2061_v6 = vmax.f32 %v2060_v8, %v1928_v63  ;;  %v1936_v28 = vmax.f32 %v1872_v0, 0.0  ;;  %3673 = vmatpush1.bf16.msra.mxu1 %v6113_v20  ;;  %3837 = vmatpush1.bf16.msra.mxu0 %v6116_v21  ;;  %v1674_v29 = vpop.f32.mrb[48].mxu0  ;;  %v2076_v31 = vpack.c.bf16 %v2020_v23, %v2020_v23  ;;  %v6131_v8 = vld [vmem:[#allocation5 + $0x340] ss:$16 sps:$4 sm:$0xff]   ;;  %v6140_v23 = vld [vmem:[#allocation5 + $0x368] ss:$16 sps:$4 sm:$0xff]  }
 0x338   : > { %v2049_v38 = vmax.f32 %v2048_v26, %v1935_v2  ;;  %v1773_v3 = vmul.f32 %v7248_v40, %v1674_v29  ;;  %v1676_v39 = vpop.f32.mrb[49].mxu0  ;;  %3674 = vmatprep.subr.bf16.mxu1 %v6121_v24  ;;  %3838 = vmatprep.subr.bf16.mxu0 %v6124_v10  ;;  %v6137_v0 = vld [vmem:[#allocation5 + $0x360] ss:$16 sps:$4 sm:$0xff]   ;;  %v2003_v26 = vmax.f32 %v7260_v27, %v2002_v13  ;;  %v6148_v29 = vld [vmem:[#allocation5 + $0x38c] ss:$16 sps:$4 sm:$0xff]  }
 0x339   : > { %v2062_v50 = vmax.f32 %v2061_v6, %v1936_v28  ;;  %v1774_v33 = vmul.f32 %v7252_v5, %v1676_v39  ;;  %v1678_v34 = vpop.f32.mrb[50].mxu0  ;;  %3690 = vmatprep.mubr.bf16.mxu1 %v2076_v31  ;;  %3854 = vmatprep.mubr.bf16.mxu0 %v2076_v31  ;;  %v6145_v28 = vld [vmem:[#allocation5 + $0x384] ss:$16 sps:$4 sm:$0xff]   ;;  %v6143_v39 = vld [vmem:[#allocation5 + $0x380] ss:$16 sps:$4 sm:$0xff]  }
 0x33a   : > { %v1879_v35 = vadd.f32 %v7255_v9, %v1773_v3  ;;  %v1781_v49 = vmul.f32 %v7248_v40, %v1678_v34  ;;  %v1680_v48 = vpop.f32.mrb[51].mxu0  ;;  %v6146_v27 = vld [vmem:[#allocation5 + $0x388] ss:$16 sps:$4 sm:$0xff]   ;;  %v6175_v13 = vld [vmem:[#allocation5 + $0x424] ss:$16 sps:$4 sm:$0xff]  }
 0x33b   : > { %v1880_v52 = vadd.f32 %v7258_v25, %v1774_v33  ;;  %v1782_v53 = vmul.f32 %v7252_v5, %v1680_v48  ;;  %3675 = vmatpush1.bf16.msra.mxu1 %v6119_v30  ;;  %3839 = vmatpush1.bf16.msra.mxu0 %v6122_v37  ;;  %v6152_v34 = vld [vmem:[#allocation5 + $0x3a8] ss:$16 sps:$4 sm:$0xff]   ;;  %v6160_v48 = vld [vmem:[#allocation5 + $0x3cc] ss:$16 sps:$4 sm:$0xff]  }
 0x33c   : > { %v1943_v56 = vmax.f32 %v1879_v35, 0.0  ;;  %v1887_v57 = vadd.f32 %v7255_v9, %v1781_v49  ;;  %3676 = vmatprep.subr.bf16.mxu1 %v6127_v41  ;;  %3840 = vmatprep.subr.bf16.mxu0 %v6130_v42  ;;  %v2004_v41 = vrot.slane %v2003_v26, 2  ;;  %v6157_v49 = vld [vmem:[#allocation5 + $0x3c4] ss:$16 sps:$4 sm:$0xff]  }
 0x33d   : > { %v1944_v60 = vmax.f32 %v1880_v52, 0.0  ;;  %v1888_v61 = vadd.f32 %v7258_v25, %v1782_v53  ;;  %v6155_v53 = vld [vmem:[#allocation5 + $0x3c0] ss:$16 sps:$4 sm:$0xff]  }
 0x33e   : > { %v2050_v62 = vmax.f32 %v2049_v38, %v1943_v56  ;;  %v1951_v32 = vmax.f32 %v1887_v57, 0.0  ;;  %v2005_v35 = vmax.f32 %v2003_v26, %v2004_v41  ;;  %v6166_v56 = vld [vmem:[#allocation5 + $0x3ec] ss:$16 sps:$4 sm:$0xff]   ;;  %v6218_v41 = vld [vmem:[#allocation5 + $0x508] ss:$16 sps:$4 sm:$0xff]  }
 0x33f   : > { %v2063_v7 = vmax.f32 %v2062_v50, %v1944_v60  ;;  %v1952_v4 = vmax.f32 %v1888_v61, 0.0  ;;  %3677 = vmatpush1.bf16.msra.mxu1 %v6125_v54  ;;  %3841 = vmatpush1.bf16.msra.mxu0 %v6128_v55  ;;  %v1684_v15 = vpop.f32.mrb[52].mxu0  ;;  %v6154_v50 = vld [vmem:[#allocation5 + $0x3ac] ss:$16 sps:$4 sm:$0xff]   ;;  %v6158_v54 = vld [vmem:[#allocation5 + $0x3c8] ss:$16 sps:$4 sm:$0xff]  }
 0x340   : > { %v2051_v14 = vmax.f32 %v2050_v62, %v1951_v32  ;;  %v1789_v17 = vmul.f32 %v7248_v40, %v1684_v15  ;;  %v1686_v19 = vpop.f32.mrb[53].mxu0  ;;  %3678 = vmatprep.subr.bf16.mxu1 %v6133_v58  ;;  %3842 = vmatprep.subr.bf16.mxu0 %v6136_v59  ;;  %v6163_v55 = vld [vmem:[#allocation5 + $0x3e4] ss:$16 sps:$4 sm:$0xff]   ;;  %v2006_v57 = vrot.slane %v2005_v35, 1  ;;  %v6161_v59 = vld [vmem:[#allocation5 + $0x3e0] ss:$16 sps:$4 sm:$0xff]  }
 0x341   : > { %v2064_v20 = vmax.f32 %v2063_v7, %v1952_v4  ;;  %v1790_v21 = vmul.f32 %v7252_v5, %v1686_v19  ;;  %v1688_v43 = vpop.f32.mrb[54].mxu0  ;;  %v6164_v60 = vld [vmem:[#allocation5 + $0x3e8] ss:$16 sps:$4 sm:$0xff]   ;;  %v6169_v62 = vld [vmem:[#allocation5 + $0x404] ss:$16 sps:$4 sm:$0xff]  }
 0x342   : > { %v1895_v51 = vadd.f32 %v7255_v9, %v1789_v17  ;;  %v1797_v47 = vmul.f32 %v7248_v40, %v1688_v43  ;;  %v1690_v24 = vpop.f32.mrb[55].mxu0  ;;  %v2042_v40 = vmax.f32 %v7213_v11, %v2041_v18  ;;  %v2007_v61 = vmax.f32 %v2005_v35, %v2006_v57  ;;  %v6172_v32 = vld [vmem:[#allocation5 + $0x40c] ss:$16 sps:$4 sm:$0xff]   ;;  %v6167_v4 = vld [vmem:[#allocation5 + $0x400] ss:$16 sps:$4 sm:$0xff]  }
 0x343   : > { %v1896_v10 = vadd.f32 %v7258_v25, %v1790_v21  ;;  %v1798_v63 = vmul.f32 %v7252_v5, %v1690_v24  ;;  %3679 = vmatpush1.bf16.msra.mxu1 %v6131_v8  ;;  %3843 = vmatpush1.bf16.msra.mxu0 %v6134_v12  ;;  %v6170_v8 = vld [vmem:[#allocation5 + $0x408] ss:$16 sps:$4 sm:$0xff]   ;;  %v6173_v17 = vld [vmem:[#allocation5 + $0x420] ss:$16 sps:$4 sm:$0xff]   ;;  %v6187_v21 = vld [vmem:[#allocation5 + $0x464] ss:$16 sps:$4 sm:$0xff]  }
 0x344   : > { %v1959_v2 = vmax.f32 %v1895_v51, 0.0  ;;  %v1903_v6 = vadd.f32 %v7255_v9, %v1797_v47  ;;  %3680 = vmatprep.subr.bf16.mxu1 %v6139_v16  ;;  %3844 = vmatprep.subr.bf16.mxu0 %v6142_v1  ;;  %v6151_v9 = vld [vmem:[#allocation5 + $0x3a4] ss:$16 sps:$4 sm:$0xff]   ;;  %v2043_v11 = vrot.slane %v2042_v40, 2  ;;  %v2075_v15 = vpack.c.bf16 %v2007_v61, %v2007_v61  ;;  %v6176_v19 = vld [vmem:[#allocation5 + $0x428] ss:$16 sps:$4 sm:$0xff]  }
 0x345   : > { %v1960_v30 = vmax.f32 %v1896_v10, 0.0  ;;  %v1904_v31 = vadd.f32 %v7258_v25, %v1798_v63  ;;  %v6149_v25 = vld [vmem:[#allocation5 + $0x3a0] ss:$16 sps:$4 sm:$0xff]   ;;  %v6181_v16 = vld [vmem:[#allocation5 + $0x444] ss:$16 sps:$4 sm:$0xff]  }
 0x346   : > { %v2052_v37 = vmax.f32 %v2051_v14, %v1959_v2  ;;  %v1967_v5 = vmax.f32 %v1903_v6, 0.0  ;;  %v2044_v52 = vmax.f32 %v2042_v40, %v2043_v11  ;;  %v6178_v14 = vld [vmem:[#allocation5 + $0x42c] ss:$16 sps:$4 sm:$0xff]   ;;  %v6179_v18 = vld [vmem:[#allocation5 + $0x440] ss:$16 sps:$4 sm:$0xff]  }
 0x347   : > { %v2065_v38 = vmax.f32 %v2064_v20, %v1960_v30  ;;  %v1968_v3 = vmax.f32 %v1904_v31, 0.0  ;;  %3681 = vmatpush1.bf16.msra.mxu1 %v6137_v0  ;;  %3845 = vmatpush1.bf16.msra.mxu0 %v6140_v23  ;;  %v6184_v1 = vld [vmem:[#allocation5 + $0x44c] ss:$16 sps:$4 sm:$0xff]   ;;  %v6182_v20 = vld [vmem:[#allocation5 + $0x448] ss:$16 sps:$4 sm:$0xff]  }
 0x348   : > { %v7298_v42 = vmax.f32 %v2052_v37, %v1967_v5  ;;  %3682 = vmatprep.subr.bf16.mxu1 %v6145_v28  ;;  %3846 = vmatprep.subr.bf16.mxu0 %v6148_v29  ;;  %v2045_v58 = vrot.slane %v2044_v52, 1  ;;  %v6190_v43 = vld [vmem:[#allocation5 + $0x46c] ss:$16 sps:$4 sm:$0xff]   ;;  %v6185_v51 = vld [vmem:[#allocation5 + $0x460] ss:$16 sps:$4 sm:$0xff]  }
 0x349   : > { %v7300_v33 = vmax.f32 %v2065_v38, %v1968_v3  ;;  %v6188_v47 = vld [vmem:[#allocation5 + $0x468] ss:$16 sps:$4 sm:$0xff]   ;;  %v6193_v24 = vld [vmem:[#allocation5 + $0x484] ss:$16 sps:$4 sm:$0xff]   ;;  %v6196_v10 = vld [vmem:[#allocation5 + $0x48c] ss:$16 sps:$4 sm:$0xff]  }
 0x34a   : > { %v2046_v7 = vmax.f32 %v2044_v52, %v2045_v58  ;;  %v6191_v63 = vld [vmem:[#allocation5 + $0x480] ss:$16 sps:$4 sm:$0xff]   ;;  %v6194_v0 = vld [vmem:[#allocation5 + $0x488] ss:$16 sps:$4 sm:$0xff]   ;;  %v6199_v23 = vld [vmem:[#allocation5 + $0x4a4] ss:$16 sps:$4 sm:$0xff]  }
 0x34b   : > { %3683 = vmatpush1.bf16.msra.mxu1 %v6143_v39  ;;  %3847 = vmatpush1.bf16.msra.mxu0 %v6146_v27  ;;  %v6202_v26 = vld [vmem:[#allocation5 + $0x4ac] ss:$16 sps:$4 sm:$0xff]   ;;  %v6197_v2 = vld [vmem:[#allocation5 + $0x4a0] ss:$16 sps:$4 sm:$0xff]   ;;  %v6200_v6 = vld [vmem:[#allocation5 + $0x4a8] ss:$16 sps:$4 sm:$0xff]  }
 0x34c   : > { %3684 = vmatprep.subr.bf16.mxu1 %v6151_v9  ;;  %3848 = vmatprep.subr.bf16.mxu0 %v6154_v50  ;;  %v2078_v12 = vpack.c.bf16 %v2046_v7, %v2046_v7  ;;  %v6205_v28 = vld [vmem:[#allocation5 + $0x4c4] ss:$16 sps:$4 sm:$0xff]   ;;  %v6208_v29 = vld [vmem:[#allocation5 + $0x4cc] ss:$16 sps:$4 sm:$0xff]   ;;  %v6203_v40 = vld [vmem:[#allocation5 + $0x4c0] ss:$16 sps:$4 sm:$0xff]  }
 0x34d   : > { %v6206_v30 = vld [vmem:[#allocation5 + $0x4c8] ss:$16 sps:$4 sm:$0xff]   ;;  %v6211_v31 = vld [vmem:[#allocation5 + $0x4e4] ss:$16 sps:$4 sm:$0xff]   ;;  %v6214_v37 = vld [vmem:[#allocation5 + $0x4ec] ss:$16 sps:$4 sm:$0xff]  }
 0x34e   : > { %v6209_v5 = vld [vmem:[#allocation5 + $0x4e0] ss:$16 sps:$4 sm:$0xff]   ;;  %v6212_v38 = vld [vmem:[#allocation5 + $0x4e8] ss:$16 sps:$4 sm:$0xff]   ;;  %v6217_v3 = vld [vmem:[#allocation5 + $0x504] ss:$16 sps:$4 sm:$0xff]  }
 0x34f   : > { %3685 = vmatpush1.bf16.msra.mxu1 %v6149_v25  ;;  %3849 = vmatpush1.bf16.msra.mxu0 %v6152_v34  ;;  %v6220_v39 = vld [vmem:[#allocation5 + $0x50c] ss:$16 sps:$4 sm:$0xff]   ;;  %v6215_v27 = vld [vmem:[#allocation5 + $0x500] ss:$16 sps:$4 sm:$0xff]   ;;  %v6223_v9 = vld [vmem:[#allocation5 + $0x524] ss:$16 sps:$4 sm:$0xff]  }
 0x350   : > { %3686 = vmatprep.subr.bf16.mxu1 %v6157_v49  ;;  %3850 = vmatprep.subr.bf16.mxu0 %v6160_v48  ;;  %v6226_v50 = vld [vmem:[#allocation5 + $0x52c] ss:$16 sps:$4 sm:$0xff]   ;;  %v6221_v11 = vld [vmem:[#allocation5 + $0x520] ss:$16 sps:$4 sm:$0xff]   ;;  %v6224_v25 = vld [vmem:[#allocation5 + $0x528] ss:$16 sps:$4 sm:$0xff]  }
 0x351   : > { %v6229_v34 = vld [vmem:[#allocation5 + $0x544] ss:$16 sps:$4 sm:$0xff]   ;;  %v6232_v35 = vld [vmem:[#allocation5 + $0x54c] ss:$16 sps:$4 sm:$0xff]   ;;  %v6227_v49 = vld [vmem:[#allocation5 + $0x540] ss:$16 sps:$4 sm:$0xff]  }
 0x352   : > { %v2028_v48 = vrot.slane %v7210_v22, 4  ;;  %v6230_v52 = vld [vmem:[#allocation5 + $0x548] ss:$16 sps:$4 sm:$0xff]  }
 0x353   : > { %3687 = vmatpush1.bf16.msra.mxu1 %v6155_v53  ;;  %3851 = vmatpush1.bf16.msra.mxu0 %v6158_v54  ;;  %v6235_v53 = vld [vmem:[#allocation5 + $0x564] ss:$16 sps:$4 sm:$0xff]   ;;  %v6238_v54 = vld [vmem:[#allocation5 + $0x56c] ss:$16 sps:$4 sm:$0xff]   ;;  %v6236_v58 = vld [vmem:[#allocation5 + $0x568] ss:$16 sps:$4 sm:$0xff]  }
 0x354   : > { %3688 = vmatprep.subr.bf16.mxu1 %v6163_v55  ;;  %3852 = vmatprep.subr.bf16.mxu0 %v6166_v56  ;;  %v2067_v55 = vrot.slane %v7300_v33, 4  ;;  %v6233_v56 = vld [vmem:[#allocation5 + $0x560] ss:$16 sps:$4 sm:$0xff]   ;;  %v2029_v57 = vmax.f32 %v7210_v22, %v2028_v48  ;;  %v6242_v7 = vld [vmem:[#allocation5 + $0x588] ss:$16 sps:$4 sm:$0xff]  }
 0x355   : > { %v6245_v22 = vld [vmem:[#allocation5 + $0x5a0] ss:$16 sps:$4 sm:$0xff]   ;;  %v6301_v48 = vld [vmem:[#allocation5 + $0x6c4] ss:$16 sps:$4 sm:$0xff]  }
 0x356   : > { %v2068_v61 = vmax.f32 %v7300_v33, %v2067_v55  ;;  %v6307_v55 = vld [vmem:[#allocation5 + $0x6e4] ss:$16 sps:$4 sm:$0xff]  }
 0x357   : > { %3689 = vmatpush1.bf16.msra.mxu1 %v6161_v59  ;;  %3853 = vmatpush1.bf16.msra.mxu0 %v6164_v60  ;;  %v6241_v59 = vld [vmem:[#allocation5 + $0x584] ss:$16 sps:$4 sm:$0xff]   ;;  %v6244_v60 = vld [vmem:[#allocation5 + $0x58c] ss:$16 sps:$4 sm:$0xff]  }
 0x358   : > { %3699 = vmatprep.subr.bf16.mxu1 %v6169_v62  ;;  %3863 = vmatprep.subr.bf16.mxu0 %v6172_v32  ;;  %v6239_v62 = vld [vmem:[#allocation5 + $0x580] ss:$16 sps:$4 sm:$0xff]   ;;  %v2030_v32 = vrot.slane %v2029_v57, 2 }
 0x35a   : > { %3691 = vmatmul.mubr.bf16.vlgmr.msra.gmra.mrb[16].mxu1 %v2075_v15  ;;  %3855 = vmatmul.mubr.bf16.vlgmr.msra.gmra.mrb[56].mxu0 %v2075_v15  ;;  %v6250_v15 = vld [vmem:[#allocation5 + $0x5ac] ss:$16 sps:$4 sm:$0xff]  }
 0x35b   : > { %3700 = vmatpush1.bf16.msra.mxu1 %v6167_v4  ;;  %3731 = vmatprep.mubr.bf16.mxu1 %v2078_v12  ;;  %v6247_v4 = vld [vmem:[#allocation5 + $0x5a4] ss:$16 sps:$4 sm:$0xff]  }
 0x35c   : > { %3864 = vmatpush1.bf16.msra.mxu0 %v6170_v8  ;;  %3895 = vmatprep.mubr.bf16.mxu0 %v2078_v12  ;;  %v2069_v8 = vrot.slane %v2068_v61, 2  ;;  %v2031_v12 = vmax.f32 %v2029_v57, %v2030_v32  ;;  %v6305_v57 = vld [vmem:[#allocation5 + $0x6e0] ss:$16 sps:$4 sm:$0xff]   ;;  %v6319_v32 = vld [vmem:[#allocation5 + $0x724] ss:$16 sps:$4 sm:$0xff]  }
 0x35d   : > { %3701 = vmatprep.subr.bf16.mxu1 %v6175_v13  ;;  %3865 = vmatprep.subr.bf16.mxu0 %v6178_v14  ;;  %v6248_v13 = vld [vmem:[#allocation5 + $0x5a8] ss:$16 sps:$4 sm:$0xff]   ;;  %v6253_v14 = vld [vmem:[#allocation5 + $0x5c4] ss:$16 sps:$4 sm:$0xff]  }
 0x35e   : > { %v2070_v33 = vmax.f32 %v2068_v61, %v2069_v8  ;;  %v6311_v61 = vld [vmem:[#allocation5 + $0x700] ss:$16 sps:$4 sm:$0xff]   ;;  %v6325_v8 = vld [vmem:[#allocation5 + $0x744] ss:$16 sps:$4 sm:$0xff]  }
 0x35f   : > { %3702 = vmatpush1.bf16.msra.mxu1 %v6173_v17  ;;  %v6256_v17 = vld [vmem:[#allocation5 + $0x5cc] ss:$16 sps:$4 sm:$0xff]  }
 0x360   : > { %3866 = vmatpush1.bf16.msra.mxu0 %v6176_v19  ;;  %3703 = vmatprep.subr.bf16.mxu1 %v6181_v16  ;;  %v6251_v19 = vld [vmem:[#allocation5 + $0x5c0] ss:$16 sps:$4 sm:$0xff]   ;;  %v6254_v16 = vld [vmem:[#allocation5 + $0x5c8] ss:$16 sps:$4 sm:$0xff]  }
 0x361   : > { %3867 = vmatprep.subr.bf16.mxu0 %v6184_v1  ;;  %v6259_v1 = vld [vmem:[#allocation5 + $0x5e4] ss:$16 sps:$4 sm:$0xff]  }
 0x363   : > { %3704 = vmatpush1.bf16.msra.mxu1 %v6179_v18  ;;  %v2032_v18 = vrot.slane %v2031_v12, 1 }
 0x364   : > { %3868 = vmatpush1.bf16.msra.mxu0 %v6182_v20  ;;  %3705 = vmatprep.subr.bf16.mxu1 %v6187_v21  ;;  %v6262_v20 = vld [vmem:[#allocation5 + $0x5ec] ss:$16 sps:$4 sm:$0xff]   ;;  %v2071_v21 = vrot.slane %v2070_v33, 1 }
 0x365   : > { %3869 = vmatprep.subr.bf16.mxu0 %v6190_v43  ;;  %v6257_v43 = vld [vmem:[#allocation5 + $0x5e0] ss:$16 sps:$4 sm:$0xff]  }
 0x367   : > { %3706 = vmatpush1.bf16.msra.mxu1 %v6185_v51  ;;  %v6260_v51 = vld [vmem:[#allocation5 + $0x5e8] ss:$16 sps:$4 sm:$0xff]  }
 0x368   : > { %3870 = vmatpush1.bf16.msra.mxu0 %v6188_v47  ;;  %3707 = vmatprep.subr.bf16.mxu1 %v6193_v24  ;;  %v2033_v47 = vmax.f32 %v2031_v12, %v2032_v18  ;;  %v6265_v24 = vld [vmem:[#allocation5 + $0x604] ss:$16 sps:$4 sm:$0xff]   ;;  %v6323_v12 = vld [vmem:[#allocation5 + $0x740] ss:$16 sps:$4 sm:$0xff]  }
 0x369   : > { %3871 = vmatprep.subr.bf16.mxu0 %v6196_v10  ;;  %v6268_v10 = vld [vmem:[#allocation5 + $0x60c] ss:$16 sps:$4 sm:$0xff]   ;;  %v6337_v18 = vld [vmem:[#allocation5 + $0x784] ss:$16 sps:$4 sm:$0xff]  }
 0x36b   : > { %3708 = vmatpush1.bf16.msra.mxu1 %v6191_v63  ;;  %v2072_v63 = vmax.f32 %v2070_v33, %v2071_v21  ;;  %v6334_v33 = vld [vmem:[#allocation5 + $0x76c] ss:$16 sps:$4 sm:$0xff]   ;;  %v6335_v21 = vld [vmem:[#allocation5 + $0x780] ss:$16 sps:$4 sm:$0xff]  }
 0x36c   : > { %3872 = vmatpush1.bf16.msra.mxu0 %v6194_v0  ;;  %3709 = vmatprep.subr.bf16.mxu1 %v6199_v23  ;;  %v6263_v0 = vld [vmem:[#allocation5 + $0x600] ss:$16 sps:$4 sm:$0xff]   ;;  %v2077_v23 = vpack.c.bf16 %v2033_v47, %v2033_v47  ;;  %v6343_v47 = vld [vmem:[#allocation5 + $0x7a4] ss:$16 sps:$4 sm:$0xff]  }
 0x36d   : > { %3873 = vmatprep.subr.bf16.mxu0 %v6202_v26  ;;  %v6266_v26 = vld [vmem:[#allocation5 + $0x608] ss:$16 sps:$4 sm:$0xff]  }
 0x36f   : > { %3710 = vmatpush1.bf16.msra.mxu1 %v6197_v2  ;;  %v6271_v2 = vld [vmem:[#allocation5 + $0x624] ss:$16 sps:$4 sm:$0xff]  }
 0x370   : > { %3874 = vmatpush1.bf16.msra.mxu0 %v6200_v6  ;;  %3711 = vmatprep.subr.bf16.mxu1 %v6205_v28  ;;  %v2080_v6 = vpack.c.bf16 %v2072_v63, %v2072_v63  ;;  %v6274_v28 = vld [vmem:[#allocation5 + $0x62c] ss:$16 sps:$4 sm:$0xff]  }
 0x371   : > { %3875 = vmatprep.subr.bf16.mxu0 %v6208_v29  ;;  %v6269_v29 = vld [vmem:[#allocation5 + $0x620] ss:$16 sps:$4 sm:$0xff]  }
 0x373   : > { %3712 = vmatpush1.bf16.msra.mxu1 %v6203_v40  ;;  %v6272_v40 = vld [vmem:[#allocation5 + $0x628] ss:$16 sps:$4 sm:$0xff]  }
 0x374   : > { %3876 = vmatpush1.bf16.msra.mxu0 %v6206_v30  ;;  %3713 = vmatprep.subr.bf16.mxu1 %v6211_v31  ;;  %v6277_v30 = vld [vmem:[#allocation5 + $0x644] ss:$16 sps:$4 sm:$0xff]   ;;  %v6280_v31 = vld [vmem:[#allocation5 + $0x64c] ss:$16 sps:$4 sm:$0xff]  }
 0x375   : > { %3877 = vmatprep.subr.bf16.mxu0 %v6214_v37  ;;  %v6275_v37 = vld [vmem:[#allocation5 + $0x640] ss:$16 sps:$4 sm:$0xff]  }
 0x377   : > { %3714 = vmatpush1.bf16.msra.mxu1 %v6209_v5  ;;  %v6278_v5 = vld [vmem:[#allocation5 + $0x648] ss:$16 sps:$4 sm:$0xff]  }
 0x378   : > { %3878 = vmatpush1.bf16.msra.mxu0 %v6212_v38  ;;  %3715 = vmatprep.subr.bf16.mxu1 %v6217_v3  ;;  %v6283_v38 = vld [vmem:[#allocation5 + $0x664] ss:$16 sps:$4 sm:$0xff]   ;;  %v6286_v3 = vld [vmem:[#allocation5 + $0x66c] ss:$16 sps:$4 sm:$0xff]  }
 0x379   : > { %3879 = vmatprep.subr.bf16.mxu0 %v6220_v39  ;;  %v6281_v39 = vld [vmem:[#allocation5 + $0x660] ss:$16 sps:$4 sm:$0xff]  }
 0x37b   : > { %3716 = vmatpush1.bf16.msra.mxu1 %v6215_v27  ;;  %v6284_v27 = vld [vmem:[#allocation5 + $0x668] ss:$16 sps:$4 sm:$0xff]  }
 0x37c   : > { %3880 = vmatpush1.bf16.msra.mxu0 %v6218_v41  ;;  %3717 = vmatprep.subr.bf16.mxu1 %v6223_v9  ;;  %v6289_v41 = vld [vmem:[#allocation5 + $0x684] ss:$16 sps:$4 sm:$0xff]   ;;  %v6292_v9 = vld [vmem:[#allocation5 + $0x68c] ss:$16 sps:$4 sm:$0xff]  }
 0x37d   : > { %3881 = vmatprep.subr.bf16.mxu0 %v6226_v50  ;;  %v6287_v50 = vld [vmem:[#allocation5 + $0x680] ss:$16 sps:$4 sm:$0xff]  }
 0x37f   : > { %3718 = vmatpush1.bf16.msra.mxu1 %v6221_v11  ;;  %v6290_v11 = vld [vmem:[#allocation5 + $0x688] ss:$16 sps:$4 sm:$0xff]  }
 0x380   : > { %3882 = vmatpush1.bf16.msra.mxu0 %v6224_v25  ;;  %3719 = vmatprep.subr.bf16.mxu1 %v6229_v34  ;;  %v6295_v25 = vld [vmem:[#allocation5 + $0x6a4] ss:$16 sps:$4 sm:$0xff]   ;;  %v6298_v34 = vld [vmem:[#allocation5 + $0x6ac] ss:$16 sps:$4 sm:$0xff]  }
 0x381   : > { %3883 = vmatprep.subr.bf16.mxu0 %v6232_v35  ;;  %v6293_v35 = vld [vmem:[#allocation5 + $0x6a0] ss:$16 sps:$4 sm:$0xff]  }
 0x383   : > { %3720 = vmatpush1.bf16.msra.mxu1 %v6227_v49  ;;  %v6296_v49 = vld [vmem:[#allocation5 + $0x6a8] ss:$16 sps:$4 sm:$0xff]  }
 0x384   : > { %3884 = vmatpush1.bf16.msra.mxu0 %v6230_v52  ;;  %3721 = vmatprep.subr.bf16.mxu1 %v6235_v53  ;;  %v6304_v52 = vld [vmem:[#allocation5 + $0x6cc] ss:$16 sps:$4 sm:$0xff]   ;;  %v6299_v53 = vld [vmem:[#allocation5 + $0x6c0] ss:$16 sps:$4 sm:$0xff]  }
 0x385   : > { %3885 = vmatprep.subr.bf16.mxu0 %v6238_v54  ;;  %v6302_v54 = vld [vmem:[#allocation5 + $0x6c8] ss:$16 sps:$4 sm:$0xff]  }
 0x387   : > { %3722 = vmatpush1.bf16.msra.mxu1 %v6233_v56  ;;  %v6310_v56 = vld [vmem:[#allocation5 + $0x6ec] ss:$16 sps:$4 sm:$0xff]  }
 0x388   : > { %3886 = vmatpush1.bf16.msra.mxu0 %v6236_v58  ;;  %3723 = vmatprep.subr.bf16.mxu1 %v6241_v59  ;;  %v6308_v58 = vld [vmem:[#allocation5 + $0x6e8] ss:$16 sps:$4 sm:$0xff]   ;;  %v6313_v59 = vld [vmem:[#allocation5 + $0x704] ss:$16 sps:$4 sm:$0xff]  }
 0x389   : > { %3887 = vmatprep.subr.bf16.mxu0 %v6244_v60  ;;  %v6316_v60 = vld [vmem:[#allocation5 + $0x70c] ss:$16 sps:$4 sm:$0xff]  }
 0x38b   : > { %3724 = vmatpush1.bf16.msra.mxu1 %v6239_v62  ;;  %v6314_v62 = vld [vmem:[#allocation5 + $0x708] ss:$16 sps:$4 sm:$0xff]  }
 0x38c   : > { %3888 = vmatpush1.bf16.msra.mxu0 %v6242_v7  ;;  %3725 = vmatprep.subr.bf16.mxu1 %v6247_v4  ;;  %v6322_v7 = vld [vmem:[#allocation5 + $0x72c] ss:$16 sps:$4 sm:$0xff]   ;;  %v6317_v4 = vld [vmem:[#allocation5 + $0x720] ss:$16 sps:$4 sm:$0xff]  }
 0x38d   : > { %3889 = vmatprep.subr.bf16.mxu0 %v6250_v15  ;;  %v6320_v15 = vld [vmem:[#allocation5 + $0x728] ss:$16 sps:$4 sm:$0xff]  }
 0x38f   : > { %3726 = vmatpush1.bf16.msra.mxu1 %v6245_v22  ;;  %v6328_v22 = vld [vmem:[#allocation5 + $0x74c] ss:$16 sps:$4 sm:$0xff]  }
 0x390   : > { %3890 = vmatpush1.bf16.msra.mxu0 %v6248_v13  ;;  %3727 = vmatprep.subr.bf16.mxu1 %v6253_v14  ;;  %v2054_v13 = vrot.slane %v7298_v42, 4  ;;  %v6326_v14 = vld [vmem:[#allocation5 + $0x748] ss:$16 sps:$4 sm:$0xff]  }
 0x391   : > { %3891 = vmatprep.subr.bf16.mxu0 %v6256_v17  ;;  %v6331_v17 = vld [vmem:[#allocation5 + $0x764] ss:$16 sps:$4 sm:$0xff]  }
 0x393   : > { %3728 = vmatpush1.bf16.msra.mxu1 %v6251_v19  ;;  %v6329_v19 = vld [vmem:[#allocation5 + $0x760] ss:$16 sps:$4 sm:$0xff]  }
 0x394   : > { %3892 = vmatpush1.bf16.msra.mxu0 %v6254_v16  ;;  %3729 = vmatprep.subr.bf16.mxu1 %v6259_v1  ;;  %v2055_v16 = vmax.f32 %v7298_v42, %v2054_v13  ;;  %v6332_v1 = vld [vmem:[#allocation5 + $0x768] ss:$16 sps:$4 sm:$0xff]   ;;  %v6409_v13 = vld [vmem:[#allocation7 + $0x104] ss:$8 sps:$4 sm:$0xff]  }
 0x395   : > { %3893 = vmatprep.subr.bf16.mxu0 %v6262_v20  ;;  %v6340_v20 = vld [vmem:[#allocation5 + $0x78c] ss:$16 sps:$4 sm:$0xff]   ;;  %v6344_v42 = vld [vmem:[#allocation5 + $0x7a8] ss:$16 sps:$4 sm:$0xff]  }
 0x397   : > { %3730 = vmatpush1.bf16.msra.mxu1 %v6257_v43  ;;  %v2056_v43 = vrot.slane %v2055_v16, 2 }
 0x398   : > { %3894 = vmatpush1.bf16.msra.mxu0 %v6260_v51  ;;  %3740 = vmatprep.subr.bf16.mxu1 %v6265_v24  ;;  %v6338_v51 = vld [vmem:[#allocation5 + $0x788] ss:$16 sps:$4 sm:$0xff]   ;;  %v6346_v24 = vld [vmem:[#allocation5 + $0x7ac] ss:$16 sps:$4 sm:$0xff]  }
 0x399   : > { %3904 = vmatprep.subr.bf16.mxu0 %v6268_v10  ;;  %v6341_v10 = vld [vmem:[#allocation5 + $0x7a0] ss:$16 sps:$4 sm:$0xff]   ;;  %v2057_v63 = vmax.f32 %v2055_v16, %v2056_v43 }
 0x39a   : > { %3732 = vmatmul.mubr.bf16.vlgmr.msra.gmra.mrb[16].mxu1 %v2077_v23  ;;  %v6459_v16 = vld [vmem:[%s7789_s16 + $0x50] sm:$0xff]   ;;  %v6464_v43 = vld [vmem:[%s7789_s16 + $0x20] sm:$0xff]  }
 0x39b   : > { %3896 = vmatmul.mubr.bf16.vlgmr.msra.gmra.mrb[56].mxu0 %v2077_v23  ;;  %3741 = vmatpush1.bf16.msra.mxu1 %v6263_v0  ;;  %v6349_v0 = vld [vmem:[#allocation5 + $0x7c4] ss:$16 sps:$4 sm:$0xff]   ;;  %v6352_v23 = vld [vmem:[#allocation5 + $0x7cc] ss:$16 sps:$4 sm:$0xff]  }
 0x39c   : > { %3772 = vmatprep.mubr.bf16.mxu1 %v2080_v6  ;;  %3905 = vmatpush1.bf16.msra.mxu0 %v6266_v26  ;;  %v6347_v26 = vld [vmem:[#allocation5 + $0x7c0] ss:$16 sps:$4 sm:$0xff]  }
 0x39d   : > { %3936 = vmatprep.mubr.bf16.mxu0 %v2080_v6  ;;  %3742 = vmatprep.subr.bf16.mxu1 %v6271_v2  ;;  %v6350_v2 = vld [vmem:[#allocation5 + $0x7c8] ss:$16 sps:$4 sm:$0xff]   ;;  %v6355_v6 = vld [vmem:[#allocation5 + $0x7e4] ss:$16 sps:$4 sm:$0xff]  }
 0x39e   : > { %3906 = vmatprep.subr.bf16.mxu0 %v6274_v28  ;;  %v2058_v28 = vrot.slane %v2057_v63, 1 }
 0x39f   : > { %3743 = vmatpush1.bf16.msra.mxu1 %v6269_v29  ;;  %v6358_v29 = vld [vmem:[#allocation5 + $0x7ec] ss:$16 sps:$4 sm:$0xff]  }
 0x3a0   : > { %3907 = vmatpush1.bf16.msra.mxu0 %v6272_v40  ;;  %3744 = vmatprep.subr.bf16.mxu1 %v6277_v30  ;;  %v6353_v40 = vld [vmem:[#allocation5 + $0x7e0] ss:$16 sps:$4 sm:$0xff]   ;;  %v6356_v30 = vld [vmem:[#allocation5 + $0x7e8] ss:$16 sps:$4 sm:$0xff]  }
 0x3a1   : > { %3908 = vmatprep.subr.bf16.mxu0 %v6280_v31  ;;  %v2059_v31 = vmax.f32 %v2057_v63, %v2058_v28 }
 0x3a3   : > { %3745 = vmatpush1.bf16.msra.mxu1 %v6275_v37  ;;  %v6361_v37 = vld [vmem:[#allocation7 + $0x4] ss:$8 sps:$4 sm:$0xff]  }
 0x3a4   : > { %3909 = vmatpush1.bf16.msra.mxu0 %v6278_v5  ;;  %3746 = vmatprep.subr.bf16.mxu1 %v6283_v38  ;;  %v6359_v5 = vld [vmem:[#allocation7] ss:$8 sps:$4 sm:$0xff]   ;;  %v2079_v38 = vpack.c.bf16 %v2059_v31, %v2059_v31 }
 0x3a5   : > { %3910 = vmatprep.subr.bf16.mxu0 %v6286_v3  ;;  %v6364_v3 = vld [vmem:[#allocation7 + $0x14] ss:$8 sps:$4 sm:$0xff]  }
 0x3a7   : > { %3747 = vmatpush1.bf16.msra.mxu1 %v6281_v39  ;;  %v6362_v39 = vld [vmem:[#allocation7 + $0x10] ss:$8 sps:$4 sm:$0xff]  }
 0x3a8   : > { %3911 = vmatpush1.bf16.msra.mxu0 %v6284_v27  ;;  %3748 = vmatprep.subr.bf16.mxu1 %v6289_v41  ;;  %v6367_v27 = vld [vmem:[#allocation7 + $0x24] ss:$8 sps:$4 sm:$0xff]   ;;  %v6365_v41 = vld [vmem:[#allocation7 + $0x20] ss:$8 sps:$4 sm:$0xff]  }
 0x3a9   : > { %3912 = vmatprep.subr.bf16.mxu0 %v6292_v9  ;;  %v6370_v9 = vld [vmem:[#allocation7 + $0x34] ss:$8 sps:$4 sm:$0xff]  }
 0x3ab   : > { %3749 = vmatpush1.bf16.msra.mxu1 %v6287_v50  ;;  %v6368_v50 = vld [vmem:[#allocation7 + $0x30] ss:$8 sps:$4 sm:$0xff]  }
 0x3ac   : > { %3913 = vmatpush1.bf16.msra.mxu0 %v6290_v11  ;;  %3750 = vmatprep.subr.bf16.mxu1 %v6295_v25  ;;  %v6373_v11 = vld [vmem:[#allocation7 + $0x44] ss:$8 sps:$4 sm:$0xff]   ;;  %v6371_v25 = vld [vmem:[#allocation7 + $0x40] ss:$8 sps:$4 sm:$0xff]  }
 0x3ad   : > { %3914 = vmatprep.subr.bf16.mxu0 %v6298_v34  ;;  %v6376_v34 = vld [vmem:[#allocation7 + $0x54] ss:$8 sps:$4 sm:$0xff]  }
 0x3af   : > { %3751 = vmatpush1.bf16.msra.mxu1 %v6293_v35  ;;  %v6374_v35 = vld [vmem:[#allocation7 + $0x50] ss:$8 sps:$4 sm:$0xff]  }
 0x3b0   : > { %3915 = vmatpush1.bf16.msra.mxu0 %v6296_v49  ;;  %3752 = vmatprep.subr.bf16.mxu1 %v6301_v48  ;;  %v6379_v49 = vld [vmem:[#allocation7 + $0x64] ss:$8 sps:$4 sm:$0xff]   ;;  %v6377_v48 = vld [vmem:[#allocation7 + $0x60] ss:$8 sps:$4 sm:$0xff]  }
 0x3b1   : > { %3916 = vmatprep.subr.bf16.mxu0 %v6304_v52  ;;  %v6382_v52 = vld [vmem:[#allocation7 + $0x74] ss:$8 sps:$4 sm:$0xff]  }
 0x3b3   : > { %3753 = vmatpush1.bf16.msra.mxu1 %v6299_v53  ;;  %v6380_v53 = vld [vmem:[#allocation7 + $0x70] ss:$8 sps:$4 sm:$0xff]  }
 0x3b4   : > { %3917 = vmatpush1.bf16.msra.mxu0 %v6302_v54  ;;  %3754 = vmatprep.subr.bf16.mxu1 %v6307_v55  ;;  %v6385_v54 = vld [vmem:[#allocation7 + $0x84] ss:$8 sps:$4 sm:$0xff]   ;;  %v6383_v55 = vld [vmem:[#allocation7 + $0x80] ss:$8 sps:$4 sm:$0xff]  }
 0x3b5   : > { %3918 = vmatprep.subr.bf16.mxu0 %v6310_v56  ;;  %v6388_v56 = vld [vmem:[#allocation7 + $0x94] ss:$8 sps:$4 sm:$0xff]  }
 0x3b7   : > { %3755 = vmatpush1.bf16.msra.mxu1 %v6305_v57  ;;  %v6386_v57 = vld [vmem:[#allocation7 + $0x90] ss:$8 sps:$4 sm:$0xff]  }
 0x3b8   : > { %3919 = vmatpush1.bf16.msra.mxu0 %v6308_v58  ;;  %3756 = vmatprep.subr.bf16.mxu1 %v6313_v59  ;;  %v6391_v58 = vld [vmem:[#allocation7 + $0xa4] ss:$8 sps:$4 sm:$0xff]   ;;  %v6389_v59 = vld [vmem:[#allocation7 + $0xa0] ss:$8 sps:$4 sm:$0xff]  }
 0x3b9   : > { %3920 = vmatprep.subr.bf16.mxu0 %v6316_v60  ;;  %v6394_v60 = vld [vmem:[#allocation7 + $0xb4] ss:$8 sps:$4 sm:$0xff]  }
 0x3bb   : > { %3757 = vmatpush1.bf16.msra.mxu1 %v6311_v61  ;;  %v6392_v61 = vld [vmem:[#allocation7 + $0xb0] ss:$8 sps:$4 sm:$0xff]  }
 0x3bc   : > { %3921 = vmatpush1.bf16.msra.mxu0 %v6314_v62  ;;  %3758 = vmatprep.subr.bf16.mxu1 %v6319_v32  ;;  %v6397_v62 = vld [vmem:[#allocation7 + $0xc4] ss:$8 sps:$4 sm:$0xff]   ;;  %v6395_v32 = vld [vmem:[#allocation7 + $0xc0] ss:$8 sps:$4 sm:$0xff]  }
 0x3bd   : > { %3922 = vmatprep.subr.bf16.mxu0 %v6322_v7  ;;  %v6400_v7 = vld [vmem:[#allocation7 + $0xd4] ss:$8 sps:$4 sm:$0xff]  }
 0x3bf   : > { %3759 = vmatpush1.bf16.msra.mxu1 %v6317_v4  ;;  %v6398_v4 = vld [vmem:[#allocation7 + $0xd0] ss:$8 sps:$4 sm:$0xff]  }
 0x3c0   : > { %3923 = vmatpush1.bf16.msra.mxu0 %v6320_v15  ;;  %3760 = vmatprep.subr.bf16.mxu1 %v6325_v8  ;;  %v6403_v15 = vld [vmem:[#allocation7 + $0xe4] ss:$8 sps:$4 sm:$0xff]   ;;  %v6401_v8 = vld [vmem:[#allocation7 + $0xe0] ss:$8 sps:$4 sm:$0xff]  }
 0x3c1   : > { %3924 = vmatprep.subr.bf16.mxu0 %v6328_v22  ;;  %v6406_v22 = vld [vmem:[#allocation7 + $0xf4] ss:$8 sps:$4 sm:$0xff]  }
 0x3c3   : > { %3761 = vmatpush1.bf16.msra.mxu1 %v6323_v12  ;;  %v6404_v12 = vld [vmem:[#allocation7 + $0xf0] ss:$8 sps:$4 sm:$0xff]  }
 0x3c4   : > { %3925 = vmatpush1.bf16.msra.mxu0 %v6326_v14  ;;  %3762 = vmatprep.subr.bf16.mxu1 %v6331_v17  ;;  %v6455_v14 = vld [vmem:[%s7789_s16 + $0x40] sm:$0xff]  }
 0x3c5   : > { %3926 = vmatprep.subr.bf16.mxu0 %v6334_v33  ;;  %v6456_v17 = vld [vmem:[%s7789_s16] sm:$0xff]   ;;  %v6457_v33 = vld [vmem:[%s7789_s16 + $0x48] sm:$0xff]  }
 0x3c7   : > { %3763 = vmatpush1.bf16.msra.mxu1 %v6329_v19  ;;  %v6458_v19 = vld [vmem:[%s7789_s16 + $0x8] sm:$0xff]  }
 0x3c8   : > { %3927 = vmatpush1.bf16.msra.mxu0 %v6332_v1  ;;  %3764 = vmatprep.subr.bf16.mxu1 %v6337_v18  ;;  %v6460_v1 = vld [vmem:[%s7789_s16 + $0x10] sm:$0xff]   ;;  %v6461_v18 = vld [vmem:[%s7789_s16 + $0x58] sm:$0xff]  }
 0x3c9   : > { %3928 = vmatprep.subr.bf16.mxu0 %v6340_v20  ;;  %v6462_v20 = vld [vmem:[%s7789_s16 + $0x18] sm:$0xff]  }
 0x3cb   : > { %3765 = vmatpush1.bf16.msra.mxu1 %v6335_v21  ;;  %v6463_v21 = vld [vmem:[%s7789_s16 + $0x60] sm:$0xff]  }
 0x3cc   : > { %3929 = vmatpush1.bf16.msra.mxu0 %v6338_v51  ;;  %3766 = vmatprep.subr.bf16.mxu1 %v6343_v47  ;;  %v6465_v51 = vld [vmem:[%s7789_s16 + $0x68] sm:$0xff]   ;;  %v3945_v47 = vld [vmem:[%s7784_s11] sm:$0xf] }
 0x3cd   : > { %3930 = vmatprep.subr.bf16.mxu0 %v6346_v24  ;;  %v3971_v24 = vld [vmem:[%s7785_s12] sm:$0xf]  ;;  %v3958_v63 = vrot.slane %v3945_v47, %v6945_v44 }
 0x3cf   : > { %3767 = vmatpush1.bf16.msra.mxu1 %v6341_v10  ;;  %v3950_v10 = vrot.slane %v3945_v47, %v6951_v46 }
 0x3d0   : > { %3931 = vmatpush1.bf16.msra.mxu0 %v6344_v42  ;;  %3768 = vmatprep.subr.bf16.mxu1 %v6349_v0  ;;  %v3954_v42 = vrot.slane %v3945_v47, %v6948_v45  ;;  %v3976_v0 = vrot.slane %v3971_v24, %v6951_v46 }
 0x3d1   : > { %3932 = vmatprep.subr.bf16.mxu0 %v6352_v23  ;;  %v3962_v23 = vrot.slane %v3945_v47, %v7160_v36  ;;  %v6452_v47 = vld [vmem:[#allocation7 + $0x1f0] ss:$8 sps:$4 sm:$0xff]  }
 0x3d3   : > { %3769 = vmatpush1.bf16.msra.mxu1 %v6347_v26 }
 0x3d4   : > { %3933 = vmatpush1.bf16.msra.mxu0 %v6350_v2  ;;  %3770 = vmatprep.subr.bf16.mxu1 %v6355_v6  ;;  %v3984_v2 = vrot.slane %v3971_v24, %v6945_v44  ;;  %v3980_v6 = vrot.slane %v3971_v24, %v6948_v45 }
 0x3d5   : > { %3934 = vmatprep.subr.bf16.mxu0 %v6358_v29 }
 0x3d7   : > { %3771 = vmatpush1.bf16.msra.mxu1 %v6353_v40 }
 0x3d8   : > { %3935 = vmatpush1.bf16.msra.mxu0 %v6356_v30  ;;  %4389 = vmatprep.subr.bf16.mxu1 %v6361_v37  ;;  %v3988_v30 = vrot.slane %v3971_v24, %v7160_v36  ;;  %v6412_v36 = vld [vmem:[#allocation7 + $0x114] ss:$8 sps:$4 sm:$0xff]  }
 0x3d9   : > { %5804 = vmatprep.subr.bf16.mxu0 %v6455_v14  ;;  %v6439_v14 = vld [vmem:[#allocation7 + $0x1a4] ss:$8 sps:$4 sm:$0xff]  }
 0x3da   : > { %3773 = vmatmul.mubr.bf16.vlgmr.msra.gmra.mrb[16].mxu1 %v2079_v38 }
 0x3db   : > { %3937 = vmatmul.mubr.bf16.vlgmr.msra.gmra.mrb[56].mxu0 %v2079_v38  ;;  %4390 = vmatpush1.bf16.msra.mxu1 %v6359_v5 }
 0x3dc   : > { %4391 = vmatprep.subr.bf16.mxu1 %v6364_v3  ;;  %5805 = vmatpush3.bf16.msra.mxu0 %v6456_v17  ;;  %v6437_v17 = vld [vmem:[#allocation7 + $0x1a0] ss:$8 sps:$4 sm:$0xff]  }
 0x3dd   : > { %5806 = vmatprep.subr.bf16.mxu0 %v6457_v33  ;;  %v6442_v33 = vld [vmem:[#allocation7 + $0x1b4] ss:$8 sps:$4 sm:$0xff]  }
 0x3df   : > { %4392 = vmatpush1.bf16.msra.mxu1 %v6362_v39 }
 0x3e0   : > { %4393 = vmatprep.subr.bf16.mxu1 %v6367_v27  ;;  %5807 = vmatpush3.bf16.msra.mxu0 %v6458_v19  ;;  %v6440_v19 = vld [vmem:[#allocation7 + $0x1b0] ss:$8 sps:$4 sm:$0xff]  }
 0x3e1   : > { %5808 = vmatprep.subr.bf16.mxu0 %v6459_v16  ;;  %v6445_v16 = vld [vmem:[#allocation7 + $0x1c4] ss:$8 sps:$4 sm:$0xff]  }
 0x3e3   : > { %4394 = vmatpush1.bf16.msra.mxu1 %v6365_v41 }
 0x3e4   : > { %4395 = vmatprep.subr.bf16.mxu1 %v6370_v9  ;;  %5809 = vmatpush3.bf16.msra.mxu0 %v6460_v1  ;;  %v6443_v1 = vld [vmem:[#allocation7 + $0x1c0] ss:$8 sps:$4 sm:$0xff]  }
 0x3e5   : > { %5810 = vmatprep.subr.bf16.mxu0 %v6461_v18  ;;  %v6448_v18 = vld [vmem:[#allocation7 + $0x1d4] ss:$8 sps:$4 sm:$0xff]  }
 0x3e7   : > { %4396 = vmatpush1.bf16.msra.mxu1 %v6368_v50 }
 0x3e8   : > { %4397 = vmatprep.subr.bf16.mxu1 %v6373_v11  ;;  %5811 = vmatpush3.bf16.msra.mxu0 %v6462_v20  ;;  %v6446_v20 = vld [vmem:[#allocation7 + $0x1d0] ss:$8 sps:$4 sm:$0xff]  }
 0x3e9   : > { %5812 = vmatprep.subr.bf16.mxu0 %v6463_v21  ;;  %v6451_v21 = vld [vmem:[#allocation7 + $0x1e4] ss:$8 sps:$4 sm:$0xff]  }
 0x3eb   : > { %4398 = vmatpush1.bf16.msra.mxu1 %v6371_v25 }
 0x3ec   : > { %4399 = vmatprep.subr.bf16.mxu1 %v6376_v34  ;;  %5813 = vmatpush3.bf16.msra.mxu0 %v6464_v43  ;;  %v6449_v43 = vld [vmem:[#allocation7 + $0x1e0] ss:$8 sps:$4 sm:$0xff]  }
 0x3ed   : > { %5814 = vmatprep.subr.bf16.mxu0 %v6465_v51  ;;  %v6454_v51 = vld [vmem:[#allocation7 + $0x1f4] ss:$8 sps:$4 sm:$0xff]  }
 0x3ef   : > { %4400 = vmatpush1.bf16.msra.mxu1 %v6374_v35 }
 0x3f0   : > { %4401 = vmatprep.subr.bf16.mxu1 %v6379_v49 }
 0x3f3   : > { %4402 = vmatpush1.bf16.msra.mxu1 %v6377_v48  ;;  %v6407_v48 = vld [vmem:[#allocation7 + $0x100] ss:$8 sps:$4 sm:$0xff]  }
 0x3f4   : > { %4403 = vmatprep.subr.bf16.mxu1 %v6382_v52 }
 0x3f7   : > { %4404 = vmatpush1.bf16.msra.mxu1 %v6380_v53 }
 0x3f8   : > { %4405 = vmatprep.subr.bf16.mxu1 %v6385_v54  ;;  %v6410_v54 = vld [vmem:[#allocation7 + $0x110] ss:$8 sps:$4 sm:$0xff]  }
 0x3fb   : > { %4406 = vmatpush1.bf16.msra.mxu1 %v6383_v55  ;;  %v6415_v55 = vld [vmem:[#allocation7 + $0x124] ss:$8 sps:$4 sm:$0xff]  }
 0x3fc   : > { %4407 = vmatprep.subr.bf16.mxu1 %v6388_v56  ;;  %v6413_v56 = vld [vmem:[#allocation7 + $0x120] ss:$8 sps:$4 sm:$0xff]  }
 0x3ff   : > { %4408 = vmatpush1.bf16.msra.mxu1 %v6386_v57  ;;  %v6418_v57 = vld [vmem:[#allocation7 + $0x134] ss:$8 sps:$4 sm:$0xff]  }
 0x400   : > { %4409 = vmatprep.subr.bf16.mxu1 %v6391_v58  ;;  %v6416_v58 = vld [vmem:[#allocation7 + $0x130] ss:$8 sps:$4 sm:$0xff]  }
 0x403   : > { %4410 = vmatpush1.bf16.msra.mxu1 %v6389_v59  ;;  %v6421_v59 = vld [vmem:[#allocation7 + $0x144] ss:$8 sps:$4 sm:$0xff]  }
 0x404   : > { %4411 = vmatprep.subr.bf16.mxu1 %v6394_v60  ;;  %v6419_v60 = vld [vmem:[#allocation7 + $0x140] ss:$8 sps:$4 sm:$0xff]  }
 0x407   : > { %4412 = vmatpush1.bf16.msra.mxu1 %v6392_v61  ;;  %v6424_v61 = vld [vmem:[#allocation7 + $0x154] ss:$8 sps:$4 sm:$0xff]  }
 0x408   : > { %4413 = vmatprep.subr.bf16.mxu1 %v6397_v62  ;;  %v6422_v62 = vld [vmem:[#allocation7 + $0x150] ss:$8 sps:$4 sm:$0xff]  }
 0x40b   : > { %4414 = vmatpush1.bf16.msra.mxu1 %v6395_v32  ;;  %v6427_v32 = vld [vmem:[#allocation7 + $0x164] ss:$8 sps:$4 sm:$0xff]  }
 0x40c   : > { %4415 = vmatprep.subr.bf16.mxu1 %v6400_v7  ;;  %v6425_v7 = vld [vmem:[#allocation7 + $0x160] ss:$8 sps:$4 sm:$0xff]  }
 0x40f   : > { %4416 = vmatpush1.bf16.msra.mxu1 %v6398_v4  ;;  %v6430_v4 = vld [vmem:[#allocation7 + $0x174] ss:$8 sps:$4 sm:$0xff]  }
 0x410   : > { %4417 = vmatprep.subr.bf16.mxu1 %v6403_v15  ;;  %v6428_v15 = vld [vmem:[#allocation7 + $0x170] ss:$8 sps:$4 sm:$0xff]  }
 0x413   : > { %4418 = vmatpush1.bf16.msra.mxu1 %v6401_v8  ;;  %v6433_v8 = vld [vmem:[#allocation7 + $0x184] ss:$8 sps:$4 sm:$0xff]  }
 0x414   : > { %4419 = vmatprep.subr.bf16.mxu1 %v6406_v22  ;;  %v6431_v22 = vld [vmem:[#allocation7 + $0x180] ss:$8 sps:$4 sm:$0xff]  }
 0x417   : > { %4420 = vmatpush1.bf16.msra.mxu1 %v6404_v12  ;;  %v6436_v12 = vld [vmem:[#allocation7 + $0x194] ss:$8 sps:$4 sm:$0xff]  }
 0x418   : > { %4430 = vmatprep.subr.bf16.mxu1 %v6409_v13  ;;  %v6434_v13 = vld [vmem:[#allocation7 + $0x190] ss:$8 sps:$4 sm:$0xff]  }
 0x4ad   : > { %v3774_v26 = vpop.f32.mrb[16].mxu1 }
 0x4ae   : > { %v3967_v28 = vmul.f32 %v3950_v10, %v3774_v26  ;;  %v3938_v29 = vpop.f32.mrb[56].mxu0  ;;  %v3776_v40 = vpop.f32.mrb[17].mxu1  ;;  %v6470_v26 = vld [vmem:[%s7789_s16 + $0x38] sm:$0xff]  }
 0x4af   : > { %v3969_v31 = vmul.f32 %v3958_v63, %v3938_v29  ;;  %v3968_v37 = vmul.f32 %v3954_v42, %v3776_v40  ;;  %v3940_v5 = vpop.f32.mrb[57].mxu0  ;;  %v3778_v38 = vpop.f32.mrb[18].mxu1  ;;  %v6466_v63 = vld [vmem:[%s7789_s16 + $0x28] sm:$0xff]   ;;  %v6467_v42 = vld [vmem:[%s7789_s16 + $0x70] sm:$0xff]  }
 0x4b0   : > { %v3993_v3 = vadd.f32 %v3976_v0, %v3967_v28  ;;  %v3970_v39 = vmul.f32 %v3962_v23, %v3940_v5  ;;  %v3942_v27 = vpop.f32.mrb[58].mxu0  ;;  %v3779_v41 = vpop.f32.mrb[19].mxu1  ;;  %5815 = vmatpush3.bf16.msra.mxu0 %v6466_v63  ;;  %v6468_v0 = vld [vmem:[%s7789_s16 + $0x30] sm:$0xff]   ;;  %v6469_v23 = vld [vmem:[%s7789_s16 + $0x78] sm:$0xff]  }
 0x4b1   : > { %v7355_v9 = vadd.f32 %v3984_v2, %v3969_v31  ;;  %v3994_v50 = vadd.f32 %v3980_v6, %v3968_v37  ;;  %v3943_v11 = vpop.f32.mrb[59].mxu0  ;;  %5816 = vmatprep.subr.bf16.mxu0 %v6467_v42  ;;  %v4471_v2 = vld [vmem:[%s7787_s14] sm:$0x3] }
 0x4b2   : > { %v3997_v44 = vmax.f32 %v3993_v3, 0.0  ;;  %v3996_v25 = vadd.f32 %v3988_v30, %v3970_v39  ;;  %v4485_v6 = vld [vmem:[%s7788_s15] sm:$0x3]  ;;  %v4476_v28 = vrot.slane %v4471_v2, %v6951_v46  ;;  %v4480_v29 = vrot.slane %v4471_v2, %v6948_v45 }
 0x4b3   : > { %v3998_v34 = vmax.f32 %v3994_v50, 0.0  ;;  %v3999_v24 = vmax.f32 %v7355_v9, 0.0  ;;  %v4490_v40 = vrot.slane %v4485_v6, %v6951_v46  ;;  %v4494_v31 = vrot.slane %v4485_v6, %v6948_v45 }
 0x4b4   : > { %v4000_v35 = vmax.f32 %v3996_v25, 0.0  ;;  %v4001_v52 = vpack.c.bf16 %v3997_v44, %v3997_v44  ;;  %5817 = vmatpush3.bf16.msra.mxu0 %v6468_v0  ;;  %v7434_v0 = vld [vmem:[%s6908_s25 + $0x20] sm:$0xff] }
 0x4b5   : > { %v4002_v49 = vpack.c.bf16 %v3998_v34, %v3998_v34  ;;  %v4003_v10 = vpack.c.bf16 %v3999_v24, %v3999_v24  ;;  %5818 = vmatprep.subr.bf16.mxu0 %v6469_v23  ;;  %v4535_v34 = vld [vmem:[%s7790_s17] sm:$0x1]  ;;  %v7426_v24 = vld [vmem:[%s6908_s25 + $0x28] sm:$0xff] }
 0x4b6   : > { %v4004_v53 = vpack.c.bf16 %v4000_v35, %v4000_v35 }
 0x4b7   : > { %4421 = vmatprep.mubr.bf16.mxu1 %v4002_v49 }
 0x4b8   : > { %4422 = vmatmul.mubr.bf16.vlgmr.msra.gmra.mrb[20].mxu1 %v4001_v52  ;;  %5819 = vmatpush3.bf16.msra.mxu0 %v6470_v26  ;;  %v7438_v26 = vld [vmem:[%s6908_s25 + $0x38] sm:$0xff] }
 0x4b9   : > { %4431 = vmatpush1.bf16.msra.mxu1 %v6407_v48  ;;  %4462 = vmatprep.mubr.bf16.mxu1 %v4004_v53 }
 0x4ba   : > { %4432 = vmatprep.subr.bf16.mxu1 %v6412_v36 }
 0x4bd   : > { %4433 = vmatpush1.bf16.msra.mxu1 %v6410_v54 }
 0x4be   : > { %4434 = vmatprep.subr.bf16.mxu1 %v6415_v55 }
 0x4c1   : > { %4435 = vmatpush1.bf16.msra.mxu1 %v6413_v56 }
 0x4c2   : > { %4436 = vmatprep.subr.bf16.mxu1 %v6418_v57 }
 0x4c5   : > { %4437 = vmatpush1.bf16.msra.mxu1 %v6416_v58 }
 0x4c6   : > { %4438 = vmatprep.subr.bf16.mxu1 %v6421_v59 }
 0x4c9   : > { %4439 = vmatpush1.bf16.msra.mxu1 %v6419_v60 }
 0x4ca   : > { %4440 = vmatprep.subr.bf16.mxu1 %v6424_v61 }
 0x4cd   : > { %4441 = vmatpush1.bf16.msra.mxu1 %v6422_v62 }
 0x4ce   : > { %4442 = vmatprep.subr.bf16.mxu1 %v6427_v32 }
 0x4d1   : > { %4443 = vmatpush1.bf16.msra.mxu1 %v6425_v7 }
 0x4d2   : > { %4444 = vmatprep.subr.bf16.mxu1 %v6430_v4 }
 0x4d5   : > { %4445 = vmatpush1.bf16.msra.mxu1 %v6428_v15 }
 0x4d6   : > { %4446 = vmatprep.subr.bf16.mxu1 %v6433_v8 }
 0x4d9   : > { %4447 = vmatpush1.bf16.msra.mxu1 %v6431_v22 }
 0x4da   : > { %4448 = vmatprep.subr.bf16.mxu1 %v6436_v12 }
 0x4dd   : > { %4449 = vmatpush1.bf16.msra.mxu1 %v6434_v13 }
 0x4de   : > { %4450 = vmatprep.subr.bf16.mxu1 %v6439_v14 }
 0x4e1   : > { %4451 = vmatpush1.bf16.msra.mxu1 %v6437_v17 }
 0x4e2   : > { %4452 = vmatprep.subr.bf16.mxu1 %v6442_v33 }
 0x4e5   : > { %4453 = vmatpush1.bf16.msra.mxu1 %v6440_v19  ;;  %v7407_v19 = vld [vmem:[%s6908_s25 + $0x8] sm:$0xff] }
 0x4e6   : > { %4454 = vmatprep.subr.bf16.mxu1 %v6445_v16 }
 0x4e9   : > { %4455 = vmatpush1.bf16.msra.mxu1 %v6443_v1  ;;  %v7412_v1 = vld [vmem:[%s6908_s25] sm:$0xff] }
 0x4ea   : > { %4456 = vmatprep.subr.bf16.mxu1 %v6448_v18 }
 0x4ed   : > { %4457 = vmatpush1.bf16.msra.mxu1 %v6446_v20  ;;  %v7416_v20 = vld [vmem:[%s6908_s25 + $0x18] sm:$0xff] }
 0x4ee   : > { %4458 = vmatprep.subr.bf16.mxu1 %v6451_v21 }
 0x4f1   : > { %4459 = vmatpush1.bf16.msra.mxu1 %v6449_v43 }
 0x4f2   : > { %4460 = vmatprep.subr.bf16.mxu1 %v6454_v51  ;;  %v7422_v51 = vld [vmem:[%s6908_s25 + $0x10] sm:$0xff] }
 0x4f5   : > { %4461 = vmatpush1.bf16.msra.mxu1 %v6452_v47 }
 0x4f8   : > { %4463 = vmatmul.mubr.bf16.vlgmr.msra.gmra.mrb[20].mxu1 %v4003_v10 }
 0x5cb   : > { %v4464_v30 = vpop.f32.mrb[20].mxu1 }
 0x5cc   : > { %v4483_v37 = vmul.f32 %v4476_v28, %v4464_v30  ;;  %v4466_v5 = vpop.f32.mrb[21].mxu1 }
 0x5cd   : > { %v4484_v38 = vmul.f32 %v4480_v29, %v4466_v5  ;;  %v4468_v3 = vpop.f32.mrb[22].mxu1 }
 0x5ce   : > { %v4497_v39 = vadd.f32 %v4490_v40, %v4483_v37  ;;  %v4469_v27 = vpop.f32.mrb[23].mxu1  ;;  %v7449_v37 = vld [vmem:[%s6908_s25 + $0x30] sm:$0xff]  ;;  %s7837_s25 = sld [smem:[#allocation13_spill]] }
 0x5cf   : > { %v4498_v41 = vadd.f32 %v4494_v31, %v4484_v38 }
 0x5d0   : > { %v4499_v9 = vmax.f32 %v4497_v39, 0.0 }
 0x5d1   : > { %v4500_v50 = vmax.f32 %v4498_v41, 0.0 }
 0x5d2   : > { %v4501_v44 = vpack.c.bf16 %v4499_v9, %v4499_v9 }
 0x5d3   : > { %v4502_v11 = vpack.c.bf16 %v4500_v50, %v4500_v50 }
 0x5d4   : > { %s638_s29 = sand.u32 1, %s7837_s25  }
 0x5d5   : > { %4664 = vmatprep.mubr.bf16.mxu0 %v4502_v11  ;;  %s7550_s24 = scalar_lea.vmem [#allocation8], %s638_s29 }
 0x5d6   : > { %4665 = vmatmul.mubr.bf16.vlgmr.msra.gmra.mrb[60].mxu0 %v4501_v44 }
 0x6a9   : > { %v5820_v25 = vpop.f32.mrb[60].mxu0 }
 0x6aa   : > { %v5821_v35 = vpop.f32.mrb[61].mxu0 }
 0x6ab   : > { %v5822_v45 = vadd.f32 %v5821_v35, %v5820_v25  ;;  %v5823_v49 = vpop.f32.mrb[62].mxu0 }
 0x6ac   : > { %v5824_v48 = vpop.f32.mrb[63].mxu0 }
 0x6ad   : > { %v4667_v52 = vadd.f32 %v5822_v45, %v4535_v34 }
 0x6af   : > { %4687 = vrot.lane.b32.xlu1 %v4667_v52, %s6649_s28  ;;  %v4672_v36 = vmul.f32 %v4667_v52, %v4667_v52 }
 0x6b1   : > { %v4674_v53 = vsel %vm4673_vm1, %v4672_v36, 0.0 }
 0x6b2   : > { %4675 = vadd.xlane.f32.xlu0 %v4674_v53 }
 0x6b3   : > { %4691 = vrot.lane.b32.xlu1 %v4667_v52, %s6650_s3 }
 0x6b7   : > { %4701 = vrot.lane.b32.xlu1 %v4667_v52, %s6651_s0 }
 0x6bb   : > { %4680 = vrot.lane.b32.xlu1 %v4672_v36, %s6649_s28 }
 0x721   : > { %v4688_v54 = vpop.permute.xlu1 %4687 }
 0x722   : > { %v7389_v55 = vmul.f32 %v4688_v54, %v4667_v52 }
 0x724   : > { %4720 = vrot.lane.b32.xlu1 %v7389_v55, %s6652_s21 }
 0x725   : > { %v4692_v56 = vpop.permute.xlu1 %4691 }
 0x726   : > { %v4694_v57 = vmul.f32 %v4692_v56, %v4667_v52 }
 0x728   : > { %4713 = vrot.lane.b32.xlu1 %v4672_v36, %s6651_s0 }
 0x729   : > { %v4702_v58 = vpop.permute.xlu1 %4701 }
 0x72a   : > { %v4704_v59 = vmul.f32 %v4702_v58, %v4667_v52 }
 0x72c   : > { %4696 = vrot.lane.b32.xlu1 %v4694_v57, %s6653_s2 }
 0x72d   : > { %v4681_v61 = vpop.permute.xlu1 %4680 }
 0x72e   : > { %v4683_v32 = vadd.f32 %v4681_v61, %v4672_v36 }
 0x730   : > { %4706 = vrot.lane.b32.xlu1 %v4704_v59, %s6653_s2 }
 0x73f   : > { %v4676_v60 = vpop.xlane.xlu0 %4675 }
 0x740   : > { %6471 = vrcp.f32 %v4676_v60 }
 0x74a   : > { %v6472_v62 = vpop.eup %6471 }
 0x74b   : > { %v7396_v7 = vmul.f32 2.0, %v6472_v62 }
 0x74d   : > { %v4684_v4 = vmul.f32 %v4683_v32, %v7396_v7 }
 0x74f   : > { %v4685_v15 = vsub.f32 1.0, %v4684_v4 }
 0x751   : > { %4730 = vrot.lane.b32.xlu1 %v4685_v15, %s6651_s0  ;;  %v4781_v8 = vrot.slane %v4685_v15, %v6951_v46 }
 0x753   : > { %5094 = vrot.lane.b32.xlu0 %v4781_v8, %s6653_s2 }
 0x757   : > { %4783 = vrot.lane.b32.xlu0 %v4781_v8, %s6651_s0 }
 0x796   : > { %v4721_v22 = vpop.permute.xlu1 %4720 }
 0x797   : > { %v4727_v63 = vadd.f32 %v4721_v22, %v7389_v55  ;;  %v4723_v41 = vsub.f32 %v7389_v55, %v4721_v22 }
 0x799   : > { %v4728_v28 = vmul.f32 %v4727_v63, %v7396_v7  ;;  %v4724_v11 = vmul.f32 %v4723_v41, %v7396_v7 }
 0x79a   : > { %v4714_v12 = vpop.permute.xlu1 %4713 }
 0x79b   : > { %v4716_v13 = vadd.f32 %v4714_v12, %v4672_v36  ;;  %v4973_v25 = vrot.slane %v4728_v28, %v6951_v46  ;;  %v5041_v35 = vrot.slane %v4724_v11, %v6951_v46 }
 0x79d   : > { %v4717_v14 = vmul.f32 %v4716_v13, %v7396_v7  ;;  %v4975_v45 = vmul.f32 %v7407_v19, %v4973_v25  ;;  %v4977_v48 = vmul.f32 %v7416_v20, %v4973_v25  ;;  %v4979_v36 = vmul.f32 %v7426_v24, %v4973_v25 }
 0x79e   : > { %v4697_v43 = vpop.permute.xlu1 %4696  ;;  %v4974_v57 = vmul.f32 %v7412_v1, %v4973_v25  ;;  %v4978_v61 = vmul.f32 %v7434_v0, %v4973_v25  ;;  %v4980_v62 = vmul.f32 %v7449_v37, %v4973_v25 }
 0x79f   : > { %v4718_v17 = vsub.f32 1.0, %v4717_v14  ;;  %v4699_v42 = vsub.f32 %v7389_v55, %v4697_v43  ;;  %v4711_v29 = vadd.f32 %v4697_v43, %v7389_v55 }
 0x7a1   : > { %v4921_v33 = vrot.slane %v4718_v17, %v6951_v46  ;;  %4742 = vrot.lane.b32.xlu1 %v4718_v17, %s6654_s26  ;;  %v7446_v40 = vmul.f32 %v4699_v42, %v7396_v7  ;;  %v4712_v38 = vmul.f32 %v4711_v29, %v7396_v7 }
 0x7a2   : > { %v4707_v6 = vpop.permute.xlu1 %4706 }
 0x7a3   : > { %v4923_v16 = vmul.f32 %v7407_v19, %v4921_v33  ;;  %v4922_v18 = vmul.f32 %v7412_v1, %v4921_v33  ;;  %v4925_v21 = vmul.f32 %v7416_v20, %v4921_v33  ;;  %v4924_v47 = vmul.f32 %v7422_v51, %v4921_v33 }
 0x7a4   : > { %v4927_v10 = vmul.f32 %v7426_v24, %v4921_v33  ;;  %v4926_v23 = vmul.f32 %v7434_v0, %v4921_v33  ;;  %v4929_v2 = vmul.f32 %v7438_v26, %v4921_v33  ;;  %v4709_v30 = vadd.f32 %v4707_v6, %v4704_v59 }
 0x7a5   : > { %4757 = vrot.lane.b32.xlu1 %v4685_v15, %s6655_s23  ;;  %4940 = vrot.lane.b32.xlu0 %v4923_v16, %s6649_s28  ;;  %v4725_v31 = vsub.f32 %v4704_v59, %v4707_v6  ;;  %v4928_v5 = vmul.f32 %v7449_v37, %v4921_v33  ;;  %v4905_v27 = vrot.slane %v7446_v40, %v6951_v46  ;;  %s6569_s23 = sshll.u32 %s6657_s1, 4  ;;  %s6570_s23 = int_to_ptr.vmem [resolvable:$false] %s6569_s23 }
 0x7a6   : > { %v4710_v3 = vmul.f32 %v4709_v30, %v7396_v7  ;;  %v7462_v9 = vrot.slane %v4712_v38, %v6951_v46  ;;  %v4976_v59 = vmul.f32 %v7422_v51, %v4973_v25 }
 0x7a7   : > { %v4726_v39 = vmul.f32 %v4725_v31, %v7396_v7 }
 0x7a8   : > { %v4799_v44 = vmul.f32 %v7407_v19, %v7462_v9  ;;  %v4801_v34 = vmul.f32 %v7416_v20, %v7462_v9  ;;  %v5025_v49 = vrot.slane %v4710_v3, %v6951_v46  ;;  %v4798_v52 = vmul.f32 %v7412_v1, %v7462_v9 }
 0x7a9   : > { %4938 = vrot.lane.b32.xlu1 %v4922_v18, %s6649_s28  ;;  %4944 = vrot.lane.b32.xlu0 %v4925_v21, %s6649_s28  ;;  %v4849_v50 = vrot.slane %v4726_v39, %v6951_v46  ;;  %v4800_v53 = vmul.f32 %v7422_v51, %v7462_v9  ;;  %v4981_v46 = vmul.f32 %v7438_v26, %v4973_v25 }
 0x7aa   : > { %v4802_v55 = vmul.f32 %v7434_v0, %v7462_v9 }
 0x7ad   : > { %4942 = vrot.lane.b32.xlu1 %v4924_v47, %s6649_s28  ;;  %4948 = vrot.lane.b32.xlu0 %v4927_v10, %s6649_s28 }
 0x7b1   : > { %4946 = vrot.lane.b32.xlu1 %v4926_v23, %s6649_s28  ;;  %4952 = vrot.lane.b32.xlu0 %v4929_v2, %s6649_s28 }
 0x7b5   : > { %4950 = vrot.lane.b32.xlu1 %v4928_v5, %s6649_s28  ;;  %4754 = vrot.lane.b32.xlu0 %v4728_v28, %s6656_s20 }
 0x7b9   : > { %4734 = vrot.lane.b32.xlu1 %v4710_v3, %s6653_s2  ;;  %4907 = vrot.lane.b32.xlu0 %v4905_v27, %s6649_s28 }
 0x7bd   : > { %4738 = vrot.lane.b32.xlu1 %v4712_v38, %s6652_s21  ;;  %4851 = vrot.lane.b32.xlu0 %v4849_v50, %s6653_s2 }
 0x7c1   : > { %4746 = vrot.lane.b32.xlu1 %v4724_v11, %s6654_s26  ;;  %4816 = vrot.lane.b32.xlu0 %v4799_v44, %s6649_s28 }
 0x7c3   : > { %v4731_v15 = vpop.permute.xlu1 %4730 }
 0x7c4   : > { %v4761_v10 = vsel %vm4760_vm2, %v4731_v15, %v7446_v40 }
 0x7c5   : > { %4750 = vrot.lane.b32.xlu1 %v4726_v39, %s6656_s20  ;;  %4820 = vrot.lane.b32.xlu0 %v4801_v34, %s6649_s28  ;;  %v7492_v54 = vpop.permute.xlu0 %5094  ;;  %s6571_s20 = scalar_lea.vmem %s6570_s23, 32 }
 0x7c6   : > { %v5098_v56 = vmul.f32 %v7407_v19, %v7492_v54  ;;  %v5100_v58 = vmul.f32 %v7416_v20, %v7492_v54  ;;  %v5102_v60 = vmul.f32 %v7426_v24, %v7492_v54  ;;  %v5097_v32 = vmul.f32 %v7412_v1, %v7492_v54 }
 0x7c7   : > { %v5099_v7 = vmul.f32 %v7422_v51, %v7492_v54  ;;  %v5101_v4 = vmul.f32 %v7434_v0, %v7492_v54 }
 0x7c9   : > { %5043 = vrot.lane.b32.xlu1 %v5041_v35, %s6649_s28  ;;  %4992 = vrot.lane.b32.xlu0 %v4975_v45, %s6651_s0  ;;  %v7527_v13 = vpop.permute.xlu0 %4783 }
 0x7cd   : > { %5027 = vrot.lane.b32.xlu1 %v5025_v49, %s6649_s28  ;;  %4996 = vrot.lane.b32.xlu0 %v4977_v48, %s6651_s0  ;;  %v5104_v49 = vmul.f32 %v7438_v26, %v7492_v54  ;;  %v5103_v48 = vmul.f32 %v7449_v37, %v7492_v54  ;;  %v4805_v54 = vmul.f32 %v7438_v26, %v7462_v9 }
 0x7d1   : > { %4814 = vrot.lane.b32.xlu1 %v4798_v52, %s6649_s28  ;;  %5000 = vrot.lane.b32.xlu0 %v4979_v36, %s6651_s0 }
 0x7d5   : > { %4818 = vrot.lane.b32.xlu1 %v4800_v53, %s6649_s28  ;;  %5004 = vrot.lane.b32.xlu0 %v4981_v46, %s6651_s0  ;;  %v4804_v53 = vmul.f32 %v7449_v37, %v7462_v9  ;;  %v4803_v46 = vmul.f32 %v7426_v24, %v7462_v9 }
 0x7d9   : > { %4822 = vrot.lane.b32.xlu1 %v4802_v55, %s6649_s28  ;;  %5115 = vrot.lane.b32.xlu0 %v5098_v56, %s6651_s0 }
 0x7dd   : > { %4990 = vrot.lane.b32.xlu1 %v4974_v57, %s6651_s0  ;;  %5119 = vrot.lane.b32.xlu0 %v5100_v58, %s6651_s0 }
 0x7e1   : > { %4994 = vrot.lane.b32.xlu1 %v4976_v59, %s6651_s0  ;;  %5123 = vrot.lane.b32.xlu0 %v5102_v60, %s6651_s0 }
 0x7e5   : > { %4998 = vrot.lane.b32.xlu1 %v4978_v61, %s6651_s0 }
 0x7e9   : > { %5002 = vrot.lane.b32.xlu1 %v4980_v62, %s6651_s0 }
 0x7ed   : > { %5113 = vrot.lane.b32.xlu1 %v5097_v32, %s6651_s0 }
 0x7f1   : > { %5117 = vrot.lane.b32.xlu1 %v5099_v7, %s6651_s0 }
 0x7f5   : > { %5121 = vrot.lane.b32.xlu1 %v5101_v4, %s6651_s0 }
 0x813   : > { %v4743_v8 = vpop.permute.xlu1 %4742 }
 0x817   : > { %v4758_v22 = vpop.permute.xlu1 %4757  ;;  %v7531_v17 = vpop.permute.xlu0 %4940 }
 0x81b   : > { %v7525_v12 = vpop.permute.xlu1 %4938  ;;  %v7535_v16 = vpop.permute.xlu0 %4944 }
 0x81f   : > { %v7529_v14 = vpop.permute.xlu1 %4942  ;;  %v7539_v43 = vpop.permute.xlu0 %4948 }
 0x823   : > { %v7533_v33 = vpop.permute.xlu1 %4946  ;;  %v7543_v63 = vpop.permute.xlu0 %4952 }
 0x827   : > { %v7537_v18 = vpop.permute.xlu1 %4950  ;;  %v4755_v30 = vpop.permute.xlu0 %4754 }
 0x82b   : > { %v4735_v21 = vpop.permute.xlu1 %4734  ;;  %v7567_v25 = vpop.permute.xlu0 %4907 }
 0x82c   : > { %v4763_v42 = vsel %vm4762_vm3, %v4761_v10, %v4735_v21  ;;  %v4910_v32 = vmul.f32 %v7412_v1, %v7567_v25 }
 0x82e   : > { %v4962_v21 = vadd.f32 %v7525_v12, %v4910_v32  ;;  %v4914_v12 = vmul.f32 %v7434_v0, %v7567_v25 }
 0x82f   : > { %v4739_v47 = vpop.permute.xlu1 %4738  ;;  %v4852_v52 = vpop.permute.xlu0 %4851 }
 0x830   : > { %v4765_v23 = vsel %vm4764_vm4, %v4763_v42, %v4739_v47  ;;  %v4854_v56 = vmul.f32 %v7412_v1, %v4852_v52  ;;  %v4855_v58 = vmul.f32 %v7407_v19, %v4852_v52  ;;  %v4856_v59 = vmul.f32 %v7422_v51, %v4852_v52 }
 0x831   : > { %v4767_v6 = vsel %vm4766_vm5, %v4765_v23, %v4743_v8  ;;  %v4857_v9 = vmul.f32 %v7416_v20, %v4852_v52  ;;  %v4858_v62 = vmul.f32 %v7434_v0, %v4852_v52  ;;  %v4859_v4 = vmul.f32 %v7426_v24, %v4852_v52 }
 0x832   : > { %v4860_v15 = vmul.f32 %v7449_v37, %v4852_v52  ;;  %v4912_v47 = vmul.f32 %v7422_v51, %v7567_v25  ;;  %v4861_v42 = vmul.f32 %v7438_v26, %v4852_v52  ;;  %v4913_v23 = vmul.f32 %v7416_v20, %v7567_v25 }
 0x833   : > { %v4747_v2 = vpop.permute.xlu1 %4746  ;;  %v7589_v55 = vpop.permute.xlu0 %4816 }
 0x834   : > { %v4769_v28 = vsel %vm4768_vm6, %v4767_v6, %v4747_v2 }
 0x837   : > { %v4751_v29 = vpop.permute.xlu1 %4750  ;;  %v7600_v60 = vpop.permute.xlu0 %4820 }
 0x838   : > { %v4771_v31 = vsel %vm4770_vm7, %v4769_v28, %v4751_v29  ;;  %v4964_v28 = vadd.f32 %v7529_v14, %v4912_v47  ;;  %v4916_v14 = vmul.f32 %v7449_v37, %v7567_v25 }
 0x839   : > { %v4773_v40 = vsel %vm4772_vm8, %v4771_v31, %v4755_v30 }
 0x83a   : > { %v4775_v5 = vsel %vm4774_vm9, %v4773_v40, %v4758_v22  ;;  %v4911_v22 = vmul.f32 %v7407_v19, %v7567_v25  ;;  %v4915_v40 = vmul.f32 %v7426_v24, %v7567_v25 }
 0x83b   : > { %v5044_v38 = vpop.permute.xlu1 %5043  ;;  %4777 = vst.msk [vmem:[%s7550_s24] sm:$0x1] %vm4776_vm10, %v4775_v5  ;;  %v4993_v7 = vpop.permute.xlu0 %4992  ;;  %v4965_v5 = vadd.f32 %v7535_v16, %v4913_v23  ;;  %v4968_v16 = vadd.f32 %v7537_v18, %v4916_v14 }
 0x83c   : > { %v5047_v3 = vmul.f32 %v7407_v19, %v5044_v38  ;;  %v5046_v39 = vmul.f32 %v7412_v1, %v5044_v38  ;;  %v5049_v27 = vmul.f32 %v7416_v20, %v5044_v38  ;;  %v5048_v41 = vmul.f32 %v7422_v51, %v5044_v38 }
 0x83d   : > { %v5051_v11 = vmul.f32 %v7426_v24, %v5044_v38  ;;  %v5050_v44 = vmul.f32 %v7434_v0, %v5044_v38  ;;  %v5053_v34 = vmul.f32 %v7438_v26, %v5044_v38  ;;  %v5052_v35 = vmul.f32 %v7449_v37, %v5044_v38 }
 0x83e   : > { %5064 = vrot.lane.b32.xlu0 %v5047_v3, %s6649_s28  ;;  %5062 = vrot.lane.b32.xlu1 %v5046_v39, %s6649_s28  ;;  %v4963_v6 = vadd.f32 %v7531_v17, %v4911_v22  ;;  %v4966_v38 = vadd.f32 %v7533_v33, %v4914_v12 }
 0x83f   : > { %v7561_v50 = vpop.permute.xlu1 %5027  ;;  %v4997_v2 = vpop.permute.xlu0 %4996 }
 0x840   : > { %v5015_v30 = vadd.f32 %v4993_v7, %v4963_v6  ;;  %v5017_v3 = vadd.f32 %v4997_v2, %v4965_v5  ;;  %v5033_v32 = vmul.f32 %v7416_v20, %v7561_v50  ;;  %v5034_v47 = vmul.f32 %v7434_v0, %v7561_v50 }
 0x842   : > { %5068 = vrot.lane.b32.xlu0 %v5049_v27, %s6649_s28  ;;  %5066 = vrot.lane.b32.xlu1 %v5048_v41, %s6649_s28  ;;  %v4967_v41 = vadd.f32 %v7539_v43, %v4915_v40 }
 0x843   : > { %v7571_v45 = vpop.permute.xlu1 %4814  ;;  %v5001_v17 = vpop.permute.xlu0 %5000 }
 0x844   : > { %v5019_v33 = vadd.f32 %v5001_v17, %v4967_v41 }
 0x846   : > { %5072 = vrot.lane.b32.xlu0 %v5051_v11, %s6649_s28  ;;  %5070 = vrot.lane.b32.xlu1 %v5050_v44, %s6649_s28  ;;  %v4917_v11 = vmul.f32 %v7438_v26, %v7567_v25 }
 0x847   : > { %v7581_v36 = vpop.permute.xlu1 %4818 }
 0x84a   : > { %5076 = vrot.lane.b32.xlu0 %v5053_v34, %s6649_s28  ;;  %5074 = vrot.lane.b32.xlu1 %v5052_v35, %s6649_s28  ;;  %v5005_v34 = vpop.permute.xlu0 %5004  ;;  %v4969_v35 = vadd.f32 %v7543_v63, %v4917_v11 }
 0x84b   : > { %v7594_v57 = vpop.permute.xlu1 %4822 }
 0x84e   : > { %5127 = vrot.lane.b32.xlu0 %v5104_v49, %s6651_s0  ;;  %5125 = vrot.lane.b32.xlu1 %v5103_v48, %s6651_s0  ;;  %v5021_v49 = vadd.f32 %v5005_v34, %v4969_v35  ;;  %v5116_v43 = vpop.permute.xlu0 %5115 }
 0x84f   : > { %v4991_v61 = vpop.permute.xlu1 %4990 }
 0x850   : > { %v5014_v10 = vadd.f32 %v4991_v61, %v4962_v21 }
 0x852   : > { %4826 = vrot.lane.b32.xlu0 %v4804_v53, %s6649_s28  ;;  %4824 = vrot.lane.b32.xlu1 %v4803_v46, %s6649_s28  ;;  %v5120_v48 = vpop.permute.xlu0 %5119  ;;  %v5030_v46 = vmul.f32 %v7412_v1, %v7561_v50 }
 0x853   : > { %v4995_v8 = vpop.permute.xlu1 %4994 }
 0x854   : > { %v5016_v31 = vadd.f32 %v4995_v8, %v4964_v28 }
 0x856   : > { %4828 = vrot.lane.b32.xlu1 %v4805_v54, %s6649_s28  ;;  %4870 = vrot.lane.b32.xlu0 %v4854_v56, %s6651_s0  ;;  %v5124_v52 = vpop.permute.xlu0 %5123  ;;  %v5031_v54 = vmul.f32 %v7407_v19, %v7561_v50  ;;  %s7839_s28 = sld [smem:[#allocation25_spill]] }
 0x857   : > { %v4999_v29 = vpop.permute.xlu1 %4998 }
 0x858   : > { %v5018_v39 = vadd.f32 %v4999_v29, %v4966_v38 }
 0x85a   : > { %4872 = vrot.lane.b32.xlu1 %v4855_v58, %s6651_s0  ;;  %4874 = vrot.lane.b32.xlu0 %v4856_v59, %s6651_s0 }
 0x85b   : > { %v5003_v27 = vpop.permute.xlu1 %5002 }
 0x85c   : > { %v5020_v44 = vadd.f32 %v5003_v27, %v4968_v16  ;;  %s7664_s3 = scalar_lea.hbm %s7839_s28, %s5791_s19 }
 0x85e   : > { %4876 = vrot.lane.b32.xlu1 %v4857_v9, %s6651_s0  ;;  %4878 = vrot.lane.b32.xlu0 %v4858_v62, %s6651_s0  ;;  %v5032_v62 = vmul.f32 %v7422_v51, %v7561_v50 }
 0x85f   : > { %v5114_v25 = vpop.permute.xlu1 %5113 }
 0x862   : > { %4880 = vrot.lane.b32.xlu1 %v4859_v4, %s6651_s0  ;;  %4882 = vrot.lane.b32.xlu0 %v4860_v15, %s6651_s0 }
 0x863   : > { %v5118_v18 = vpop.permute.xlu1 %5117 }
 0x866   : > { %4884 = vrot.lane.b32.xlu1 %v4861_v42, %s6651_s0  ;;  %5153 = vrot.lane.b32.xlu0 %v5014_v10, %s6653_s2  ;;  %v5035_v10 = vmul.f32 %v7426_v24, %v7561_v50  ;;  %s5251_s0 = sshll.u32 %s7550_s24, 4  ;;  %s5252_s0 = int_to_ptr.vmem [resolvable:$true] %s5251_s0 }
 0x867   : > { %v5122_v53 = vpop.permute.xlu1 %5121  ;;  %s6565_s26 = scalar_lea.vmem %s5252_s0, 16  ;;  %p6572_p4 = scmp.lt.s32.totalorder %s5252_s0, %s6570_s23 }
 0x868   : > { %p6566_p12 = scmp.ne.s32.totalorder %s5252_s0, %s6565_s26  ;;  %p6573_p7 = scmp.lt.s32.totalorder %s6571_s20, %s6565_s26 }
 0x86a   : > { %5157 = vrot.lane.b32.xlu0 %v5016_v31, %s6653_s2  ;;  %5155 = vrot.lane.b32.xlu1 %v5015_v30, %s6653_s2  ;;  %p6567_p2 = pnand %p6566_p12, %p7840_p1  ;;  %p6574_p8 = por %p6573_p7, %p6572_p4 }
 0x86c   : > { %p6568_p3 = pneg %p6567_p2 }
 0x86e   : > { %5161 = vrot.lane.b32.xlu0 %v5018_v39, %s6653_s2  ;;  %5159 = vrot.lane.b32.xlu1 %v5017_v3, %s6653_s2  ;;  %p6575_p11 = pnand %p6574_p8, %p6568_p3 }
 0x872   : > { %5165 = vrot.lane.b32.xlu0 %v5020_v44, %s6653_s2  ;;  %5163 = vrot.lane.b32.xlu1 %v5019_v33, %s6653_s2 }
 0x876   : > { %5167 = vrot.lane.b32.xlu1 %v5021_v49, %s6653_s2  ;;  %s5234_s2 = scalar_lea.sflag [#allocation4], %s638_s29 }
 0x8b0   : > { %v5063_v63 = vpop.permute.xlu1 %5062  ;;  %v5065_v56 = vpop.permute.xlu0 %5064 }
 0x8b1   : > { %v5086_v58 = vadd.f32 %v5063_v63, %v5030_v46  ;;  %v5087_v59 = vadd.f32 %v5065_v56, %v5031_v54 }
 0x8b3   : > { %v5137_v61 = vadd.f32 %v5114_v25, %v5086_v58  ;;  %v5138_v9 = vadd.f32 %v5116_v43, %v5087_v59 }
 0x8b4   : > { %v5067_v7 = vpop.permute.xlu1 %5066  ;;  %v5069_v4 = vpop.permute.xlu0 %5068 }
 0x8b5   : > { %v5088_v15 = vadd.f32 %v5067_v7, %v5032_v62  ;;  %v5089_v8 = vadd.f32 %v5069_v4, %v5033_v32  ;;  %5185 = vrot.lane.b32.xlu0 %v5137_v61, %s6652_s21  ;;  %5187 = vrot.lane.b32.xlu1 %v5138_v9, %s6652_s21 }
 0x8b7   : > { %v5139_v22 = vadd.f32 %v5118_v18, %v5088_v15  ;;  %v5140_v21 = vadd.f32 %v5120_v48, %v5089_v8 }
 0x8b8   : > { %v5071_v42 = vpop.permute.xlu1 %5070  ;;  %v5073_v23 = vpop.permute.xlu0 %5072 }
 0x8b9   : > { %v5090_v2 = vadd.f32 %v5071_v42, %v5034_v47  ;;  %v5091_v6 = vadd.f32 %v5073_v23, %v5035_v10  ;;  %5189 = vrot.lane.b32.xlu0 %v5139_v22, %s6652_s21  ;;  %5191 = vrot.lane.b32.xlu1 %v5140_v21, %s6652_s21 }
 0x8ba   : > { %6578 = shalt.err (!%p6575_p11)
}
 0x8bb   : > { %s6579_s25 = scalar_lea.hbm %s7664_s3, 16  ;;  %s6583_s19 = scalar_lea.hbm %s7839_s28, 32 }
 0x8bc   : > { %p6580_p13 = scmp.ne.s32.totalorder %s7664_s3, %s6579_s25  ;;  %p6584_p6 = scmp.lt.u32.totalorder %s7664_s3, %s7839_s28 }
 0x8bd   : > { %p6585_p9 = scmp.lt.u32.totalorder %s6583_s19, %s6579_s25  ;;  %p6587_p12 = scmp.lt.u32.totalorder %s6579_s25, %s7664_s3 }
 0x8be   : > { %p6581_p5 = pnand %p6580_p13, %p7840_p1 }
 0x8bf   : > { %p6586_p10 = por %p6585_p9, %p6584_p6 }
 0x8c0   : > { %p6582_p0 = pneg %p6581_p5 }
 0x8c1   : > { %p6588_p2 = por %p6587_p12, %p6586_p10 }
 0x8c3   : > { %p6589_p3 = pnand %p6588_p2, %p6582_p0 }
 0x8c5   : > { %6592 = shalt.err (!%p6589_p3)
}
 0x8c6   : > { %5882 = dma.vmem_to_hbm [thread:$0]  (%p7840_p1), %s5252_s0, 16, %s7664_s3, %s5234_s2   ;;  %v5141_v28 = vadd.f32 %v5122_v53, %v5090_v2  ;;  %v5142_v12 = vadd.f32 %v5124_v52, %v5091_v6  ;;  %v5075_v29 = vpop.permute.xlu1 %5074  ;;  %v5077_v30 = vpop.permute.xlu0 %5076  ;;  %v5036_v31 = vmul.f32 %v7449_v37, %v7561_v50  ;;  %v5037_v40 = vmul.f32 %v7438_v26, %v7561_v50 }
 0x8c7   : > { %v4787_v54 = vmul.f32 %v7407_v19, %v7527_v13  ;;  %v4786_v63 = vmul.f32 %v7412_v1, %v7527_v13  ;;  %v4789_v9 = vmul.f32 %v7416_v20, %v7527_v13  ;;  %v4788_v62 = vmul.f32 %v7422_v51, %v7527_v13  ;;  %s7841_s3 = sld [smem:[#allocation26_spill]] }
 0x8c8   : > { %5193 = vrot.lane.b32.xlu0 %v5141_v28, %s6652_s21  ;;  %5195 = vrot.lane.b32.xlu1 %v5142_v12, %s6652_s21  ;;  %v5092_v5 = vadd.f32 %v5075_v29, %v5036_v31  ;;  %v5093_v38 = vadd.f32 %v5077_v30, %v5037_v40  ;;  %v4790_v8 = vmul.f32 %v7434_v0, %v7527_v13 }
 0x8c9   : > { %v4839_v56 = vadd.f32 %v7589_v55, %v4787_v54  ;;  %v4838_v58 = vadd.f32 %v7571_v45, %v4786_v63  ;;  %v4841_v19 = vadd.f32 %v7600_v60, %v4789_v9  ;;  %v4840_v1 = vadd.f32 %v7581_v36, %v4788_v62 }
 0x8ca   : > { %v5126_v14 = vpop.permute.xlu1 %5125  ;;  %v5128_v17 = vpop.permute.xlu0 %5127  ;;  %v4791_v22 = vmul.f32 %v7426_v24, %v7527_v13  ;;  %v4842_v21 = vadd.f32 %v7594_v57, %v4790_v8  ;;  %v4792_v57 = vmul.f32 %v7449_v37, %v7527_v13  ;;  %v4793_v12 = vmul.f32 %v7438_v26, %v7527_v13 }
 0x8cb   : > { %v5143_v3 = vadd.f32 %v5126_v14, %v5092_v5  ;;  %v5144_v39 = vadd.f32 %v5128_v17, %v5093_v38 }
 0x8cd   : > { %5197 = vrot.lane.b32.xlu0 %v5143_v3, %s6652_s21  ;;  %5199 = vrot.lane.b32.xlu1 %v5144_v39, %s6652_s21  ;;  %s7711_s0 = scalar_lea.vmem %s7841_s3, %s5794_s22 }
 0x8ce   : > { %v4825_v27 = vpop.permute.xlu1 %4824  ;;  %v4827_v41 = vpop.permute.xlu0 %4826 }
 0x8cf   : > { %v4843_v47 = vadd.f32 %v4825_v27, %v4791_v22  ;;  %v4844_v14 = vadd.f32 %v4827_v41, %v4792_v57 }
 0x8d2   : > { %v4829_v11 = vpop.permute.xlu1 %4828  ;;  %v4871_v16 = vpop.permute.xlu0 %4870 }
 0x8d3   : > { %v4894_v32 = vadd.f32 %v4871_v16, %v4838_v58  ;;  %v4845_v17 = vadd.f32 %v4829_v11, %v4793_v12 }
 0x8d6   : > { %v4873_v33 = vpop.permute.xlu1 %4872  ;;  %v4875_v50 = vpop.permute.xlu0 %4874 }
 0x8d7   : > { %v4895_v7 = vadd.f32 %v4873_v33, %v4839_v56  ;;  %v4896_v60 = vadd.f32 %v4875_v50, %v4840_v1 }
 0x8da   : > { %v4877_v44 = vpop.permute.xlu1 %4876  ;;  %v4879_v34 = vpop.permute.xlu0 %4878 }
 0x8db   : > { %v4897_v36 = vadd.f32 %v4877_v44, %v4841_v19  ;;  %v4898_v6 = vadd.f32 %v4879_v34, %v4842_v21 }
 0x8de   : > { %v4881_v35 = vpop.permute.xlu1 %4880  ;;  %v4883_v49 = vpop.permute.xlu0 %4882 }
 0x8df   : > { %v4899_v28 = vadd.f32 %v4881_v35, %v4843_v47  ;;  %v4900_v37 = vadd.f32 %v4883_v49, %v4844_v14 }
 0x8e2   : > { %v4885_v43 = vpop.permute.xlu1 %4884  ;;  %v5154_v25 = vpop.permute.xlu0 %5153 }
 0x8e3   : > { %v5209_v45 = vsel %vm4760_vm2, %v4894_v32, %v5154_v25  ;;  %v4901_v26 = vadd.f32 %v4885_v43, %v4845_v17 }
 0x8e6   : > { %v5156_v48 = vpop.permute.xlu1 %5155  ;;  %v5158_v18 = vpop.permute.xlu0 %5157 }
 0x8e7   : > { %v5210_v20 = vsel %vm4760_vm2, %v4895_v7, %v5156_v48  ;;  %v5211_v10 = vsel %vm4760_vm2, %v4896_v60, %v5158_v18 }
 0x8ea   : > { %v5160_v52 = vpop.permute.xlu1 %5159  ;;  %v5162_v53 = vpop.permute.xlu0 %5161 }
 0x8eb   : > { %v5212_v42 = vsel %vm4760_vm2, %v4897_v36, %v5160_v52  ;;  %v5213_v29 = vsel %vm4760_vm2, %v4898_v6, %v5162_v53 }
 0x8ee   : > { %v5164_v46 = vpop.permute.xlu1 %5163  ;;  %v5166_v59 = vpop.permute.xlu0 %5165 }
 0x8ef   : > { %v5214_v30 = vsel %vm4760_vm2, %v4899_v28, %v5164_v46  ;;  %v5215_v13 = vsel %vm4760_vm2, %v4900_v37, %v5166_v59 }
 0x8f2   : > { %v5168_v61 = vpop.permute.xlu1 %5167 }
 0x8f3   : > { %v5216_v3 = vsel %vm4760_vm2, %v4901_v26, %v5168_v61 }
 0x927   : > { %v5188_v55 = vpop.permute.xlu1 %5187  ;;  %v5186_v51 = vpop.permute.xlu0 %5185 }
 0x928   : > { %v5218_v4 = vsel %vm4762_vm3, %v5210_v20, %v5188_v55  ;;  %v5217_v15 = vsel %vm4762_vm3, %v5209_v45, %v5186_v51 }
 0x929   : > { %5226 = vst.msk [vmem:[%s7711_s0 + $0x8] sm:$0xff] %vm4764_vm4, %v5218_v4  ;;  %5225 = vst.msk [vmem:[%s7711_s0] sm:$0xff] %vm4764_vm4, %v5217_v15 }
 0x92b   : > { %v5192_v23 = vpop.permute.xlu1 %5191  ;;  %v5190_v0 = vpop.permute.xlu0 %5189 }
 0x92c   : > { %v5220_v2 = vsel %vm4762_vm3, %v5212_v42, %v5192_v23  ;;  %v5219_v24 = vsel %vm4762_vm3, %v5211_v10, %v5190_v0 }
 0x92d   : > { %5228 = vst.msk [vmem:[%s7711_s0 + $0x18] sm:$0xff] %vm4764_vm4, %v5220_v2  ;;  %5227 = vst.msk [vmem:[%s7711_s0 + $0x10] sm:$0xff] %vm4764_vm4, %v5219_v24 }
 0x93a   : > { %v5196_v31 = vpop.permute.xlu1 %5195  ;;  %v5194_v40 = vpop.permute.xlu0 %5193 }
 0x93b   : > { %v5222_v5 = vsel %vm4762_vm3, %v5214_v30, %v5196_v31  ;;  %v5221_v38 = vsel %vm4762_vm3, %v5213_v29, %v5194_v40 }
 0x93c   : > { %5230 = vst.msk [vmem:[%s7711_s0 + $0x28] sm:$0xff] %vm4764_vm4, %v5222_v5  ;;  %5229 = vst.msk [vmem:[%s7711_s0 + $0x20] sm:$0xff] %vm4764_vm4, %v5221_v38 }
 0x93f   : > { %v5200_v39 = vpop.permute.xlu1 %5199  ;;  %v5198_v27 = vpop.permute.xlu0 %5197 }
 0x940   : > { %v5224_v16 = vsel %vm4762_vm3, %v5216_v3, %v5200_v39  ;;  %v5223_v33 = vsel %vm4762_vm3, %v5215_v13, %v5198_v27 }
 0x941   : > { %5232 = vst.msk [vmem:[%s7711_s0 + $0x38] sm:$0xff] %vm4764_vm4, %v5224_v16  ;;  %5231 = vst.msk [vmem:[%s7711_s0 + $0x30] sm:$0xff] %vm4764_vm4, %v5223_v33 }
 0x942 PF: > { %s7842_s27 = sld [smem:[#allocation15_spill]]  ;;  %s7843_s22 = sld [smem:[#allocation12_spill]] }
 0x943   : > { %s7844_s2 = sld [smem:[#allocation19_spill]] }
 0x948   : > { %p5904_p1 = scmp.ge.s32.totalorder %s7842_s27, 2  ;;  %s5266_s26 = sand.u32 1, %s7843_s22  }
 0x949   : > { %p7845_p4 = scmp.ne.s32.totalorder %s7844_s2, 0  ;;  %s5267_s1 = scalar_lea.sflag [#allocation4], %s5266_s26 }
 0x94b   : > { %p5895_p7 = pnand %p5904_p1, %p7845_p4 }
 0x94d   : > { %6618 = dma.done.wait (!%p5895_p7), %s5267_s1, 16  }
 0x94e   : > { %6620 = vsyncadd (!%p5895_p7), %s5267_s1, 4294967280  ;;  %s7846_s21 = sld [smem:[#allocation16_spill]]  ;;  %s7847_s0 = sld [smem:[#allocation13_spill]] }
 0x94f   : > { %s7848_s30 = sld [smem:[#allocation14_spill]]  ;;  %s7849_s20 = sld [smem:[#allocation17_spill]] }
 0x954   : > { %p32_p8 = scmp.ge.s32.totalorder %s7846_s21, 4  }
 0x956   :  { %34 = sbr.rel (!%p32_p8) target bundleno = 13 (0xd), region = 152 }
 0x95d   :  { %5279 = vsyncpa [#allocation3], 1 }
 0x95e   :  { %5281 = vsyncpa [#allocation3 + $0x1], 1 }
 0x95f   :  { %5282 = vsyncpa [#allocation6], 1 }
 0x960   :  { %5283 = vsyncpa [#allocation4], 1 }
 0x961   :  { %5285 = vsyncpa [#allocation4 + $0x1], 1 }

</bundles_post_ra>
